<compile_context>
chip_gen: v6e
topology: v6e:2x2x1
jax: 0.10.0
libtpu: 0.0.40
codegen_flags: <defaults>
</compile_context>

<pallas_src>
import functools
import math

import jax
import jax.numpy as jnp
from jax.experimental import pallas as pl
from jax.experimental.pallas import tpu as pltpu

# ----------------------- reduced Hubert-large style config -----------------------
BATCH = 2
AUDIO_LEN = 400
CONV_DIM = (64, 64, 64)          # real model: (512,)*7
CONV_KERNEL = (10, 3, 3)         # real model: (10,3,3,3,3,2,2)
CONV_STRIDE = (5, 2, 2)          # real model: (5,2,2,2,2,2,2)
HIDDEN = 128                     # real model: 1024
NUM_HEADS = 4                    # real model: 16
INTERMEDIATE = 256               # real model: 4096
NUM_LAYERS = 2                   # real model: 24
POS_KERNEL = 16                  # real model: 128 (even -> SamePad removes last step)
POS_GROUPS = 4                   # real model: 16
LN_EPS = 1e-4                    # config.layer_norm_eps set to 0.0001 by the module
CONV_LN_EPS = 1e-5               # nn.LayerNorm default inside the conv feature extractor

# Tile-size targets (v5e/v6e friendly; halve MM_TM/MM_TN for v7x's 64 MiB VMEM).
# Small problems collapse to a single tile automatically; double-buffered
# footprints at these sizes stay well under the default scoped-VMEM limit, so
# vmem_limit_bytes is left at its default.
MM_TM, MM_TN, MM_TK = 256, 256, 512
LN_TM = 512

_SQRT_2_OVER_PI = 0.7978845608028654


# ------------------------------- in-kernel helpers -------------------------------
def _gelu(x):
    # TODO(synk): PyTorch nn.GELU() is exact erf-GELU; use tanh approximation here
    # (erf has no guaranteed Mosaic lowering).  Kept in f32 (v5e VPU/EUP are f32-only).
    return 0.5 * x * (1.0 + jnp.tanh(_SQRT_2_OVER_PI * (x + 0.044715 * x * x * x)))


def _round_up(x, m):
    return (x + m - 1) // m * m


# --------------------------------- Pallas kernels --------------------------------
def _matmul_kernel(*refs, activation, has_residual):
    """K-tiled matmul: bias [+ GELU] [+ residual] fused into the epilogue."""
    if has_residual:
        x_ref, w_ref, b_ref, r_ref, o_ref, acc_ref = refs
    else:
        x_ref, w_ref, b_ref, o_ref, acc_ref = refs
        r_ref = None

    @pl.when(pl.program_id(2) == 0)
    def _():
        acc_ref[...] = jnp.zeros_like(acc_ref)

    acc_ref[...] += jnp.dot(x_ref[...], w_ref[...],
                            preferred_element_type=jnp.float32)

    @pl.when(pl.program_id(2) == pl.num_programs(2) - 1)
    def _():
        y = acc_ref[...] + b_ref[...]                 # (1, tn) broadcasts over (tm, tn)
        if activation == "gelu":
            y = _gelu(y)
        if has_residual:
            y = y + r_ref[...]
        o_ref[...] = y.astype(o_ref.dtype)


def _ln_matmul_kernel(x_ref, g_ref, bt_ref, w_ref, b_ref, o_ref, *, eps, activation):
    """Fused LayerNorm (over full K, f32) -> matmul (bf16 MXU) [+ GELU]."""
    x = x_ref[...]                                    # (tm, K) f32
    mean = jnp.mean(x, axis=-1, keepdims=True)
    var = jnp.mean((x - mean) ** 2, axis=-1, keepdims=True)   # biased, like torch LN
    xn = (x - mean) * jax.lax.rsqrt(var + eps) * g_ref[...] + bt_ref[...]
    y = jnp.dot(xn.astype(jnp.bfloat16), w_ref[...],
                preferred_element_type=jnp.float32) + b_ref[...]
    if activation == "gelu":
        y = _gelu(y)
    o_ref[...] = y


def _layernorm_kernel(x_ref, g_ref, b_ref, o_ref, *, eps, activation):
    x = x_ref[...]
    mean = jnp.mean(x, axis=-1, keepdims=True)
    var = jnp.mean((x - mean) ** 2, axis=-1, keepdims=True)
    y = (x - mean) * jax.lax.rsqrt(var + eps) * g_ref[...] + b_ref[...]
    if activation == "gelu":
        y = _gelu(y)
    o_ref[...] = y


def _attention_oproj_kernel(q_ref, k_ref, v_ref, wo_ref, bo_ref, r_ref, o_ref,
                            *, num_heads, scale):
    """All heads of one batch element, fused with the output projection, its
    bias and the residual add.  In/out are lane-dense (T, H) slabs; the output
    is written with a single unmasked store (no per-head sub-128-lane writes).

    TODO(synk): for real-model sequence lengths convert to a flash-style
    online-softmax with a KV grid axis (bounds VMEM on v7x's 64 MiB).
    """
    T, H = q_ref.shape
    dh = H // num_heads
    q = q_ref[...]                                    # (T, H) bf16
    k = k_ref[...]
    v = v_ref[...]
    wo = wo_ref[...]                                  # (H, H) bf16
    acc = jnp.zeros((T, H), jnp.float32)
    for h in range(num_heads):                        # static unroll over heads
        sl = slice(h * dh, (h + 1) * dh)
        qh, kh, vh = q[:, sl], k[:, sl], v[:, sl]     # (T, dh)
        s = jax.lax.dot_general(qh, kh, (((1,), (1,)), ((), ())),
                                preferred_element_type=jnp.float32) * scale   # (T, T)
        s = s - jnp.max(s, axis=-1, keepdims=True)
        p = jnp.exp(s)
        p = p * pl.reciprocal(jnp.sum(p, axis=-1, keepdims=True), approx=True)
        ctx = jax.lax.dot_general(p.astype(vh.dtype), vh, (((1,), (0,)), ((), ())),
                                  preferred_element_type=jnp.float32)         # (T, dh)
        # per-head slice of the output projection -> accumulate into (T, H)
        acc = acc + jnp.dot(ctx.astype(jnp.bfloat16), wo[sl, :],
                            preferred_element_type=jnp.float32)
    o_ref[...] = (acc + bo_ref[...] + r_ref[...]).astype(o_ref.dtype)


# -------------------------------- Pallas wrappers ---------------------------------
def matmul_fused(x, w, b, *, activation=None, residual=None,
                 tm=MM_TM, tn=MM_TN, tk=MM_TK):
    """(M,K)@(K,N) + bias [+GELU] [+residual].  bf16 operands, f32 accumulation.
    Dims are zero-padded to tile multiples (lane dims to multiples of 128)."""
    M, K = x.shape
    Kw, N = w.shape
    assert Kw == K
    Mp, Kp, Np = _round_up(M, 8), _round_up(K, 128), _round_up(N, 128)
    tm, tk, tn = min(tm, Mp), min(tk, Kp), min(tn, Np)
    Mp, Kp, Np = _round_up(Mp, tm), _round_up(Kp, tk), _round_up(Np, tn)

    xp = jnp.pad(x, ((0, Mp - M), (0, Kp - K))).astype(jnp.bfloat16)
    wp = jnp.pad(w, ((0, Kp - K), (0, Np - N))).astype(jnp.bfloat16)
    bp = jnp.pad(b.reshape(1, N), ((0, 0), (0, Np - N))).astype(jnp.float32)

    in_specs = [
        pl.BlockSpec((tm, tk), lambda i, j, k: (i, k)),
        pl.BlockSpec((tk, tn), lambda i, j, k: (k, j)),
        pl.BlockSpec((1, tn), lambda i, j, k: (0, j)),
    ]
    args = [xp, wp, bp]
    if residual is not None:
        rp = jnp.pad(residual, ((0, Mp - M), (0, Np - N))).astype(jnp.float32)
        in_specs.append(pl.BlockSpec((tm, tn), lambda i, j, k: (i, j)))
        args.append(rp)

    out = pl.pallas_call(
        functools.partial(_matmul_kernel, activation=activation,
                          has_residual=residual is not None),
        out_shape=jax.ShapeDtypeStruct((Mp, Np), jnp.float32),
        grid=(Mp // tm, Np // tn, Kp // tk),
        in_specs=in_specs,
        out_specs=pl.BlockSpec((tm, tn), lambda i, j, k: (i, j)),
        scratch_shapes=[pltpu.VMEM((tm, tn), jnp.float32)],
        compiler_params=pltpu.CompilerParams(
            dimension_semantics=("parallel", "parallel", "arbitrary")),
    )(*args)
    return out[:M, :N]


def ln_matmul(x, gamma, beta, w, b, *, eps, activation=None, tm=MM_TM, tn=512):
    """Fused LayerNorm(x) @ w + b [+GELU].  K (= feature dim) kept whole so LN is exact."""
    M, K = x.shape
    Kw, N = w.shape
    assert Kw == K
    Mp, Np = _round_up(M, 8), _round_up(N, 128)
    tm, tn = min(tm, Mp), min(tn, Np)
    Mp, Np = _round_up(Mp, tm), _round_up(Np, tn)

    xp = jnp.pad(x, ((0, Mp - M), (0, 0))).astype(jnp.float32)
    wp = jnp.pad(w, ((0, 0), (0, Np - N))).astype(jnp.bfloat16)
    bp = jnp.pad(b.reshape(1, N), ((0, 0), (0, Np - N))).astype(jnp.float32)

    out = pl.pallas_call(
        functools.partial(_ln_matmul_kernel, eps=eps, activation=activation),
        out_shape=jax.ShapeDtypeStruct((Mp, Np), jnp.float32),
        grid=(Mp // tm, Np // tn),
        in_specs=[
            pl.BlockSpec((tm, K), lambda i, j: (i, 0)),
            pl.BlockSpec((1, K), lambda i, j: (0, 0)),
            pl.BlockSpec((1, K), lambda i, j: (0, 0)),
            pl.BlockSpec((K, tn), lambda i, j: (0, j)),
            pl.BlockSpec((1, tn), lambda i, j: (0, j)),
        ],
        out_specs=pl.BlockSpec((tm, tn), lambda i, j: (i, j)),
        compiler_params=pltpu.CompilerParams(
            dimension_semantics=("parallel", "parallel")),
    )(xp, gamma.reshape(1, K).astype(jnp.float32),
      beta.reshape(1, K).astype(jnp.float32), wp, bp)
    return out[:M, :N]


def layernorm(x, gamma, beta, *, eps, activation=None, tm=LN_TM):
    """Row-tiled LayerNorm over the last dim of (M, C) [+ GELU]."""
    M, C = x.shape
    Mp = _round_up(M, 8)
    tm = min(tm, Mp)
    Mp = _round_up(Mp, tm)
    xp = jnp.pad(x, ((0, Mp - M), (0, 0))).astype(jnp.float32)
    out = pl.pallas_call(
        functools.partial(_layernorm_kernel, eps=eps, activation=activation),
        out_shape=jax.ShapeDtypeStruct((Mp, C), jnp.float32),
        grid=(Mp // tm,),
        in_specs=[
            pl.BlockSpec((tm, C), lambda i: (i, 0)),
            pl.BlockSpec((1, C), lambda i: (0, 0)),
            pl.BlockSpec((1, C), lambda i: (0, 0)),
        ],
        out_specs=pl.BlockSpec((tm, C), lambda i: (i, 0)),
        compiler_params=pltpu.CompilerParams(dimension_semantics=("parallel",)),
    )(xp, gamma.reshape(1, C).astype(jnp.float32),
      beta.reshape(1, C).astype(jnp.float32))
    return out[:M]


def attention_oproj_residual(q, k, v, w_o, b_o, residual, *, num_heads, scale):
    """softmax(QK^T * scale) V  @ W_o + b_o + residual, grid over batch.
    q, k, v, residual, out are lane-dense (B, T, H) slabs."""
    B, T, H = q.shape
    slab = pl.BlockSpec((None, T, H), lambda b: (b, 0, 0))   # batch dim squeezed
    return pl.pallas_call(
        functools.partial(_attention_oproj_kernel, num_heads=num_heads, scale=scale),
        out_shape=jax.ShapeDtypeStruct((B, T, H), jnp.float32),
        grid=(B,),
        in_specs=[slab, slab, slab,
                  pl.BlockSpec((H, H), lambda b: (0, 0)),
                  pl.BlockSpec((1, H), lambda b: (0, 0)),
                  slab],
        out_specs=slab,
        compiler_params=pltpu.CompilerParams(dimension_semantics=("parallel",)),
    )(q.astype(jnp.bfloat16), k.astype(jnp.bfloat16), v.astype(jnp.bfloat16),
      w_o.astype(jnp.bfloat16), b_o.reshape(1, H).astype(jnp.float32),
      residual.astype(jnp.float32))


# ----------------------------------- model glue -----------------------------------
def conv1d_ln_gelu(x, w, b, ln_g, ln_b, stride):
    """HubertLayerNormConvLayer: conv1d (no padding) -> LayerNorm over C -> GELU."""
    B, Cin, L = x.shape
    Cout, _, K = w.shape
    T = (L - K) // stride + 1
    # TODO(synk): im2col materializes a K-times larger patch array in HBM; at real
    # 512-channel widths move the tap accumulation inside the matmul kernel instead.
    idx = jnp.arange(T)[:, None] * stride + jnp.arange(K)[None, :]       # (T, K)
    patches = x[:, :, idx]                                               # (B, Cin, T, K)
    patches = jnp.transpose(patches, (0, 2, 1, 3)).reshape(B * T, Cin * K)
    wm = jnp.transpose(w.reshape(Cout, Cin * K))                         # (Cin*K, Cout)
    y = matmul_fused(patches, wm, b)                                     # K zero-padded to 128x inside
    y = layernorm(y, ln_g, ln_b, eps=CONV_LN_EPS, activation="gelu")     # row-tiled LN+GELU
    return jnp.transpose(y.reshape(B, T, Cout), (0, 2, 1))               # (B, Cout, T)


def pos_conv_embed_residual(h, w, b, groups, kernel):
    """h + HubertPositionalConvEmbedding(h): grouped conv1d ('same' pad) -> SamePad -> GELU,
    with the residual add fused into the matmul epilogue.  The grouped conv is expressed
    as a single lane-dense block-diagonal matmul (one pipelined kernel for all groups)."""
    B, T, H = h.shape
    cg = H // groups
    x = jnp.transpose(h, (0, 2, 1))                                      # (B, H, T)
    pad = kernel // 2
    xp = jnp.pad(x, ((0, 0), (0, 0), (pad, pad)))
    Tout = T + 2 * pad - kernel + 1
    idx = jnp.arange(Tout)[:, None] + jnp.arange(kernel)[None, :]        # (Tout, K)
    patches = xp[:, :, idx]                                              # (B, H, Tout, K)
    patches = jnp.transpose(patches, (0, 2, 1, 3)).reshape(B * Tout, H * kernel)
    # TODO(synk): block-diagonal weight wastes `groups`x MXU FLOPs; for the real model
    # (16 groups, K=128) use a dedicated grouped kernel with a 'parallel' group axis.
    blocks = [w[g * cg:(g + 1) * cg].reshape(cg, cg * kernel).T for g in range(groups)]
    wbd = jax.scipy.linalg.block_diag(*blocks)                           # (H*K, H)
    resid = jnp.pad(h, ((0, 0), (0, Tout - T), (0, 0))).reshape(B * Tout, H)
    y = matmul_fused(patches, wbd, b, activation="gelu", residual=resid)
    y = y.reshape(B, Tout, H)
    if kernel % 2 == 0:                                                  # HubertSamePadLayer
        y = y[:, :T, :]
    return y


def encoder_layer(h, p, num_heads):
    """HubertEncoderLayerStableLayerNorm (pre-LN): attn block then FF block."""
    B, T, H = h.shape
    hf = h.reshape(B * T, H)
    # fused LN1 -> QKV projection (concatenated (H, 3H) weight)
    qkv = ln_matmul(hf, p["ln1_g"], p["ln1_b"], p["qkv_w"], p["qkv_b"], eps=LN_EPS)
    q = qkv[:, :H].reshape(B, T, H)
    k = qkv[:, H:2 * H].reshape(B, T, H)
    v = qkv[:, 2 * H:].reshape(B, T, H)
    # attention + output projection + residual, fused in one kernel
    h = attention_oproj_residual(q, k, v, p["o_w"], p["o_b"], h,
                                 num_heads=num_heads,
                                 scale=1.0 / math.sqrt(H // num_heads))
    hf = h.reshape(B * T, H)
    # fused LN2 -> FF1 (+GELU), then FF2 + residual fused
    x = ln_matmul(hf, p["ln2_g"], p["ln2_b"], p["ff1_w"], p["ff1_b"],
                  eps=LN_EPS, activation="gelu")
    hf = matmul_fused(x, p["ff2_w"], p["ff2_b"], residual=hf)
    return hf.reshape(B, T, H)


def hubert_forward(params, audio, include_cls):
    """Equivalent of Hubert.forward(audio, include_cls) (inference; dropout = identity)."""
    B, _ = audio.shape
    x = audio[:, None, :]                                                # (B, 1, L)

    # --- feature extractor (conv stack) ---
    for lp, k, s in zip(params["conv"], CONV_KERNEL, CONV_STRIDE):
        x = conv1d_ln_gelu(x, lp["w"], lp["b"], lp["ln_g"], lp["ln_b"], stride=s)
    x = jnp.transpose(x, (0, 2, 1))                                      # (B, T, C)
    B, T, C = x.shape

    # --- feature projection: fused LN -> Linear ---
    h = ln_matmul(x.reshape(B * T, C), params["fp_ln_g"], params["fp_ln_b"],
                  params["fp_w"], params["fp_b"], eps=LN_EPS)            # (B*T, H)
    H = h.shape[-1]
    h = h.reshape(B, T, H)

    # --- encoder (stable layer norm variant) ---
    h = pos_conv_embed_residual(h, params["pos_w"], params["pos_b"],
                                POS_GROUPS, POS_KERNEL)
    for lp in params["layers"]:
        h = encoder_layer(h, lp, NUM_HEADS)
    h = layernorm(h.reshape(B * T, H), params["enc_ln_g"], params["enc_ln_b"],
                  eps=LN_EPS).reshape(B, T, H)

    # last_hidden_state.permute(0, 2, 1).unsqueeze(2)
    patch_tokens = jnp.transpose(h, (0, 2, 1))[:, :, None, :]            # (B, H, 1, T)
    if include_cls:
        return patch_tokens, None
    return patch_tokens


# --------------------------------- parameter init ---------------------------------
def init_params(key):
    keys = iter(jax.random.split(key, 64))

    def nrm(shape, scale=0.02):
        return (scale * jax.random.normal(next(keys), shape)).astype(jnp.float32)

    ones = lambda n: jnp.ones((n,), jnp.float32)
    zeros = lambda n: jnp.zeros((n,), jnp.float32)

    params = {}
    conv = []
    cin = 1
    for cout, k in zip(CONV_DIM, CONV_KERNEL):
        conv.append(dict(w=nrm((cout, cin, k)), b=nrm((cout,)),
                         ln_g=ones(cout), ln_b=zeros(cout)))
        cin = cout
    params["conv"] = conv

    C, H, I = CONV_DIM[-1], HIDDEN, INTERMEDIATE
    params["fp_ln_g"], params["fp_ln_b"] = ones(C), zeros(C)
    params["fp_w"], params["fp_b"] = nrm((C, H)), nrm((H,))
    # weight-norm of the positional conv is folded into one effective weight
    params["pos_w"], params["pos_b"] = nrm((H, H // POS_GROUPS, POS_KERNEL)), nrm((H,))

    layers = []
    for _ in range(NUM_LAYERS):
        layers.append(dict(
            ln1_g=ones(H), ln1_b=zeros(H),
            qkv_w=nrm((H, 3 * H)), qkv_b=nrm((3 * H,)),   # concat of q/k/v projections
            o_w=nrm((H, H)), o_b=nrm((H,)),
            ln2_g=ones(H), ln2_b=zeros(H),
            ff1_w=nrm((H, I)), ff1_b=nrm((I,)),
            ff2_w=nrm((I, H)), ff2_b=nrm((H,)),
        ))
    params["layers"] = layers
    params["enc_ln_g"], params["enc_ln_b"] = ones(H), zeros(H)
    return params


# -------------------------------------- main ---------------------------------------
if __name__ == "__main__":
    key = jax.random.PRNGKey(0)
    pkey, akey = jax.random.split(key)
    params = init_params(pkey)
    audio = jax.random.normal(akey, (BATCH, AUDIO_LEN), jnp.float32)

    fwd = jax.jit(hubert_forward, static_argnums=(2,))

    # expected output time length after the conv stack
    t = AUDIO_LEN
    for k, s in zip(CONV_KERNEL, CONV_STRIDE):
        t = (t - k) // s + 1

    patch_tokens = jax.block_until_ready(fwd(params, audio, False))
    assert patch_tokens.shape == (BATCH, HIDDEN, 1, t), patch_tokens.shape
    assert patch_tokens.dtype == jnp.float32

    toks, cls = fwd(params, audio, True)
    jax.block_until_ready(toks)
    assert cls is None
    assert toks.shape == (BATCH, HIDDEN, 1, t)
    assert bool(jnp.all(jnp.isfinite(toks)))

    print("KERNEL_OK")
</pallas_src>

<mosaic_0001>
module attributes {stable_mosaic.version = 11 : i64} {
  func.func @_matmul_kernel(%arg0: i32, %arg1: i32, %arg2: i32, %arg3: memref<160x128xbf16, #tpu.memory_space<vmem>>, %arg4: memref<128x128xbf16, #tpu.memory_space<vmem>>, %arg5: memref<1x128xf32, #tpu.memory_space<vmem>>, %arg6: memref<160x128xf32, #tpu.memory_space<vmem>>, %arg7: memref<160x128xf32, #tpu.memory_space<vmem>>) attributes {dimension_semantics = [#tpu.dimension_semantics<parallel>, #tpu.dimension_semantics<parallel>, #tpu.dimension_semantics<arbitrary>], iteration_bounds = array<i64: 1, 1, 1>, scalar_prefetch = 0 : i64, scratch_operands = 1 : i64, tpu.core_type = #tpu.core_type<tc>, window_params = [{transform_indices = @transform_0, window_bounds = array<i64: 160, 128>}, {transform_indices = @transform_1, window_bounds = array<i64: 128, 128>}, {transform_indices = @transform_2, window_bounds = array<i64: 1, 128>}, {transform_indices = @transform_3, window_bounds = array<i64: 160, 128>}]} {
    %c0_i32 = arith.constant 0 : i32
    %0 = arith.cmpi eq, %arg2, %c0_i32 : i32
    %1 = arith.extui %0 : i1 to i32
    %c0_i32_0 = arith.constant 0 : i32
    %2 = arith.cmpi ne, %1, %c0_i32_0 : i32
    scf.if %2 {
      %cst_10 = arith.constant 0.000000e+00 : f32
      %12 = vector.broadcast %cst_10 : f32 to vector<160x128xf32>
      %c0_11 = arith.constant 0 : index
      %c0_12 = arith.constant 0 : index
      %13 = vector.load %arg7[%c0_11, %c0_12] : memref<160x128xf32, #tpu.memory_space<vmem>>, vector<160x128xf32>
      tpu.vector_store %arg7[%c0_11, %c0_12], %12 {strides = array<i32>} : memref<160x128xf32, #tpu.memory_space<vmem>>, vector<160x128xf32>,
    } else {
    }
    %c0 = arith.constant 0 : index
    %c0_1 = arith.constant 0 : index
    %3 = vector.load %arg7[%c0, %c0_1] : memref<160x128xf32, #tpu.memory_space<vmem>>, vector<160x128xf32>
    %c0_2 = arith.constant 0 : index
    %c0_3 = arith.constant 0 : index
    %4 = vector.load %arg3[%c0_2, %c0_3] : memref<160x128xbf16, #tpu.memory_space<vmem>>, vector<160x128xbf16>
    %c0_4 = arith.constant 0 : index
    %c0_5 = arith.constant 0 : index
    %5 = vector.load %arg4[%c0_4, %c0_5] : memref<128x128xbf16, #tpu.memory_space<vmem>>, vector<128x128xbf16>
    %cst = arith.constant dense<0.000000e+00> : vector<160x128xf32>
    %6 = tpu.matmul %4, %5, %cst {dimension_numbers = #tpu.dot_dimension_numbers<[1], [0], [0], [1], [0, 0, 1, 1], [], []>} : vector<160x128xbf16>, vector<128x128xbf16>, vector<160x128xf32> -> vector<160x128xf32>
    %7 = arith.addf %3, %6 : vector<160x128xf32>
    %c0_6 = arith.constant 0 : index
    %c0_7 = arith.constant 0 : index
    %8 = vector.load %arg7[%c0_6, %c0_7] : memref<160x128xf32, #tpu.memory_space<vmem>>, vector<160x128xf32>
    tpu.vector_store %arg7[%c0_6, %c0_7], %7 {strides = array<i32>} : memref<160x128xf32, #tpu.memory_space<vmem>>, vector<160x128xf32>,
    %c0_i32_8 = arith.constant 0 : i32
    %9 = arith.cmpi eq, %arg2, %c0_i32_8 : i32
    %10 = arith.extui %9 : i1 to i32
    %c0_i32_9 = arith.constant 0 : i32
    %11 = arith.cmpi ne, %10, %c0_i32_9 : i32
    scf.if %11 {
      %c0_10 = arith.constant 0 : index
      %c0_11 = arith.constant 0 : index
      %12 = vector.load %arg7[%c0_10, %c0_11] : memref<160x128xf32, #tpu.memory_space<vmem>>, vector<160x128xf32>
      %c0_12 = arith.constant 0 : index
      %c0_13 = arith.constant 0 : index
      %13 = vector.load %arg5[%c0_12, %c0_13] : memref<1x128xf32, #tpu.memory_space<vmem>>, vector<1x128xf32>
      %14 = vector.broadcast %13 : vector<1x128xf32> to vector<160x128xf32>
      %15 = arith.addf %12, %14 : vector<160x128xf32>
      %c0_14 = arith.constant 0 : index
      %c0_15 = arith.constant 0 : index
      %16 = vector.load %arg6[%c0_14, %c0_15] : memref<160x128xf32, #tpu.memory_space<vmem>>, vector<160x128xf32>
      tpu.vector_store %arg6[%c0_14, %c0_15], %15 {strides = array<i32>} : memref<160x128xf32, #tpu.memory_space<vmem>>, vector<160x128xf32>,
    } else {
    }
    return
  }
  func.func @transform_0(%arg0: i32, %arg1: i32, %arg2: i32) -> (i32, i32) {
    %c0_i32 = arith.constant 0 : i32
    return %arg0, %arg2 : i32, i32
  }
  func.func @transform_1(%arg0: i32, %arg1: i32, %arg2: i32) -> (i32, i32) {
    %c0_i32 = arith.constant 0 : i32
    return %arg2, %arg1 : i32, i32
  }
  func.func @transform_2(%arg0: i32, %arg1: i32, %arg2: i32) -> (i32, i32) {
    %c0_i32 = arith.constant 0 : i32
    %c0_i32_0 = arith.constant 0 : i32
    return %c0_i32, %arg1 : i32, i32
  }
  func.func @transform_3(%arg0: i32, %arg1: i32, %arg2: i32) -> (i32, i32) {
    %c0_i32 = arith.constant 0 : i32
    return %arg0, %arg1 : i32, i32
  }
}

module attributes {stable_mosaic.version = 11 : i64} {
  func.func @_layernorm_kernel(%arg0: i32, %arg1: memref<160x64xf32, #tpu.memory_space<vmem>>, %arg2: memref<1x64xf32, #tpu.memory_space<vmem>>, %arg3: memref<1x64xf32, #tpu.memory_space<vmem>>, %arg4: memref<160x64xf32, #tpu.memory_space<vmem>>) attributes {dimension_semantics = [#tpu.dimension_semantics<parallel>], iteration_bounds = array<i64: 1>, scalar_prefetch = 0 : i64, scratch_operands = 0 : i64, tpu.core_type = #tpu.core_type<tc>, window_params = [{transform_indices = @transform_0, window_bounds = array<i64: 160, 64>}, {pipeline_mode = #tpu.pipeline_mode<synchronous>, transform_indices = @transform_1, window_bounds = array<i64: 1, 64>}, {pipeline_mode = #tpu.pipeline_mode<synchronous>, transform_indices = @transform_2, window_bounds = array<i64: 1, 64>}, {transform_indices = @transform_3, window_bounds = array<i64: 160, 64>}]} {
    %c0 = arith.constant 0 : index
    %c0_0 = arith.constant 0 : index
    %0 = vector.load %arg1[%c0, %c0_0] : memref<160x64xf32, #tpu.memory_space<vmem>>, vector<160x64xf32>
    %cst = arith.constant dense<0.000000e+00> : vector<160xf32>
    %1 = vector.multi_reduction <add>, %0, %cst [1] : vector<160x64xf32> to vector<160xf32>
    %2 = vector.shape_cast %1 : vector<160xf32> to vector<160x1xf32>
    %cst_1 = arith.constant 6.400000e+01 : f32
    %3 = vector.broadcast %cst_1 : f32 to vector<160x1xf32>
    %4 = arith.divf %2, %3 : vector<160x1xf32>
    %5 = vector.broadcast %4 : vector<160x1xf32> to vector<160x64xf32>
    %6 = arith.subf %0, %5 : vector<160x64xf32>
    %7 = arith.mulf %6, %6 : vector<160x64xf32>
    %cst_2 = arith.constant dense<0.000000e+00> : vector<160xf32>
    %8 = vector.multi_reduction <add>, %7, %cst_2 [1] : vector<160x64xf32> to vector<160xf32>
    %9 = vector.shape_cast %8 : vector<160xf32> to vector<160x1xf32>
    %cst_3 = arith.constant 6.400000e+01 : f32
    %10 = vector.broadcast %cst_3 : f32 to vector<160x1xf32>
    %11 = arith.divf %9, %10 : vector<160x1xf32>
    %12 = vector.broadcast %4 : vector<160x1xf32> to vector<160x64xf32>
    %13 = arith.subf %0, %12 : vector<160x64xf32>
    %cst_4 = arith.constant 9.99999974E-6 : f32
    %14 = vector.broadcast %cst_4 : f32 to vector<160x1xf32>
    %15 = arith.addf %11, %14 : vector<160x1xf32>
    %16 = math.rsqrt %15 : vector<160x1xf32>
    %17 = vector.broadcast %16 : vector<160x1xf32> to vector<160x64xf32>
    %18 = arith.mulf %13, %17 : vector<160x64xf32>
    %c0_5 = arith.constant 0 : index
    %c0_6 = arith.constant 0 : index
    %19 = vector.load %arg2[%c0_5, %c0_6] : memref<1x64xf32, #tpu.memory_space<vmem>>, vector<1x64xf32>
    %20 = vector.broadcast %19 : vector<1x64xf32> to vector<160x64xf32>
    %21 = arith.mulf %18, %20 : vector<160x64xf32>
    %c0_7 = arith.constant 0 : index
    %c0_8 = arith.constant 0 : index
    %22 = vector.load %arg3[%c0_7, %c0_8] : memref<1x64xf32, #tpu.memory_space<vmem>>, vector<1x64xf32>
    %23 = vector.broadcast %22 : vector<1x64xf32> to vector<160x64xf32>
    %24 = arith.addf %21, %23 : vector<160x64xf32>
    %cst_9 = arith.constant 5.000000e-01 : f32
    %25 = vector.broadcast %cst_9 : f32 to vector<160x64xf32>
    %26 = arith.mulf %25, %24 : vector<160x64xf32>
    %cst_10 = arith.constant 4.471500e-02 : f32
    %27 = vector.broadcast %cst_10 : f32 to vector<160x64xf32>
    %28 = arith.mulf %27, %24 : vector<160x64xf32>
    %29 = arith.mulf %28, %24 : vector<160x64xf32>
    %30 = arith.mulf %29, %24 : vector<160x64xf32>
    %31 = arith.addf %24, %30 : vector<160x64xf32>
    %cst_11 = arith.constant 0.797884583 : f32
    %32 = vector.broadcast %cst_11 : f32 to vector<160x64xf32>
    %33 = arith.mulf %32, %31 : vector<160x64xf32>
    %34 = math.tanh %33 : vector<160x64xf32>
    %cst_12 = arith.constant 1.000000e+00 : f32
    %35 = vector.broadcast %cst_12 : f32 to vector<160x64xf32>
    %36 = arith.addf %35, %34 : vector<160x64xf32>
    %37 = arith.mulf %26, %36 : vector<160x64xf32>
    %c0_13 = arith.constant 0 : index
    %c0_14 = arith.constant 0 : index
    %38 = vector.load %arg4[%c0_13, %c0_14] : memref<160x64xf32, #tpu.memory_space<vmem>>, vector<160x64xf32>
    tpu.vector_store %arg4[%c0_13, %c0_14], %37 {strides = array<i32>} : memref<160x64xf32, #tpu.memory_space<vmem>>, vector<160x64xf32>,
    return
  }
  func.func @transform_0(%arg0: i32) -> (i32, i32) {
    %c0_i32 = arith.constant 0 : i32
    %c0_i32_0 = arith.constant 0 : i32
    return %arg0, %c0_i32 : i32, i32
  }
  func.func @transform_1(%arg0: i32) -> (i32, i32) {
    %c0_i32 = arith.constant 0 : i32
    %c0_i32_0 = arith.constant 0 : i32
    %c0_i32_1 = arith.constant 0 : i32
    return %c0_i32, %c0_i32_0 : i32, i32
  }
  func.func @transform_2(%arg0: i32) -> (i32, i32) {
    %c0_i32 = arith.constant 0 : i32
    %c0_i32_0 = arith.constant 0 : i32
    %c0_i32_1 = arith.constant 0 : i32
    return %c0_i32, %c0_i32_0 : i32, i32
  }
  func.func @transform_3(%arg0: i32) -> (i32, i32) {
    %c0_i32 = arith.constant 0 : i32
    %c0_i32_0 = arith.constant 0 : i32
    return %arg0, %c0_i32 : i32, i32
  }
}

module attributes {stable_mosaic.version = 11 : i64} {
  func.func @_layernorm_kernel(%arg0: i32, %arg1: memref<80x64xf32, #tpu.memory_space<vmem>>, %arg2: memref<1x64xf32, #tpu.memory_space<vmem>>, %arg3: memref<1x64xf32, #tpu.memory_space<vmem>>, %arg4: memref<80x64xf32, #tpu.memory_space<vmem>>) attributes {dimension_semantics = [#tpu.dimension_semantics<parallel>], iteration_bounds = array<i64: 1>, scalar_prefetch = 0 : i64, scratch_operands = 0 : i64, tpu.core_type = #tpu.core_type<tc>, window_params = [{transform_indices = @transform_0, window_bounds = array<i64: 80, 64>}, {pipeline_mode = #tpu.pipeline_mode<synchronous>, transform_indices = @transform_1, window_bounds = array<i64: 1, 64>}, {pipeline_mode = #tpu.pipeline_mode<synchronous>, transform_indices = @transform_2, window_bounds = array<i64: 1, 64>}, {transform_indices = @transform_3, window_bounds = array<i64: 80, 64>}]} {
    %c0 = arith.constant 0 : index
    %c0_0 = arith.constant 0 : index
    %0 = vector.load %arg1[%c0, %c0_0] : memref<80x64xf32, #tpu.memory_space<vmem>>, vector<80x64xf32>
    %cst = arith.constant dense<0.000000e+00> : vector<80xf32>
    %1 = vector.multi_reduction <add>, %0, %cst [1] : vector<80x64xf32> to vector<80xf32>
    %2 = vector.shape_cast %1 : vector<80xf32> to vector<80x1xf32>
    %cst_1 = arith.constant 6.400000e+01 : f32
    %3 = vector.broadcast %cst_1 : f32 to vector<80x1xf32>
    %4 = arith.divf %2, %3 : vector<80x1xf32>
    %5 = vector.broadcast %4 : vector<80x1xf32> to vector<80x64xf32>
    %6 = arith.subf %0, %5 : vector<80x64xf32>
    %7 = arith.mulf %6, %6 : vector<80x64xf32>
    %cst_2 = arith.constant dense<0.000000e+00> : vector<80xf32>
    %8 = vector.multi_reduction <add>, %7, %cst_2 [1] : vector<80x64xf32> to vector<80xf32>
    %9 = vector.shape_cast %8 : vector<80xf32> to vector<80x1xf32>
    %cst_3 = arith.constant 6.400000e+01 : f32
    %10 = vector.broadcast %cst_3 : f32 to vector<80x1xf32>
    %11 = arith.divf %9, %10 : vector<80x1xf32>
    %12 = vector.broadcast %4 : vector<80x1xf32> to vector<80x64xf32>
    %13 = arith.subf %0, %12 : vector<80x64xf32>
    %cst_4 = arith.constant 9.99999974E-6 : f32
    %14 = vector.broadcast %cst_4 : f32 to vector<80x1xf32>
    %15 = arith.addf %11, %14 : vector<80x1xf32>
    %16 = math.rsqrt %15 : vector<80x1xf32>
    %17 = vector.broadcast %16 : vector<80x1xf32> to vector<80x64xf32>
    %18 = arith.mulf %13, %17 : vector<80x64xf32>
    %c0_5 = arith.constant 0 : index
    %c0_6 = arith.constant 0 : index
    %19 = vector.load %arg2[%c0_5, %c0_6] : memref<1x64xf32, #tpu.memory_space<vmem>>, vector<1x64xf32>
    %20 = vector.broadcast %19 : vector<1x64xf32> to vector<80x64xf32>
    %21 = arith.mulf %18, %20 : vector<80x64xf32>
    %c0_7 = arith.constant 0 : index
    %c0_8 = arith.constant 0 : index
    %22 = vector.load %arg3[%c0_7, %c0_8] : memref<1x64xf32, #tpu.memory_space<vmem>>, vector<1x64xf32>
    %23 = vector.broadcast %22 : vector<1x64xf32> to vector<80x64xf32>
    %24 = arith.addf %21, %23 : vector<80x64xf32>
    %cst_9 = arith.constant 5.000000e-01 : f32
    %25 = vector.broadcast %cst_9 : f32 to vector<80x64xf32>
    %26 = arith.mulf %25, %24 : vector<80x64xf32>
    %cst_10 = arith.constant 4.471500e-02 : f32
    %27 = vector.broadcast %cst_10 : f32 to vector<80x64xf32>
    %28 = arith.mulf %27, %24 : vector<80x64xf32>
    %29 = arith.mulf %28, %24 : vector<80x64xf32>
    %30 = arith.mulf %29, %24 : vector<80x64xf32>
    %31 = arith.addf %24, %30 : vector<80x64xf32>
    %cst_11 = arith.constant 0.797884583 : f32
    %32 = vector.broadcast %cst_11 : f32 to vector<80x64xf32>
    %33 = arith.mulf %32, %31 : vector<80x64xf32>
    %34 = math.tanh %33 : vector<80x64xf32>
    %cst_12 = arith.constant 1.000000e+00 : f32
    %35 = vector.broadcast %cst_12 : f32 to vector<80x64xf32>
    %36 = arith.addf %35, %34 : vector<80x64xf32>
    %37 = arith.mulf %26, %36 : vector<80x64xf32>
    %c0_13 = arith.constant 0 : index
    %c0_14 = arith.constant 0 : index
    %38 = vector.load %arg4[%c0_13, %c0_14] : memref<80x64xf32, #tpu.memory_space<vmem>>, vector<80x64xf32>
    tpu.vector_store %arg4[%c0_13, %c0_14], %37 {strides = array<i32>} : memref<80x64xf32, #tpu.memory_space<vmem>>, vector<80x64xf32>,
    return
  }
  func.func @transform_0(%arg0: i32) -> (i32, i32) {
    %c0_i32 = arith.constant 0 : i32
    %c0_i32_0 = arith.constant 0 : i32
    return %arg0, %c0_i32 : i32, i32
  }
  func.func @transform_1(%arg0: i32) -> (i32, i32) {
    %c0_i32 = arith.constant 0 : i32
    %c0_i32_0 = arith.constant 0 : i32
    %c0_i32_1 = arith.constant 0 : i32
    return %c0_i32, %c0_i32_0 : i32, i32
  }
  func.func @transform_2(%arg0: i32) -> (i32, i32) {
    %c0_i32 = arith.constant 0 : i32
    %c0_i32_0 = arith.constant 0 : i32
    %c0_i32_1 = arith.constant 0 : i32
    return %c0_i32, %c0_i32_0 : i32, i32
  }
  func.func @transform_3(%arg0: i32) -> (i32, i32) {
    %c0_i32 = arith.constant 0 : i32
    %c0_i32_0 = arith.constant 0 : i32
    return %arg0, %c0_i32 : i32, i32
  }
}

module attributes {stable_mosaic.version = 11 : i64} {
  func.func @_matmul_kernel(%arg0: i32, %arg1: i32, %arg2: i32, %arg3: memref<80x256xbf16, #tpu.memory_space<vmem>>, %arg4: memref<256x128xbf16, #tpu.memory_space<vmem>>, %arg5: memref<1x128xf32, #tpu.memory_space<vmem>>, %arg6: memref<80x128xf32, #tpu.memory_space<vmem>>, %arg7: memref<80x128xf32, #tpu.memory_space<vmem>>) attributes {dimension_semantics = [#tpu.dimension_semantics<parallel>, #tpu.dimension_semantics<parallel>, #tpu.dimension_semantics<arbitrary>], iteration_bounds = array<i64: 1, 1, 1>, scalar_prefetch = 0 : i64, scratch_operands = 1 : i64, tpu.core_type = #tpu.core_type<tc>, window_params = [{transform_indices = @transform_0, window_bounds = array<i64: 80, 256>}, {transform_indices = @transform_1, window_bounds = array<i64: 256, 128>}, {transform_indices = @transform_2, window_bounds = array<i64: 1, 128>}, {transform_indices = @transform_3, window_bounds = array<i64: 80, 128>}]} {
    %c0_i32 = arith.constant 0 : i32
    %0 = arith.cmpi eq, %arg2, %c0_i32 : i32
    %1 = arith.extui %0 : i1 to i32
    %c0_i32_0 = arith.constant 0 : i32
    %2 = arith.cmpi ne, %1, %c0_i32_0 : i32
    scf.if %2 {
      %cst_10 = arith.constant 0.000000e+00 : f32
      %12 = vector.broadcast %cst_10 : f32 to vector<80x128xf32>
      %c0_11 = arith.constant 0 : index
      %c0_12 = arith.constant 0 : index
      %13 = vector.load %arg7[%c0_11, %c0_12] : memref<80x128xf32, #tpu.memory_space<vmem>>, vector<80x128xf32>
      tpu.vector_store %arg7[%c0_11, %c0_12], %12 {strides = array<i32>} : memref<80x128xf32, #tpu.memory_space<vmem>>, vector<80x128xf32>,
    } else {
    }
    %c0 = arith.constant 0 : index
    %c0_1 = arith.constant 0 : index
    %3 = vector.load %arg7[%c0, %c0_1] : memref<80x128xf32, #tpu.memory_space<vmem>>, vector<80x128xf32>
    %c0_2 = arith.constant 0 : index
    %c0_3 = arith.constant 0 : index
    %4 = vector.load %arg3[%c0_2, %c0_3] : memref<80x256xbf16, #tpu.memory_space<vmem>>, vector<80x256xbf16>
    %c0_4 = arith.constant 0 : index
    %c0_5 = arith.constant 0 : index
    %5 = vector.load %arg4[%c0_4, %c0_5] : memref<256x128xbf16, #tpu.memory_space<vmem>>, vector<256x128xbf16>
    %cst = arith.constant dense<0.000000e+00> : vector<80x128xf32>
    %6 = tpu.matmul %4, %5, %cst {dimension_numbers = #tpu.dot_dimension_numbers<[1], [0], [0], [1], [0, 0, 1, 1], [], []>} : vector<80x256xbf16>, vector<256x128xbf16>, vector<80x128xf32> -> vector<80x128xf32>
    %7 = arith.addf %3, %6 : vector<80x128xf32>
    %c0_6 = arith.constant 0 : index
    %c0_7 = arith.constant 0 : index
    %8 = vector.load %arg7[%c0_6, %c0_7] : memref<80x128xf32, #tpu.memory_space<vmem>>, vector<80x128xf32>
    tpu.vector_store %arg7[%c0_6, %c0_7], %7 {strides = array<i32>} : memref<80x128xf32, #tpu.memory_space<vmem>>, vector<80x128xf32>,
    %c0_i32_8 = arith.constant 0 : i32
    %9 = arith.cmpi eq, %arg2, %c0_i32_8 : i32
    %10 = arith.extui %9 : i1 to i32
    %c0_i32_9 = arith.constant 0 : i32
    %11 = arith.cmpi ne, %10, %c0_i32_9 : i32
    scf.if %11 {
      %c0_10 = arith.constant 0 : index
      %c0_11 = arith.constant 0 : index
      %12 = vector.load %arg7[%c0_10, %c0_11] : memref<80x128xf32, #tpu.memory_space<vmem>>, vector<80x128xf32>
      %c0_12 = arith.constant 0 : index
      %c0_13 = arith.constant 0 : index
      %13 = vector.load %arg5[%c0_12, %c0_13] : memref<1x128xf32, #tpu.memory_space<vmem>>, vector<1x128xf32>
      %14 = vector.broadcast %13 : vector<1x128xf32> to vector<80x128xf32>
      %15 = arith.addf %12, %14 : vector<80x128xf32>
      %c0_14 = arith.constant 0 : index
      %c0_15 = arith.constant 0 : index
      %16 = vector.load %arg6[%c0_14, %c0_15] : memref<80x128xf32, #tpu.memory_space<vmem>>, vector<80x128xf32>
      tpu.vector_store %arg6[%c0_14, %c0_15], %15 {strides = array<i32>} : memref<80x128xf32, #tpu.memory_space<vmem>>, vector<80x128xf32>,
    } else {
    }
    return
  }
  func.func @transform_0(%arg0: i32, %arg1: i32, %arg2: i32) -> (i32, i32) {
    %c0_i32 = arith.constant 0 : i32
    return %arg0, %arg2 : i32, i32
  }
  func.func @transform_1(%arg0: i32, %arg1: i32, %arg2: i32) -> (i32, i32) {
    %c0_i32 = arith.constant 0 : i32
    return %arg2, %arg1 : i32, i32
  }
  func.func @transform_2(%arg0: i32, %arg1: i32, %arg2: i32) -> (i32, i32) {
    %c0_i32 = arith.constant 0 : i32
    %c0_i32_0 = arith.constant 0 : i32
    return %c0_i32, %arg1 : i32, i32
  }
  func.func @transform_3(%arg0: i32, %arg1: i32, %arg2: i32) -> (i32, i32) {
    %c0_i32 = arith.constant 0 : i32
    return %arg0, %arg1 : i32, i32
  }
}

module attributes {stable_mosaic.version = 11 : i64} {
  func.func @_layernorm_kernel(%arg0: i32, %arg1: memref<40x64xf32, #tpu.memory_space<vmem>>, %arg2: memref<1x64xf32, #tpu.memory_space<vmem>>, %arg3: memref<1x64xf32, #tpu.memory_space<vmem>>, %arg4: memref<40x64xf32, #tpu.memory_space<vmem>>) attributes {dimension_semantics = [#tpu.dimension_semantics<parallel>], iteration_bounds = array<i64: 1>, scalar_prefetch = 0 : i64, scratch_operands = 0 : i64, tpu.core_type = #tpu.core_type<tc>, window_params = [{transform_indices = @transform_0, window_bounds = array<i64: 40, 64>}, {pipeline_mode = #tpu.pipeline_mode<synchronous>, transform_indices = @transform_1, window_bounds = array<i64: 1, 64>}, {pipeline_mode = #tpu.pipeline_mode<synchronous>, transform_indices = @transform_2, window_bounds = array<i64: 1, 64>}, {transform_indices = @transform_3, window_bounds = array<i64: 40, 64>}]} {
    %c0 = arith.constant 0 : index
    %c0_0 = arith.constant 0 : index
    %0 = vector.load %arg1[%c0, %c0_0] : memref<40x64xf32, #tpu.memory_space<vmem>>, vector<40x64xf32>
    %cst = arith.constant dense<0.000000e+00> : vector<40xf32>
    %1 = vector.multi_reduction <add>, %0, %cst [1] : vector<40x64xf32> to vector<40xf32>
    %2 = vector.shape_cast %1 : vector<40xf32> to vector<40x1xf32>
    %cst_1 = arith.constant 6.400000e+01 : f32
    %3 = vector.broadcast %cst_1 : f32 to vector<40x1xf32>
    %4 = arith.divf %2, %3 : vector<40x1xf32>
    %5 = vector.broadcast %4 : vector<40x1xf32> to vector<40x64xf32>
    %6 = arith.subf %0, %5 : vector<40x64xf32>
    %7 = arith.mulf %6, %6 : vector<40x64xf32>
    %cst_2 = arith.constant dense<0.000000e+00> : vector<40xf32>
    %8 = vector.multi_reduction <add>, %7, %cst_2 [1] : vector<40x64xf32> to vector<40xf32>
    %9 = vector.shape_cast %8 : vector<40xf32> to vector<40x1xf32>
    %cst_3 = arith.constant 6.400000e+01 : f32
    %10 = vector.broadcast %cst_3 : f32 to vector<40x1xf32>
    %11 = arith.divf %9, %10 : vector<40x1xf32>
    %12 = vector.broadcast %4 : vector<40x1xf32> to vector<40x64xf32>
    %13 = arith.subf %0, %12 : vector<40x64xf32>
    %cst_4 = arith.constant 9.99999974E-6 : f32
    %14 = vector.broadcast %cst_4 : f32 to vector<40x1xf32>
    %15 = arith.addf %11, %14 : vector<40x1xf32>
    %16 = math.rsqrt %15 : vector<40x1xf32>
    %17 = vector.broadcast %16 : vector<40x1xf32> to vector<40x64xf32>
    %18 = arith.mulf %13, %17 : vector<40x64xf32>
    %c0_5 = arith.constant 0 : index
    %c0_6 = arith.constant 0 : index
    %19 = vector.load %arg2[%c0_5, %c0_6] : memref<1x64xf32, #tpu.memory_space<vmem>>, vector<1x64xf32>
    %20 = vector.broadcast %19 : vector<1x64xf32> to vector<40x64xf32>
    %21 = arith.mulf %18, %20 : vector<40x64xf32>
    %c0_7 = arith.constant 0 : index
    %c0_8 = arith.constant 0 : index
    %22 = vector.load %arg3[%c0_7, %c0_8] : memref<1x64xf32, #tpu.memory_space<vmem>>, vector<1x64xf32>
    %23 = vector.broadcast %22 : vector<1x64xf32> to vector<40x64xf32>
    %24 = arith.addf %21, %23 : vector<40x64xf32>
    %cst_9 = arith.constant 5.000000e-01 : f32
    %25 = vector.broadcast %cst_9 : f32 to vector<40x64xf32>
    %26 = arith.mulf %25, %24 : vector<40x64xf32>
    %cst_10 = arith.constant 4.471500e-02 : f32
    %27 = vector.broadcast %cst_10 : f32 to vector<40x64xf32>
    %28 = arith.mulf %27, %24 : vector<40x64xf32>
    %29 = arith.mulf %28, %24 : vector<40x64xf32>
    %30 = arith.mulf %29, %24 : vector<40x64xf32>
    %31 = arith.addf %24, %30 : vector<40x64xf32>
    %cst_11 = arith.constant 0.797884583 : f32
    %32 = vector.broadcast %cst_11 : f32 to vector<40x64xf32>
    %33 = arith.mulf %32, %31 : vector<40x64xf32>
    %34 = math.tanh %33 : vector<40x64xf32>
    %cst_12 = arith.constant 1.000000e+00 : f32
    %35 = vector.broadcast %cst_12 : f32 to vector<40x64xf32>
    %36 = arith.addf %35, %34 : vector<40x64xf32>
    %37 = arith.mulf %26, %36 : vector<40x64xf32>
    %c0_13 = arith.constant 0 : index
    %c0_14 = arith.constant 0 : index
    %38 = vector.load %arg4[%c0_13, %c0_14] : memref<40x64xf32, #tpu.memory_space<vmem>>, vector<40x64xf32>
    tpu.vector_store %arg4[%c0_13, %c0_14], %37 {strides = array<i32>} : memref<40x64xf32, #tpu.memory_space<vmem>>, vector<40x64xf32>,
    return
  }
  func.func @transform_0(%arg0: i32) -> (i32, i32) {
    %c0_i32 = arith.constant 0 : i32
    %c0_i32_0 = arith.constant 0 : i32
    return %arg0, %c0_i32 : i32, i32
  }
  func.func @transform_1(%arg0: i32) -> (i32, i32) {
    %c0_i32 = arith.constant 0 : i32
    %c0_i32_0 = arith.constant 0 : i32
    %c0_i32_1 = arith.constant 0 : i32
    return %c0_i32, %c0_i32_0 : i32, i32
  }
  func.func @transform_2(%arg0: i32) -> (i32, i32) {
    %c0_i32 = arith.constant 0 : i32
    %c0_i32_0 = arith.constant 0 : i32
    %c0_i32_1 = arith.constant 0 : i32
    return %c0_i32, %c0_i32_0 : i32, i32
  }
  func.func @transform_3(%arg0: i32) -> (i32, i32) {
    %c0_i32 = arith.constant 0 : i32
    %c0_i32_0 = arith.constant 0 : i32
    return %arg0, %c0_i32 : i32, i32
  }
}

module attributes {stable_mosaic.version = 11 : i64} {
  func.func @_matmul_kernel(%arg0: i32, %arg1: i32, %arg2: i32, %arg3: memref<40x256xbf16, #tpu.memory_space<vmem>>, %arg4: memref<256x128xbf16, #tpu.memory_space<vmem>>, %arg5: memref<1x128xf32, #tpu.memory_space<vmem>>, %arg6: memref<40x128xf32, #tpu.memory_space<vmem>>, %arg7: memref<40x128xf32, #tpu.memory_space<vmem>>) attributes {dimension_semantics = [#tpu.dimension_semantics<parallel>, #tpu.dimension_semantics<parallel>, #tpu.dimension_semantics<arbitrary>], iteration_bounds = array<i64: 1, 1, 1>, scalar_prefetch = 0 : i64, scratch_operands = 1 : i64, tpu.core_type = #tpu.core_type<tc>, window_params = [{transform_indices = @transform_0, window_bounds = array<i64: 40, 256>}, {transform_indices = @transform_1, window_bounds = array<i64: 256, 128>}, {transform_indices = @transform_2, window_bounds = array<i64: 1, 128>}, {transform_indices = @transform_3, window_bounds = array<i64: 40, 128>}]} {
    %c0_i32 = arith.constant 0 : i32
    %0 = arith.cmpi eq, %arg2, %c0_i32 : i32
    %1 = arith.extui %0 : i1 to i32
    %c0_i32_0 = arith.constant 0 : i32
    %2 = arith.cmpi ne, %1, %c0_i32_0 : i32
    scf.if %2 {
      %cst_10 = arith.constant 0.000000e+00 : f32
      %12 = vector.broadcast %cst_10 : f32 to vector<40x128xf32>
      %c0_11 = arith.constant 0 : index
      %c0_12 = arith.constant 0 : index
      %13 = vector.load %arg7[%c0_11, %c0_12] : memref<40x128xf32, #tpu.memory_space<vmem>>, vector<40x128xf32>
      tpu.vector_store %arg7[%c0_11, %c0_12], %12 {strides = array<i32>} : memref<40x128xf32, #tpu.memory_space<vmem>>, vector<40x128xf32>,
    } else {
    }
    %c0 = arith.constant 0 : index
    %c0_1 = arith.constant 0 : index
    %3 = vector.load %arg7[%c0, %c0_1] : memref<40x128xf32, #tpu.memory_space<vmem>>, vector<40x128xf32>
    %c0_2 = arith.constant 0 : index
    %c0_3 = arith.constant 0 : index
    %4 = vector.load %arg3[%c0_2, %c0_3] : memref<40x256xbf16, #tpu.memory_space<vmem>>, vector<40x256xbf16>
    %c0_4 = arith.constant 0 : index
    %c0_5 = arith.constant 0 : index
    %5 = vector.load %arg4[%c0_4, %c0_5] : memref<256x128xbf16, #tpu.memory_space<vmem>>, vector<256x128xbf16>
    %cst = arith.constant dense<0.000000e+00> : vector<40x128xf32>
    %6 = tpu.matmul %4, %5, %cst {dimension_numbers = #tpu.dot_dimension_numbers<[1], [0], [0], [1], [0, 0, 1, 1], [], []>} : vector<40x256xbf16>, vector<256x128xbf16>, vector<40x128xf32> -> vector<40x128xf32>
    %7 = arith.addf %3, %6 : vector<40x128xf32>
    %c0_6 = arith.constant 0 : index
    %c0_7 = arith.constant 0 : index
    %8 = vector.load %arg7[%c0_6, %c0_7] : memref<40x128xf32, #tpu.memory_space<vmem>>, vector<40x128xf32>
    tpu.vector_store %arg7[%c0_6, %c0_7], %7 {strides = array<i32>} : memref<40x128xf32, #tpu.memory_space<vmem>>, vector<40x128xf32>,
    %c0_i32_8 = arith.constant 0 : i32
    %9 = arith.cmpi eq, %arg2, %c0_i32_8 : i32
    %10 = arith.extui %9 : i1 to i32
    %c0_i32_9 = arith.constant 0 : i32
    %11 = arith.cmpi ne, %10, %c0_i32_9 : i32
    scf.if %11 {
      %c0_10 = arith.constant 0 : index
      %c0_11 = arith.constant 0 : index
      %12 = vector.load %arg7[%c0_10, %c0_11] : memref<40x128xf32, #tpu.memory_space<vmem>>, vector<40x128xf32>
      %c0_12 = arith.constant 0 : index
      %c0_13 = arith.constant 0 : index
      %13 = vector.load %arg5[%c0_12, %c0_13] : memref<1x128xf32, #tpu.memory_space<vmem>>, vector<1x128xf32>
      %14 = vector.broadcast %13 : vector<1x128xf32> to vector<40x128xf32>
      %15 = arith.addf %12, %14 : vector<40x128xf32>
      %c0_14 = arith.constant 0 : index
      %c0_15 = arith.constant 0 : index
      %16 = vector.load %arg6[%c0_14, %c0_15] : memref<40x128xf32, #tpu.memory_space<vmem>>, vector<40x128xf32>
      tpu.vector_store %arg6[%c0_14, %c0_15], %15 {strides = array<i32>} : memref<40x128xf32, #tpu.memory_space<vmem>>, vector<40x128xf32>,
    } else {
    }
    return
  }
  func.func @transform_0(%arg0: i32, %arg1: i32, %arg2: i32) -> (i32, i32) {
    %c0_i32 = arith.constant 0 : i32
    return %arg0, %arg2 : i32, i32
  }
  func.func @transform_1(%arg0: i32, %arg1: i32, %arg2: i32) -> (i32, i32) {
    %c0_i32 = arith.constant 0 : i32
    return %arg2, %arg1 : i32, i32
  }
  func.func @transform_2(%arg0: i32, %arg1: i32, %arg2: i32) -> (i32, i32) {
    %c0_i32 = arith.constant 0 : i32
    %c0_i32_0 = arith.constant 0 : i32
    return %c0_i32, %arg1 : i32, i32
  }
  func.func @transform_3(%arg0: i32, %arg1: i32, %arg2: i32) -> (i32, i32) {
    %c0_i32 = arith.constant 0 : i32
    return %arg0, %arg1 : i32, i32
  }
}

module attributes {stable_mosaic.version = 11 : i64} {
  func.func @_ln_matmul_kernel(%arg0: i32, %arg1: i32, %arg2: memref<40x64xf32, #tpu.memory_space<vmem>>, %arg3: memref<1x64xf32, #tpu.memory_space<vmem>>, %arg4: memref<1x64xf32, #tpu.memory_space<vmem>>, %arg5: memref<64x128xbf16, #tpu.memory_space<vmem>>, %arg6: memref<1x128xf32, #tpu.memory_space<vmem>>, %arg7: memref<40x128xf32, #tpu.memory_space<vmem>>) attributes {dimension_semantics = [#tpu.dimension_semantics<parallel>, #tpu.dimension_semantics<parallel>], iteration_bounds = array<i64: 1, 1>, scalar_prefetch = 0 : i64, scratch_operands = 0 : i64, tpu.core_type = #tpu.core_type<tc>, window_params = [{transform_indices = @transform_0, window_bounds = array<i64: 40, 64>}, {pipeline_mode = #tpu.pipeline_mode<synchronous>, transform_indices = @transform_1, window_bounds = array<i64: 1, 64>}, {pipeline_mode = #tpu.pipeline_mode<synchronous>, transform_indices = @transform_2, window_bounds = array<i64: 1, 64>}, {transform_indices = @transform_3, window_bounds = array<i64: 64, 128>}, {transform_indices = @transform_4, window_bounds = array<i64: 1, 128>}, {transform_indices = @transform_5, window_bounds = array<i64: 40, 128>}]} {
    %c0 = arith.constant 0 : index
    %c0_0 = arith.constant 0 : index
    %0 = vector.load %arg2[%c0, %c0_0] : memref<40x64xf32, #tpu.memory_space<vmem>>, vector<40x64xf32>
    %cst = arith.constant dense<0.000000e+00> : vector<40xf32>
    %1 = vector.multi_reduction <add>, %0, %cst [1] : vector<40x64xf32> to vector<40xf32>
    %2 = vector.shape_cast %1 : vector<40xf32> to vector<40x1xf32>
    %cst_1 = arith.constant 6.400000e+01 : f32
    %3 = vector.broadcast %cst_1 : f32 to vector<40x1xf32>
    %4 = arith.divf %2, %3 : vector<40x1xf32>
    %5 = vector.broadcast %4 : vector<40x1xf32> to vector<40x64xf32>
    %6 = arith.subf %0, %5 : vector<40x64xf32>
    %7 = arith.mulf %6, %6 : vector<40x64xf32>
    %cst_2 = arith.constant dense<0.000000e+00> : vector<40xf32>
    %8 = vector.multi_reduction <add>, %7, %cst_2 [1] : vector<40x64xf32> to vector<40xf32>
    %9 = vector.shape_cast %8 : vector<40xf32> to vector<40x1xf32>
    %cst_3 = arith.constant 6.400000e+01 : f32
    %10 = vector.broadcast %cst_3 : f32 to vector<40x1xf32>
    %11 = arith.divf %9, %10 : vector<40x1xf32>
    %12 = vector.broadcast %4 : vector<40x1xf32> to vector<40x64xf32>
    %13 = arith.subf %0, %12 : vector<40x64xf32>
    %cst_4 = arith.constant 9.99999974E-5 : f32
    %14 = vector.broadcast %cst_4 : f32 to vector<40x1xf32>
    %15 = arith.addf %11, %14 : vector<40x1xf32>
    %16 = math.rsqrt %15 : vector<40x1xf32>
    %17 = vector.broadcast %16 : vector<40x1xf32> to vector<40x64xf32>
    %18 = arith.mulf %13, %17 : vector<40x64xf32>
    %c0_5 = arith.constant 0 : index
    %c0_6 = arith.constant 0 : index
    %19 = vector.load %arg3[%c0_5, %c0_6] : memref<1x64xf32, #tpu.memory_space<vmem>>, vector<1x64xf32>
    %20 = vector.broadcast %19 : vector<1x64xf32> to vector<40x64xf32>
    %21 = arith.mulf %18, %20 : vector<40x64xf32>
    %c0_7 = arith.constant 0 : index
    %c0_8 = arith.constant 0 : index
    %22 = vector.load %arg4[%c0_7, %c0_8] : memref<1x64xf32, #tpu.memory_space<vmem>>, vector<1x64xf32>
    %23 = vector.broadcast %22 : vector<1x64xf32> to vector<40x64xf32>
    %24 = arith.addf %21, %23 : vector<40x64xf32>
    %25 = arith.truncf %24 : vector<40x64xf32> to vector<40x64xbf16>
    %c0_9 = arith.constant 0 : index
    %c0_10 = arith.constant 0 : index
    %26 = vector.load %arg5[%c0_9, %c0_10] : memref<64x128xbf16, #tpu.memory_space<vmem>>, vector<64x128xbf16>
    %cst_11 = arith.constant dense<0.000000e+00> : vector<40x128xf32>
    %27 = tpu.matmul %25, %26, %cst_11 {dimension_numbers = #tpu.dot_dimension_numbers<[1], [0], [0], [1], [0, 0, 1, 1], [], []>} : vector<40x64xbf16>, vector<64x128xbf16>, vector<40x128xf32> -> vector<40x128xf32>
    %c0_12 = arith.constant 0 : index
    %c0_13 = arith.constant 0 : index
    %28 = vector.load %arg6[%c0_12, %c0_13] : memref<1x128xf32, #tpu.memory_space<vmem>>, vector<1x128xf32>
    %29 = vector.broadcast %28 : vector<1x128xf32> to vector<40x128xf32>
    %30 = arith.addf %27, %29 : vector<40x128xf32>
    %c0_14 = arith.constant 0 : index
    %c0_15 = arith.constant 0 : index
    %31 = vector.load %arg7[%c0_14, %c0_15] : memref<40x128xf32, #tpu.memory_space<vmem>>, vector<40x128xf32>
    tpu.vector_store %arg7[%c0_14, %c0_15], %30 {strides = array<i32>} : memref<40x128xf32, #tpu.memory_space<vmem>>, vector<40x128xf32>,
    return
  }
  func.func @transform_0(%arg0: i32, %arg1: i32) -> (i32, i32) {
    %c0_i32 = arith.constant 0 : i32
    %c0_i32_0 = arith.constant 0 : i32
    return %arg0, %c0_i32 : i32, i32
  }
  func.func @transform_1(%arg0: i32, %arg1: i32) -> (i32, i32) {
    %c0_i32 = arith.constant 0 : i32
    %c0_i32_0 = arith.constant 0 : i32
    %c0_i32_1 = arith.constant 0 : i32
    return %c0_i32, %c0_i32_0 : i32, i32
  }
  func.func @transform_2(%arg0: i32, %arg1: i32) -> (i32, i32) {
    %c0_i32 = arith.constant 0 : i32
    %c0_i32_0 = arith.constant 0 : i32
    %c0_i32_1 = arith.constant 0 : i32
    return %c0_i32, %c0_i32_0 : i32, i32
  }
  func.func @transform_3(%arg0: i32, %arg1: i32) -> (i32, i32) {
    %c0_i32 = arith.constant 0 : i32
    %c0_i32_0 = arith.constant 0 : i32
    return %c0_i32, %arg1 : i32, i32
  }
  func.func @transform_4(%arg0: i32, %arg1: i32) -> (i32, i32) {
    %c0_i32 = arith.constant 0 : i32
    %c0_i32_0 = arith.constant 0 : i32
    return %c0_i32, %arg1 : i32, i32
  }
  func.func @transform_5(%arg0: i32, %arg1: i32) -> (i32, i32) {
    %c0_i32 = arith.constant 0 : i32
    return %arg0, %arg1 : i32, i32
  }
}

module attributes {stable_mosaic.version = 11 : i64} {
  func.func @_matmul_kernel(%arg0: i32, %arg1: i32, %arg2: i32, %arg3: memref<40x512xbf16, #tpu.memory_space<vmem>>, %arg4: memref<512x128xbf16, #tpu.memory_space<vmem>>, %arg5: memref<1x128xf32, #tpu.memory_space<vmem>>, %arg6: memref<40x128xf32, #tpu.memory_space<vmem>>, %arg7: memref<40x128xf32, #tpu.memory_space<vmem>>, %arg8: memref<40x128xf32, #tpu.memory_space<vmem>>) attributes {dimension_semantics = [#tpu.dimension_semantics<parallel>, #tpu.dimension_semantics<parallel>, #tpu.dimension_semantics<arbitrary>], iteration_bounds = array<i64: 1, 1, 4>, scalar_prefetch = 0 : i64, scratch_operands = 1 : i64, tpu.core_type = #tpu.core_type<tc>, window_params = [{transform_indices = @transform_0, window_bounds = array<i64: 40, 512>}, {transform_indices = @transform_1, window_bounds = array<i64: 512, 128>}, {transform_indices = @transform_2, window_bounds = array<i64: 1, 128>}, {transform_indices = @transform_3, window_bounds = array<i64: 40, 128>}, {transform_indices = @transform_4, window_bounds = array<i64: 40, 128>}]} {
    %c0_i32 = arith.constant 0 : i32
    %0 = arith.cmpi eq, %arg2, %c0_i32 : i32
    %1 = arith.extui %0 : i1 to i32
    %c0_i32_0 = arith.constant 0 : i32
    %2 = arith.cmpi ne, %1, %c0_i32_0 : i32
    scf.if %2 {
      %cst_9 = arith.constant 0.000000e+00 : f32
      %12 = vector.broadcast %cst_9 : f32 to vector<40x128xf32>
      %c0_10 = arith.constant 0 : index
      %c0_11 = arith.constant 0 : index
      %13 = vector.load %arg8[%c0_10, %c0_11] : memref<40x128xf32, #tpu.memory_space<vmem>>, vector<40x128xf32>
      tpu.vector_store %arg8[%c0_10, %c0_11], %12 {strides = array<i32>} : memref<40x128xf32, #tpu.memory_space<vmem>>, vector<40x128xf32>,
    } else {
    }
    %c0 = arith.constant 0 : index
    %c0_1 = arith.constant 0 : index
    %3 = vector.load %arg8[%c0, %c0_1] : memref<40x128xf32, #tpu.memory_space<vmem>>, vector<40x128xf32>
    %c0_2 = arith.constant 0 : index
    %c0_3 = arith.constant 0 : index
    %4 = vector.load %arg3[%c0_2, %c0_3] : memref<40x512xbf16, #tpu.memory_space<vmem>>, vector<40x512xbf16>
    %c0_4 = arith.constant 0 : index
    %c0_5 = arith.constant 0 : index
    %5 = vector.load %arg4[%c0_4, %c0_5] : memref<512x128xbf16, #tpu.memory_space<vmem>>, vector<512x128xbf16>
    %cst = arith.constant dense<0.000000e+00> : vector<40x128xf32>
    %6 = tpu.matmul %4, %5, %cst {dimension_numbers = #tpu.dot_dimension_numbers<[1], [0], [0], [1], [0, 0, 1, 1], [], []>} : vector<40x512xbf16>, vector<512x128xbf16>, vector<40x128xf32> -> vector<40x128xf32>
    %7 = arith.addf %3, %6 : vector<40x128xf32>
    %c0_6 = arith.constant 0 : index
    %c0_7 = arith.constant 0 : index
    %8 = vector.load %arg8[%c0_6, %c0_7] : memref<40x128xf32, #tpu.memory_space<vmem>>, vector<40x128xf32>
    tpu.vector_store %arg8[%c0_6, %c0_7], %7 {strides = array<i32>} : memref<40x128xf32, #tpu.memory_space<vmem>>, vector<40x128xf32>,
    %c3_i32 = arith.constant 3 : i32
    %9 = arith.cmpi eq, %arg2, %c3_i32 : i32
    %10 = arith.extui %9 : i1 to i32
    %c0_i32_8 = arith.constant 0 : i32
    %11 = arith.cmpi ne, %10, %c0_i32_8 : i32
    scf.if %11 {
      %c0_9 = arith.constant 0 : index
      %c0_10 = arith.constant 0 : index
      %12 = vector.load %arg8[%c0_9, %c0_10] : memref<40x128xf32, #tpu.memory_space<vmem>>, vector<40x128xf32>
      %c0_11 = arith.constant 0 : index
      %c0_12 = arith.constant 0 : index
      %13 = vector.load %arg5[%c0_11, %c0_12] : memref<1x128xf32, #tpu.memory_space<vmem>>, vector<1x128xf32>
      %14 = vector.broadcast %13 : vector<1x128xf32> to vector<40x128xf32>
      %15 = arith.addf %12, %14 : vector<40x128xf32>
      %cst_13 = arith.constant 5.000000e-01 : f32
      %16 = vector.broadcast %cst_13 : f32 to vector<40x128xf32>
      %17 = arith.mulf %16, %15 : vector<40x128xf32>
      %cst_14 = arith.constant 4.471500e-02 : f32
      %18 = vector.broadcast %cst_14 : f32 to vector<40x128xf32>
      %19 = arith.mulf %18, %15 : vector<40x128xf32>
      %20 = arith.mulf %19, %15 : vector<40x128xf32>
      %21 = arith.mulf %20, %15 : vector<40x128xf32>
      %22 = arith.addf %15, %21 : vector<40x128xf32>
      %cst_15 = arith.constant 0.797884583 : f32
      %23 = vector.broadcast %cst_15 : f32 to vector<40x128xf32>
      %24 = arith.mulf %23, %22 : vector<40x128xf32>
      %25 = math.tanh %24 : vector<40x128xf32>
      %cst_16 = arith.constant 1.000000e+00 : f32
      %26 = vector.broadcast %cst_16 : f32 to vector<40x128xf32>
      %27 = arith.addf %26, %25 : vector<40x128xf32>
      %28 = arith.mulf %17, %27 : vector<40x128xf32>
      %c0_17 = arith.constant 0 : index
      %c0_18 = arith.constant 0 : index
      %29 = vector.load %arg6[%c0_17, %c0_18] : memref<40x128xf32, #tpu.memory_space<vmem>>, vector<40x128xf32>
      %30 = arith.addf %28, %29 : vector<40x128xf32>
      %c0_19 = arith.constant 0 : index
      %c0_20 = arith.constant 0 : index
      %31 = vector.load %arg7[%c0_19, %c0_20] : memref<40x128xf32, #tpu.memory_space<vmem>>, vector<40x128xf32>
      tpu.vector_store %arg7[%c0_19, %c0_20], %30 {strides = array<i32>} : memref<40x128xf32, #tpu.memory_space<vmem>>, vector<40x128xf32>,
    } else {
    }
    return
  }
  func.func @transform_0(%arg0: i32, %arg1: i32, %arg2: i32) -> (i32, i32) {
    %c0_i32 = arith.constant 0 : i32
    return %arg0, %arg2 : i32, i32
  }
  func.func @transform_1(%arg0: i32, %arg1: i32, %arg2: i32) -> (i32, i32) {
    %c0_i32 = arith.constant 0 : i32
    return %arg2, %arg1 : i32, i32
  }
  func.func @transform_2(%arg0: i32, %arg1: i32, %arg2: i32) -> (i32, i32) {
    %c0_i32 = arith.constant 0 : i32
    %c0_i32_0 = arith.constant 0 : i32
    return %c0_i32, %arg1 : i32, i32
  }
  func.func @transform_3(%arg0: i32, %arg1: i32, %arg2: i32) -> (i32, i32) {
    %c0_i32 = arith.constant 0 : i32
    return %arg0, %arg1 : i32, i32
  }
  func.func @transform_4(%arg0: i32, %arg1: i32, %arg2: i32) -> (i32, i32) {
    %c0_i32 = arith.constant 0 : i32
    return %arg0, %arg1 : i32, i32
  }
}

module attributes {stable_mosaic.version = 11 : i64} {
  func.func @_ln_matmul_kernel(%arg0: i32, %arg1: i32, %arg2: memref<40x128xf32, #tpu.memory_space<vmem>>, %arg3: memref<1x128xf32, #tpu.memory_space<vmem>>, %arg4: memref<1x128xf32, #tpu.memory_space<vmem>>, %arg5: memref<128x384xbf16, #tpu.memory_space<vmem>>, %arg6: memref<1x384xf32, #tpu.memory_space<vmem>>, %arg7: memref<40x384xf32, #tpu.memory_space<vmem>>) attributes {dimension_semantics = [#tpu.dimension_semantics<parallel>, #tpu.dimension_semantics<parallel>], iteration_bounds = array<i64: 1, 1>, scalar_prefetch = 0 : i64, scratch_operands = 0 : i64, tpu.core_type = #tpu.core_type<tc>, window_params = [{transform_indices = @transform_0, window_bounds = array<i64: 40, 128>}, {pipeline_mode = #tpu.pipeline_mode<synchronous>, transform_indices = @transform_1, window_bounds = array<i64: 1, 128>}, {pipeline_mode = #tpu.pipeline_mode<synchronous>, transform_indices = @transform_2, window_bounds = array<i64: 1, 128>}, {transform_indices = @transform_3, window_bounds = array<i64: 128, 384>}, {transform_indices = @transform_4, window_bounds = array<i64: 1, 384>}, {transform_indices = @transform_5, window_bounds = array<i64: 40, 384>}]} {
    %c0 = arith.constant 0 : index
    %c0_0 = arith.constant 0 : index
    %0 = vector.load %arg2[%c0, %c0_0] : memref<40x128xf32, #tpu.memory_space<vmem>>, vector<40x128xf32>
    %cst = arith.constant dense<0.000000e+00> : vector<40xf32>
    %1 = vector.multi_reduction <add>, %0, %cst [1] : vector<40x128xf32> to vector<40xf32>
    %2 = vector.shape_cast %1 : vector<40xf32> to vector<40x1xf32>
    %cst_1 = arith.constant 1.280000e+02 : f32
    %3 = vector.broadcast %cst_1 : f32 to vector<40x1xf32>
    %4 = arith.divf %2, %3 : vector<40x1xf32>
    %5 = vector.broadcast %4 : vector<40x1xf32> to vector<40x128xf32>
    %6 = arith.subf %0, %5 : vector<40x128xf32>
    %7 = arith.mulf %6, %6 : vector<40x128xf32>
    %cst_2 = arith.constant dense<0.000000e+00> : vector<40xf32>
    %8 = vector.multi_reduction <add>, %7, %cst_2 [1] : vector<40x128xf32> to vector<40xf32>
    %9 = vector.shape_cast %8 : vector<40xf32> to vector<40x1xf32>
    %cst_3 = arith.constant 1.280000e+02 : f32
    %10 = vector.broadcast %cst_3 : f32 to vector<40x1xf32>
    %11 = arith.divf %9, %10 : vector<40x1xf32>
    %12 = vector.broadcast %4 : vector<40x1xf32> to vector<40x128xf32>
    %13 = arith.subf %0, %12 : vector<40x128xf32>
    %cst_4 = arith.constant 9.99999974E-5 : f32
    %14 = vector.broadcast %cst_4 : f32 to vector<40x1xf32>
    %15 = arith.addf %11, %14 : vector<40x1xf32>
    %16 = math.rsqrt %15 : vector<40x1xf32>
    %17 = vector.broadcast %16 : vector<40x1xf32> to vector<40x128xf32>
    %18 = arith.mulf %13, %17 : vector<40x128xf32>
    %c0_5 = arith.constant 0 : index
    %c0_6 = arith.constant 0 : index
    %19 = vector.load %arg3[%c0_5, %c0_6] : memref<1x128xf32, #tpu.memory_space<vmem>>, vector<1x128xf32>
    %20 = vector.broadcast %19 : vector<1x128xf32> to vector<40x128xf32>
    %21 = arith.mulf %18, %20 : vector<40x128xf32>
    %c0_7 = arith.constant 0 : index
    %c0_8 = arith.constant 0 : index
    %22 = vector.load %arg4[%c0_7, %c0_8] : memref<1x128xf32, #tpu.memory_space<vmem>>, vector<1x128xf32>
    %23 = vector.broadcast %22 : vector<1x128xf32> to vector<40x128xf32>
    %24 = arith.addf %21, %23 : vector<40x128xf32>
    %25 = arith.truncf %24 : vector<40x128xf32> to vector<40x128xbf16>
    %c0_9 = arith.constant 0 : index
    %c0_10 = arith.constant 0 : index
    %26 = vector.load %arg5[%c0_9, %c0_10] : memref<128x384xbf16, #tpu.memory_space<vmem>>, vector<128x384xbf16>
    %cst_11 = arith.constant dense<0.000000e+00> : vector<40x384xf32>
    %27 = tpu.matmul %25, %26, %cst_11 {dimension_numbers = #tpu.dot_dimension_numbers<[1], [0], [0], [1], [0, 0, 1, 1], [], []>} : vector<40x128xbf16>, vector<128x384xbf16>, vector<40x384xf32> -> vector<40x384xf32>
    %c0_12 = arith.constant 0 : index
    %c0_13 = arith.constant 0 : index
    %28 = vector.load %arg6[%c0_12, %c0_13] : memref<1x384xf32, #tpu.memory_space<vmem>>, vector<1x384xf32>
    %29 = vector.broadcast %28 : vector<1x384xf32> to vector<40x384xf32>
    %30 = arith.addf %27, %29 : vector<40x384xf32>
    %c0_14 = arith.constant 0 : index
    %c0_15 = arith.constant 0 : index
    %31 = vector.load %arg7[%c0_14, %c0_15] : memref<40x384xf32, #tpu.memory_space<vmem>>, vector<40x384xf32>
    tpu.vector_store %arg7[%c0_14, %c0_15], %30 {strides = array<i32>} : memref<40x384xf32, #tpu.memory_space<vmem>>, vector<40x384xf32>,
    return
  }
  func.func @transform_0(%arg0: i32, %arg1: i32) -> (i32, i32) {
    %c0_i32 = arith.constant 0 : i32
    %c0_i32_0 = arith.constant 0 : i32
    return %arg0, %c0_i32 : i32, i32
  }
  func.func @transform_1(%arg0: i32, %arg1: i32) -> (i32, i32) {
    %c0_i32 = arith.constant 0 : i32
    %c0_i32_0 = arith.constant 0 : i32
    %c0_i32_1 = arith.constant 0 : i32
    return %c0_i32, %c0_i32_0 : i32, i32
  }
  func.func @transform_2(%arg0: i32, %arg1: i32) -> (i32, i32) {
    %c0_i32 = arith.constant 0 : i32
    %c0_i32_0 = arith.constant 0 : i32
    %c0_i32_1 = arith.constant 0 : i32
    return %c0_i32, %c0_i32_0 : i32, i32
  }
  func.func @transform_3(%arg0: i32, %arg1: i32) -> (i32, i32) {
    %c0_i32 = arith.constant 0 : i32
    %c0_i32_0 = arith.constant 0 : i32
    return %c0_i32, %arg1 : i32, i32
  }
  func.func @transform_4(%arg0: i32, %arg1: i32) -> (i32, i32) {
    %c0_i32 = arith.constant 0 : i32
    %c0_i32_0 = arith.constant 0 : i32
    return %c0_i32, %arg1 : i32, i32
  }
  func.func @transform_5(%arg0: i32, %arg1: i32) -> (i32, i32) {
    %c0_i32 = arith.constant 0 : i32
    return %arg0, %arg1 : i32, i32
  }
}

module attributes {stable_mosaic.version = 11 : i64} {
  func.func @_attention_oproj_kernel(%arg0: i32, %arg1: memref<1x19x128xbf16, #tpu.memory_space<vmem>>, %arg2: memref<1x19x128xbf16, #tpu.memory_space<vmem>>, %arg3: memref<1x19x128xbf16, #tpu.memory_space<vmem>>, %arg4: memref<128x128xbf16, #tpu.memory_space<vmem>>, %arg5: memref<1x128xf32, #tpu.memory_space<vmem>>, %arg6: memref<1x19x128xf32, #tpu.memory_space<vmem>>, %arg7: memref<1x19x128xf32, #tpu.memory_space<vmem>>) attributes {dimension_semantics = [#tpu.dimension_semantics<parallel>], iteration_bounds = array<i64: 2>, scalar_prefetch = 0 : i64, scratch_operands = 0 : i64, tpu.core_type = #tpu.core_type<tc>, window_params = [{transform_indices = @transform_0, window_bounds = array<i64: 1, 19, 128>}, {transform_indices = @transform_1, window_bounds = array<i64: 1, 19, 128>}, {transform_indices = @transform_2, window_bounds = array<i64: 1, 19, 128>}, {pipeline_mode = #tpu.pipeline_mode<synchronous>, transform_indices = @transform_3, window_bounds = array<i64: 128, 128>}, {pipeline_mode = #tpu.pipeline_mode<synchronous>, transform_indices = @transform_4, window_bounds = array<i64: 1, 128>}, {transform_indices = @transform_5, window_bounds = array<i64: 1, 19, 128>}, {transform_indices = @transform_6, window_bounds = array<i64: 1, 19, 128>}]} {
    %c0 = arith.constant 0 : index
    %c0_0 = arith.constant 0 : index
    %c0_1 = arith.constant 0 : index
    %0 = vector.load %arg1[%c0, %c0_0, %c0_1] : memref<1x19x128xbf16, #tpu.memory_space<vmem>>, vector<1x19x128xbf16>
    %1 = vector.shape_cast %0 : vector<1x19x128xbf16> to vector<19x128xbf16>
    %c0_2 = arith.constant 0 : index
    %c0_3 = arith.constant 0 : index
    %c0_4 = arith.constant 0 : index
    %2 = vector.load %arg2[%c0_2, %c0_3, %c0_4] : memref<1x19x128xbf16, #tpu.memory_space<vmem>>, vector<1x19x128xbf16>
    %3 = vector.shape_cast %2 : vector<1x19x128xbf16> to vector<19x128xbf16>
    %c0_5 = arith.constant 0 : index
    %c0_6 = arith.constant 0 : index
    %c0_7 = arith.constant 0 : index
    %4 = vector.load %arg3[%c0_5, %c0_6, %c0_7] : memref<1x19x128xbf16, #tpu.memory_space<vmem>>, vector<1x19x128xbf16>
    %5 = vector.shape_cast %4 : vector<1x19x128xbf16> to vector<19x128xbf16>
    %c0_8 = arith.constant 0 : index
    %c0_9 = arith.constant 0 : index
    %6 = vector.load %arg4[%c0_8, %c0_9] : memref<128x128xbf16, #tpu.memory_space<vmem>>, vector<128x128xbf16>
    %cst = arith.constant 0.000000e+00 : f32
    %7 = vector.broadcast %cst : f32 to vector<19x128xf32>
    %8 = vector.extract_strided_slice %1 {offsets = [0, 0], sizes = [19, 32], strides = [1, 1]} : vector<19x128xbf16> to vector<19x32xbf16>
    %9 = vector.extract_strided_slice %3 {offsets = [0, 0], sizes = [19, 32], strides = [1, 1]} : vector<19x128xbf16> to vector<19x32xbf16>
    %10 = vector.extract_strided_slice %5 {offsets = [0, 0], sizes = [19, 32], strides = [1, 1]} : vector<19x128xbf16> to vector<19x32xbf16>
    %cst_10 = arith.constant dense<0.000000e+00> : vector<19x19xf32>
    %11 = tpu.matmul %8, %9, %cst_10 {dimension_numbers = #tpu.dot_dimension_numbers<[1], [1], [0], [0], [0, 0, 1, 0], [], []>} : vector<19x32xbf16>, vector<19x32xbf16>, vector<19x19xf32> -> vector<19x19xf32>
    %cst_11 = arith.constant 0.176776692 : f32
    %12 = vector.broadcast %cst_11 : f32 to vector<19x19xf32>
    %13 = arith.mulf %11, %12 : vector<19x19xf32>
    %cst_12 = arith.constant dense<0xFF800000> : vector<19xf32>
    %14 = vector.multi_reduction <maximumf>, %13, %cst_12 [1] : vector<19x19xf32> to vector<19xf32>
    %15 = vector.shape_cast %14 : vector<19xf32> to vector<19x1xf32>
    %16 = vector.broadcast %15 : vector<19x1xf32> to vector<19x19xf32>
    %17 = arith.subf %13, %16 : vector<19x19xf32>
    %18 = math.exp %17 : vector<19x19xf32>
    %cst_13 = arith.constant dense<0.000000e+00> : vector<19xf32>
    %19 = vector.multi_reduction <add>, %18, %cst_13 [1] : vector<19x19xf32> to vector<19xf32>
    %20 = vector.shape_cast %19 : vector<19xf32> to vector<19x1xf32>
    %21 = tpu.reciprocal %20 {approx = true} : vector<19x1xf32> -> vector<19x1xf32>
    %22 = vector.broadcast %21 : vector<19x1xf32> to vector<19x19xf32>
    %23 = arith.mulf %18, %22 : vector<19x19xf32>
    %24 = arith.truncf %23 : vector<19x19xf32> to vector<19x19xbf16>
    %cst_14 = arith.constant dense<0.000000e+00> : vector<19x32xf32>
    %25 = tpu.matmul %24, %10, %cst_14 {dimension_numbers = #tpu.dot_dimension_numbers<[1], [0], [0], [1], [0, 0, 1, 1], [], []>} : vector<19x19xbf16>, vector<19x32xbf16>, vector<19x32xf32> -> vector<19x32xf32>
    %26 = arith.truncf %25 : vector<19x32xf32> to vector<19x32xbf16>
    %27 = vector.extract_strided_slice %6 {offsets = [0, 0], sizes = [32, 128], strides = [1, 1]} : vector<128x128xbf16> to vector<32x128xbf16>
    %cst_15 = arith.constant dense<0.000000e+00> : vector<19x128xf32>
    %28 = tpu.matmul %26, %27, %cst_15 {dimension_numbers = #tpu.dot_dimension_numbers<[1], [0], [0], [1], [0, 0, 1, 1], [], []>} : vector<19x32xbf16>, vector<32x128xbf16>, vector<19x128xf32> -> vector<19x128xf32>
    %29 = arith.addf %7, %28 : vector<19x128xf32>
    %30 = vector.extract_strided_slice %1 {offsets = [0, 32], sizes = [19, 32], strides = [1, 1]} : vector<19x128xbf16> to vector<19x32xbf16>
    %31 = vector.extract_strided_slice %3 {offsets = [0, 32], sizes = [19, 32], strides = [1, 1]} : vector<19x128xbf16> to vector<19x32xbf16>
    %32 = vector.extract_strided_slice %5 {offsets = [0, 32], sizes = [19, 32], strides = [1, 1]} : vector<19x128xbf16> to vector<19x32xbf16>
    %cst_16 = arith.constant dense<0.000000e+00> : vector<19x19xf32>
    %33 = tpu.matmul %30, %31, %cst_16 {dimension_numbers = #tpu.dot_dimension_numbers<[1], [1], [0], [0], [0, 0, 1, 0], [], []>} : vector<19x32xbf16>, vector<19x32xbf16>, vector<19x19xf32> -> vector<19x19xf32>
    %cst_17 = arith.constant 0.176776692 : f32
    %34 = vector.broadcast %cst_17 : f32 to vector<19x19xf32>
    %35 = arith.mulf %33, %34 : vector<19x19xf32>
    %cst_18 = arith.constant dense<0xFF800000> : vector<19xf32>
    %36 = vector.multi_reduction <maximumf>, %35, %cst_18 [1] : vector<19x19xf32> to vector<19xf32>
    %37 = vector.shape_cast %36 : vector<19xf32> to vector<19x1xf32>
    %38 = vector.broadcast %37 : vector<19x1xf32> to vector<19x19xf32>
    %39 = arith.subf %35, %38 : vector<19x19xf32>
    %40 = math.exp %39 : vector<19x19xf32>
    %cst_19 = arith.constant dense<0.000000e+00> : vector<19xf32>
    %41 = vector.multi_reduction <add>, %40, %cst_19 [1] : vector<19x19xf32> to vector<19xf32>
    %42 = vector.shape_cast %41 : vector<19xf32> to vector<19x1xf32>
    %43 = tpu.reciprocal %42 {approx = true} : vector<19x1xf32> -> vector<19x1xf32>
    %44 = vector.broadcast %43 : vector<19x1xf32> to vector<19x19xf32>
    %45 = arith.mulf %40, %44 : vector<19x19xf32>
    %46 = arith.truncf %45 : vector<19x19xf32> to vector<19x19xbf16>
    %cst_20 = arith.constant dense<0.000000e+00> : vector<19x32xf32>
    %47 = tpu.matmul %46, %32, %cst_20 {dimension_numbers = #tpu.dot_dimension_numbers<[1], [0], [0], [1], [0, 0, 1, 1], [], []>} : vector<19x19xbf16>, vector<19x32xbf16>, vector<19x32xf32> -> vector<19x32xf32>
    %48 = arith.truncf %47 : vector<19x32xf32> to vector<19x32xbf16>
    %49 = vector.extract_strided_slice %6 {offsets = [32, 0], sizes = [32, 128], strides = [1, 1]} : vector<128x128xbf16> to vector<32x128xbf16>
    %cst_21 = arith.constant dense<0.000000e+00> : vector<19x128xf32>
    %50 = tpu.matmul %48, %49, %cst_21 {dimension_numbers = #tpu.dot_dimension_numbers<[1], [0], [0], [1], [0, 0, 1, 1], [], []>} : vector<19x32xbf16>, vector<32x128xbf16>, vector<19x128xf32> -> vector<19x128xf32>
    %51 = arith.addf %29, %50 : vector<19x128xf32>
    %52 = vector.extract_strided_slice %1 {offsets = [0, 64], sizes = [19, 32], strides = [1, 1]} : vector<19x128xbf16> to vector<19x32xbf16>
    %53 = vector.extract_strided_slice %3 {offsets = [0, 64], sizes = [19, 32], strides = [1, 1]} : vector<19x128xbf16> to vector<19x32xbf16>
    %54 = vector.extract_strided_slice %5 {offsets = [0, 64], sizes = [19, 32], strides = [1, 1]} : vector<19x128xbf16> to vector<19x32xbf16>
    %cst_22 = arith.constant dense<0.000000e+00> : vector<19x19xf32>
    %55 = tpu.matmul %52, %53, %cst_22 {dimension_numbers = #tpu.dot_dimension_numbers<[1], [1], [0], [0], [0, 0, 1, 0], [], []>} : vector<19x32xbf16>, vector<19x32xbf16>, vector<19x19xf32> -> vector<19x19xf32>
    %cst_23 = arith.constant 0.176776692 : f32
    %56 = vector.broadcast %cst_23 : f32 to vector<19x19xf32>
    %57 = arith.mulf %55, %56 : vector<19x19xf32>
    %cst_24 = arith.constant dense<0xFF800000> : vector<19xf32>
    %58 = vector.multi_reduction <maximumf>, %57, %cst_24 [1] : vector<19x19xf32> to vector<19xf32>
    %59 = vector.shape_cast %58 : vector<19xf32> to vector<19x1xf32>
    %60 = vector.broadcast %59 : vector<19x1xf32> to vector<19x19xf32>
    %61 = arith.subf %57, %60 : vector<19x19xf32>
    %62 = math.exp %61 : vector<19x19xf32>
    %cst_25 = arith.constant dense<0.000000e+00> : vector<19xf32>
    %63 = vector.multi_reduction <add>, %62, %cst_25 [1] : vector<19x19xf32> to vector<19xf32>
    %64 = vector.shape_cast %63 : vector<19xf32> to vector<19x1xf32>
    %65 = tpu.reciprocal %64 {approx = true} : vector<19x1xf32> -> vector<19x1xf32>
    %66 = vector.broadcast %65 : vector<19x1xf32> to vector<19x19xf32>
    %67 = arith.mulf %62, %66 : vector<19x19xf32>
    %68 = arith.truncf %67 : vector<19x19xf32> to vector<19x19xbf16>
    %cst_26 = arith.constant dense<0.000000e+00> : vector<19x32xf32>
    %69 = tpu.matmul %68, %54, %cst_26 {dimension_numbers = #tpu.dot_dimension_numbers<[1], [0], [0], [1], [0, 0, 1, 1], [], []>} : vector<19x19xbf16>, vector<19x32xbf16>, vector<19x32xf32> -> vector<19x32xf32>
    %70 = arith.truncf %69 : vector<19x32xf32> to vector<19x32xbf16>
    %71 = vector.extract_strided_slice %6 {offsets = [64, 0], sizes = [32, 128], strides = [1, 1]} : vector<128x128xbf16> to vector<32x128xbf16>
    %cst_27 = arith.constant dense<0.000000e+00> : vector<19x128xf32>
    %72 = tpu.matmul %70, %71, %cst_27 {dimension_numbers = #tpu.dot_dimension_numbers<[1], [0], [0], [1], [0, 0, 1, 1], [], []>} : vector<19x32xbf16>, vector<32x128xbf16>, vector<19x128xf32> -> vector<19x128xf32>
    %73 = arith.addf %51, %72 : vector<19x128xf32>
    %74 = vector.extract_strided_slice %1 {offsets = [0, 96], sizes = [19, 32], strides = [1, 1]} : vector<19x128xbf16> to vector<19x32xbf16>
    %75 = vector.extract_strided_slice %3 {offsets = [0, 96], sizes = [19, 32], strides = [1, 1]} : vector<19x128xbf16> to vector<19x32xbf16>
    %76 = vector.extract_strided_slice %5 {offsets = [0, 96], sizes = [19, 32], strides = [1, 1]} : vector<19x128xbf16> to vector<19x32xbf16>
    %cst_28 = arith.constant dense<0.000000e+00> : vector<19x19xf32>
    %77 = tpu.matmul %74, %75, %cst_28 {dimension_numbers = #tpu.dot_dimension_numbers<[1], [1], [0], [0], [0, 0, 1, 0], [], []>} : vector<19x32xbf16>, vector<19x32xbf16>, vector<19x19xf32> -> vector<19x19xf32>
    %cst_29 = arith.constant 0.176776692 : f32
    %78 = vector.broadcast %cst_29 : f32 to vector<19x19xf32>
    %79 = arith.mulf %77, %78 : vector<19x19xf32>
    %cst_30 = arith.constant dense<0xFF800000> : vector<19xf32>
    %80 = vector.multi_reduction <maximumf>, %79, %cst_30 [1] : vector<19x19xf32> to vector<19xf32>
    %81 = vector.shape_cast %80 : vector<19xf32> to vector<19x1xf32>
    %82 = vector.broadcast %81 : vector<19x1xf32> to vector<19x19xf32>
    %83 = arith.subf %79, %82 : vector<19x19xf32>
    %84 = math.exp %83 : vector<19x19xf32>
    %cst_31 = arith.constant dense<0.000000e+00> : vector<19xf32>
    %85 = vector.multi_reduction <add>, %84, %cst_31 [1] : vector<19x19xf32> to vector<19xf32>
    %86 = vector.shape_cast %85 : vector<19xf32> to vector<19x1xf32>
    %87 = tpu.reciprocal %86 {approx = true} : vector<19x1xf32> -> vector<19x1xf32>
    %88 = vector.broadcast %87 : vector<19x1xf32> to vector<19x19xf32>
    %89 = arith.mulf %84, %88 : vector<19x19xf32>
    %90 = arith.truncf %89 : vector<19x19xf32> to vector<19x19xbf16>
    %cst_32 = arith.constant dense<0.000000e+00> : vector<19x32xf32>
    %91 = tpu.matmul %90, %76, %cst_32 {dimension_numbers = #tpu.dot_dimension_numbers<[1], [0], [0], [1], [0, 0, 1, 1], [], []>} : vector<19x19xbf16>, vector<19x32xbf16>, vector<19x32xf32> -> vector<19x32xf32>
    %92 = arith.truncf %91 : vector<19x32xf32> to vector<19x32xbf16>
    %93 = vector.extract_strided_slice %6 {offsets = [96, 0], sizes = [32, 128], strides = [1, 1]} : vector<128x128xbf16> to vector<32x128xbf16>
    %cst_33 = arith.constant dense<0.000000e+00> : vector<19x128xf32>
    %94 = tpu.matmul %92, %93, %cst_33 {dimension_numbers = #tpu.dot_dimension_numbers<[1], [0], [0], [1], [0, 0, 1, 1], [], []>} : vector<19x32xbf16>, vector<32x128xbf16>, vector<19x128xf32> -> vector<19x128xf32>
    %95 = arith.addf %73, %94 : vector<19x128xf32>
    %c0_34 = arith.constant 0 : index
    %c0_35 = arith.constant 0 : index
    %96 = vector.load %arg5[%c0_34, %c0_35] : memref<1x128xf32, #tpu.memory_space<vmem>>, vector<1x128xf32>
    %97 = vector.broadcast %96 : vector<1x128xf32> to vector<19x128xf32>
    %98 = arith.addf %95, %97 : vector<19x128xf32>
    %c0_36 = arith.constant 0 : index
    %c0_37 = arith.constant 0 : index
    %c0_38 = arith.constant 0 : index
    %99 = vector.load %arg6[%c0_36, %c0_37, %c0_38] : memref<1x19x128xf32, #tpu.memory_space<vmem>>, vector<1x19x128xf32>
    %100 = vector.shape_cast %99 : vector<1x19x128xf32> to vector<19x128xf32>
    %101 = arith.addf %98, %100 : vector<19x128xf32>
    %c0_39 = arith.constant 0 : index
    %c0_40 = arith.constant 0 : index
    %c0_41 = arith.constant 0 : index
    %102 = vector.load %arg7[%c0_39, %c0_40, %c0_41] : memref<1x19x128xf32, #tpu.memory_space<vmem>>, vector<1x19x128xf32>
    %103 = vector.shape_cast %102 : vector<1x19x128xf32> to vector<19x128xf32>
    %104 = vector.shape_cast %101 : vector<19x128xf32> to vector<1x19x128xf32>
    tpu.vector_store %arg7[%c0_39, %c0_40, %c0_41], %104 {strides = array<i32>} : memref<1x19x128xf32, #tpu.memory_space<vmem>>, vector<1x19x128xf32>,
    return
  }
  func.func @transform_0(%arg0: i32) -> (i32, i32, i32) {
    %c0_i32 = arith.constant 0 : i32
    %c0_i32_0 = arith.constant 0 : i32
    %c0_i32_1 = arith.constant 0 : i32
    return %arg0, %c0_i32, %c0_i32_0 : i32, i32, i32
  }
  func.func @transform_1(%arg0: i32) -> (i32, i32, i32) {
    %c0_i32 = arith.constant 0 : i32
    %c0_i32_0 = arith.constant 0 : i32
    %c0_i32_1 = arith.constant 0 : i32
    return %arg0, %c0_i32, %c0_i32_0 : i32, i32, i32
  }
  func.func @transform_2(%arg0: i32) -> (i32, i32, i32) {
    %c0_i32 = arith.constant 0 : i32
    %c0_i32_0 = arith.constant 0 : i32
    %c0_i32_1 = arith.constant 0 : i32
    return %arg0, %c0_i32, %c0_i32_0 : i32, i32, i32
  }
  func.func @transform_3(%arg0: i32) -> (i32, i32) {
    %c0_i32 = arith.constant 0 : i32
    %c0_i32_0 = arith.constant 0 : i32
    %c0_i32_1 = arith.constant 0 : i32
    return %c0_i32, %c0_i32_0 : i32, i32
  }
  func.func @transform_4(%arg0: i32) -> (i32, i32) {
    %c0_i32 = arith.constant 0 : i32
    %c0_i32_0 = arith.constant 0 : i32
    %c0_i32_1 = arith.constant 0 : i32
    return %c0_i32, %c0_i32_0 : i32, i32
  }
  func.func @transform_5(%arg0: i32) -> (i32, i32, i32) {
    %c0_i32 = arith.constant 0 : i32
    %c0_i32_0 = arith.constant 0 : i32
    %c0_i32_1 = arith.constant 0 : i32
    return %arg0, %c0_i32, %c0_i32_0 : i32, i32, i32
  }
  func.func @transform_6(%arg0: i32) -> (i32, i32, i32) {
    %c0_i32 = arith.constant 0 : i32
    %c0_i32_0 = arith.constant 0 : i32
    %c0_i32_1 = arith.constant 0 : i32
    return %arg0, %c0_i32, %c0_i32_0 : i32, i32, i32
  }
}

module attributes {stable_mosaic.version = 11 : i64} {
  func.func @_ln_matmul_kernel(%arg0: i32, %arg1: i32, %arg2: memref<40x128xf32, #tpu.memory_space<vmem>>, %arg3: memref<1x128xf32, #tpu.memory_space<vmem>>, %arg4: memref<1x128xf32, #tpu.memory_space<vmem>>, %arg5: memref<128x256xbf16, #tpu.memory_space<vmem>>, %arg6: memref<1x256xf32, #tpu.memory_space<vmem>>, %arg7: memref<40x256xf32, #tpu.memory_space<vmem>>) attributes {dimension_semantics = [#tpu.dimension_semantics<parallel>, #tpu.dimension_semantics<parallel>], iteration_bounds = array<i64: 1, 1>, scalar_prefetch = 0 : i64, scratch_operands = 0 : i64, tpu.core_type = #tpu.core_type<tc>, window_params = [{transform_indices = @transform_0, window_bounds = array<i64: 40, 128>}, {pipeline_mode = #tpu.pipeline_mode<synchronous>, transform_indices = @transform_1, window_bounds = array<i64: 1, 128>}, {pipeline_mode = #tpu.pipeline_mode<synchronous>, transform_indices = @transform_2, window_bounds = array<i64: 1, 128>}, {transform_indices = @transform_3, window_bounds = array<i64: 128, 256>}, {transform_indices = @transform_4, window_bounds = array<i64: 1, 256>}, {transform_indices = @transform_5, window_bounds = array<i64: 40, 256>}]} {
    %c0 = arith.constant 0 : index
    %c0_0 = arith.constant 0 : index
    %0 = vector.load %arg2[%c0, %c0_0] : memref<40x128xf32, #tpu.memory_space<vmem>>, vector<40x128xf32>
    %cst = arith.constant dense<0.000000e+00> : vector<40xf32>
    %1 = vector.multi_reduction <add>, %0, %cst [1] : vector<40x128xf32> to vector<40xf32>
    %2 = vector.shape_cast %1 : vector<40xf32> to vector<40x1xf32>
    %cst_1 = arith.constant 1.280000e+02 : f32
    %3 = vector.broadcast %cst_1 : f32 to vector<40x1xf32>
    %4 = arith.divf %2, %3 : vector<40x1xf32>
    %5 = vector.broadcast %4 : vector<40x1xf32> to vector<40x128xf32>
    %6 = arith.subf %0, %5 : vector<40x128xf32>
    %7 = arith.mulf %6, %6 : vector<40x128xf32>
    %cst_2 = arith.constant dense<0.000000e+00> : vector<40xf32>
    %8 = vector.multi_reduction <add>, %7, %cst_2 [1] : vector<40x128xf32> to vector<40xf32>
    %9 = vector.shape_cast %8 : vector<40xf32> to vector<40x1xf32>
    %cst_3 = arith.constant 1.280000e+02 : f32
    %10 = vector.broadcast %cst_3 : f32 to vector<40x1xf32>
    %11 = arith.divf %9, %10 : vector<40x1xf32>
    %12 = vector.broadcast %4 : vector<40x1xf32> to vector<40x128xf32>
    %13 = arith.subf %0, %12 : vector<40x128xf32>
    %cst_4 = arith.constant 9.99999974E-5 : f32
    %14 = vector.broadcast %cst_4 : f32 to vector<40x1xf32>
    %15 = arith.addf %11, %14 : vector<40x1xf32>
    %16 = math.rsqrt %15 : vector<40x1xf32>
    %17 = vector.broadcast %16 : vector<40x1xf32> to vector<40x128xf32>
    %18 = arith.mulf %13, %17 : vector<40x128xf32>
    %c0_5 = arith.constant 0 : index
    %c0_6 = arith.constant 0 : index
    %19 = vector.load %arg3[%c0_5, %c0_6] : memref<1x128xf32, #tpu.memory_space<vmem>>, vector<1x128xf32>
    %20 = vector.broadcast %19 : vector<1x128xf32> to vector<40x128xf32>
    %21 = arith.mulf %18, %20 : vector<40x128xf32>
    %c0_7 = arith.constant 0 : index
    %c0_8 = arith.constant 0 : index
    %22 = vector.load %arg4[%c0_7, %c0_8] : memref<1x128xf32, #tpu.memory_space<vmem>>, vector<1x128xf32>
    %23 = vector.broadcast %22 : vector<1x128xf32> to vector<40x128xf32>
    %24 = arith.addf %21, %23 : vector<40x128xf32>
    %25 = arith.truncf %24 : vector<40x128xf32> to vector<40x128xbf16>
    %c0_9 = arith.constant 0 : index
    %c0_10 = arith.constant 0 : index
    %26 = vector.load %arg5[%c0_9, %c0_10] : memref<128x256xbf16, #tpu.memory_space<vmem>>, vector<128x256xbf16>
    %cst_11 = arith.constant dense<0.000000e+00> : vector<40x256xf32>
    %27 = tpu.matmul %25, %26, %cst_11 {dimension_numbers = #tpu.dot_dimension_numbers<[1], [0], [0], [1], [0, 0, 1, 1], [], []>} : vector<40x128xbf16>, vector<128x256xbf16>, vector<40x256xf32> -> vector<40x256xf32>
    %c0_12 = arith.constant 0 : index
    %c0_13 = arith.constant 0 : index
    %28 = vector.load %arg6[%c0_12, %c0_13] : memref<1x256xf32, #tpu.memory_space<vmem>>, vector<1x256xf32>
    %29 = vector.broadcast %28 : vector<1x256xf32> to vector<40x256xf32>
    %30 = arith.addf %27, %29 : vector<40x256xf32>
    %cst_14 = arith.constant 5.000000e-01 : f32
    %31 = vector.broadcast %cst_14 : f32 to vector<40x256xf32>
    %32 = arith.mulf %31, %30 : vector<40x256xf32>
    %cst_15 = arith.constant 4.471500e-02 : f32
    %33 = vector.broadcast %cst_15 : f32 to vector<40x256xf32>
    %34 = arith.mulf %33, %30 : vector<40x256xf32>
    %35 = arith.mulf %34, %30 : vector<40x256xf32>
    %36 = arith.mulf %35, %30 : vector<40x256xf32>
    %37 = arith.addf %30, %36 : vector<40x256xf32>
    %cst_16 = arith.constant 0.797884583 : f32
    %38 = vector.broadcast %cst_16 : f32 to vector<40x256xf32>
    %39 = arith.mulf %38, %37 : vector<40x256xf32>
    %40 = math.tanh %39 : vector<40x256xf32>
    %cst_17 = arith.constant 1.000000e+00 : f32
    %41 = vector.broadcast %cst_17 : f32 to vector<40x256xf32>
    %42 = arith.addf %41, %40 : vector<40x256xf32>
    %43 = arith.mulf %32, %42 : vector<40x256xf32>
    %c0_18 = arith.constant 0 : index
    %c0_19 = arith.constant 0 : index
    %44 = vector.load %arg7[%c0_18, %c0_19] : memref<40x256xf32, #tpu.memory_space<vmem>>, vector<40x256xf32>
    tpu.vector_store %arg7[%c0_18, %c0_19], %43 {strides = array<i32>} : memref<40x256xf32, #tpu.memory_space<vmem>>, vector<40x256xf32>,
    return
  }
  func.func @transform_0(%arg0: i32, %arg1: i32) -> (i32, i32) {
    %c0_i32 = arith.constant 0 : i32
    %c0_i32_0 = arith.constant 0 : i32
    return %arg0, %c0_i32 : i32, i32
  }
  func.func @transform_1(%arg0: i32, %arg1: i32) -> (i32, i32) {
    %c0_i32 = arith.constant 0 : i32
    %c0_i32_0 = arith.constant 0 : i32
    %c0_i32_1 = arith.constant 0 : i32
    return %c0_i32, %c0_i32_0 : i32, i32
  }
  func.func @transform_2(%arg0: i32, %arg1: i32) -> (i32, i32) {
    %c0_i32 = arith.constant 0 : i32
    %c0_i32_0 = arith.constant 0 : i32
    %c0_i32_1 = arith.constant 0 : i32
    return %c0_i32, %c0_i32_0 : i32, i32
  }
  func.func @transform_3(%arg0: i32, %arg1: i32) -> (i32, i32) {
    %c0_i32 = arith.constant 0 : i32
    %c0_i32_0 = arith.constant 0 : i32
    return %c0_i32, %arg1 : i32, i32
  }
  func.func @transform_4(%arg0: i32, %arg1: i32) -> (i32, i32) {
    %c0_i32 = arith.constant 0 : i32
    %c0_i32_0 = arith.constant 0 : i32
    return %c0_i32, %arg1 : i32, i32
  }
  func.func @transform_5(%arg0: i32, %arg1: i32) -> (i32, i32) {
    %c0_i32 = arith.constant 0 : i32
    return %arg0, %arg1 : i32, i32
  }
}

module attributes {stable_mosaic.version = 11 : i64} {
  func.func @_matmul_kernel(%arg0: i32, %arg1: i32, %arg2: i32, %arg3: memref<40x256xbf16, #tpu.memory_space<vmem>>, %arg4: memref<256x128xbf16, #tpu.memory_space<vmem>>, %arg5: memref<1x128xf32, #tpu.memory_space<vmem>>, %arg6: memref<40x128xf32, #tpu.memory_space<vmem>>, %arg7: memref<40x128xf32, #tpu.memory_space<vmem>>, %arg8: memref<40x128xf32, #tpu.memory_space<vmem>>) attributes {dimension_semantics = [#tpu.dimension_semantics<parallel>, #tpu.dimension_semantics<parallel>, #tpu.dimension_semantics<arbitrary>], iteration_bounds = array<i64: 1, 1, 1>, scalar_prefetch = 0 : i64, scratch_operands = 1 : i64, tpu.core_type = #tpu.core_type<tc>, window_params = [{transform_indices = @transform_0, window_bounds = array<i64: 40, 256>}, {transform_indices = @transform_1, window_bounds = array<i64: 256, 128>}, {transform_indices = @transform_2, window_bounds = array<i64: 1, 128>}, {transform_indices = @transform_3, window_bounds = array<i64: 40, 128>}, {transform_indices = @transform_4, window_bounds = array<i64: 40, 128>}]} {
    %c0_i32 = arith.constant 0 : i32
    %0 = arith.cmpi eq, %arg2, %c0_i32 : i32
    %1 = arith.extui %0 : i1 to i32
    %c0_i32_0 = arith.constant 0 : i32
    %2 = arith.cmpi ne, %1, %c0_i32_0 : i32
    scf.if %2 {
      %cst_10 = arith.constant 0.000000e+00 : f32
      %12 = vector.broadcast %cst_10 : f32 to vector<40x128xf32>
      %c0_11 = arith.constant 0 : index
      %c0_12 = arith.constant 0 : index
      %13 = vector.load %arg8[%c0_11, %c0_12] : memref<40x128xf32, #tpu.memory_space<vmem>>, vector<40x128xf32>
      tpu.vector_store %arg8[%c0_11, %c0_12], %12 {strides = array<i32>} : memref<40x128xf32, #tpu.memory_space<vmem>>, vector<40x128xf32>,
    } else {
    }
    %c0 = arith.constant 0 : index
    %c0_1 = arith.constant 0 : index
    %3 = vector.load %arg8[%c0, %c0_1] : memref<40x128xf32, #tpu.memory_space<vmem>>, vector<40x128xf32>
    %c0_2 = arith.constant 0 : index
    %c0_3 = arith.constant 0 : index
    %4 = vector.load %arg3[%c0_2, %c0_3] : memref<40x256xbf16, #tpu.memory_space<vmem>>, vector<40x256xbf16>
    %c0_4 = arith.constant 0 : index
    %c0_5 = arith.constant 0 : index
    %5 = vector.load %arg4[%c0_4, %c0_5] : memref<256x128xbf16, #tpu.memory_space<vmem>>, vector<256x128xbf16>
    %cst = arith.constant dense<0.000000e+00> : vector<40x128xf32>
    %6 = tpu.matmul %4, %5, %cst {dimension_numbers = #tpu.dot_dimension_numbers<[1], [0], [0], [1], [0, 0, 1, 1], [], []>} : vector<40x256xbf16>, vector<256x128xbf16>, vector<40x128xf32> -> vector<40x128xf32>
    %7 = arith.addf %3, %6 : vector<40x128xf32>
    %c0_6 = arith.constant 0 : index
    %c0_7 = arith.constant 0 : index
    %8 = vector.load %arg8[%c0_6, %c0_7] : memref<40x128xf32, #tpu.memory_space<vmem>>, vector<40x128xf32>
    tpu.vector_store %arg8[%c0_6, %c0_7], %7 {strides = array<i32>} : memref<40x128xf32, #tpu.memory_space<vmem>>, vector<40x128xf32>,
    %c0_i32_8 = arith.constant 0 : i32
    %9 = arith.cmpi eq, %arg2, %c0_i32_8 : i32
    %10 = arith.extui %9 : i1 to i32
    %c0_i32_9 = arith.constant 0 : i32
    %11 = arith.cmpi ne, %10, %c0_i32_9 : i32
    scf.if %11 {
      %c0_10 = arith.constant 0 : index
      %c0_11 = arith.constant 0 : index
      %12 = vector.load %arg8[%c0_10, %c0_11] : memref<40x128xf32, #tpu.memory_space<vmem>>, vector<40x128xf32>
      %c0_12 = arith.constant 0 : index
      %c0_13 = arith.constant 0 : index
      %13 = vector.load %arg5[%c0_12, %c0_13] : memref<1x128xf32, #tpu.memory_space<vmem>>, vector<1x128xf32>
      %14 = vector.broadcast %13 : vector<1x128xf32> to vector<40x128xf32>
      %15 = arith.addf %12, %14 : vector<40x128xf32>
      %c0_14 = arith.constant 0 : index
      %c0_15 = arith.constant 0 : index
      %16 = vector.load %arg6[%c0_14, %c0_15] : memref<40x128xf32, #tpu.memory_space<vmem>>, vector<40x128xf32>
      %17 = arith.addf %15, %16 : vector<40x128xf32>
      %c0_16 = arith.constant 0 : index
      %c0_17 = arith.constant 0 : index
      %18 = vector.load %arg7[%c0_16, %c0_17] : memref<40x128xf32, #tpu.memory_space<vmem>>, vector<40x128xf32>
      tpu.vector_store %arg7[%c0_16, %c0_17], %17 {strides = array<i32>} : memref<40x128xf32, #tpu.memory_space<vmem>>, vector<40x128xf32>,
    } else {
    }
    return
  }
  func.func @transform_0(%arg0: i32, %arg1: i32, %arg2: i32) -> (i32, i32) {
    %c0_i32 = arith.constant 0 : i32
    return %arg0, %arg2 : i32, i32
  }
  func.func @transform_1(%arg0: i32, %arg1: i32, %arg2: i32) -> (i32, i32) {
    %c0_i32 = arith.constant 0 : i32
    return %arg2, %arg1 : i32, i32
  }
  func.func @transform_2(%arg0: i32, %arg1: i32, %arg2: i32) -> (i32, i32) {
    %c0_i32 = arith.constant 0 : i32
    %c0_i32_0 = arith.constant 0 : i32
    return %c0_i32, %arg1 : i32, i32
  }
  func.func @transform_3(%arg0: i32, %arg1: i32, %arg2: i32) -> (i32, i32) {
    %c0_i32 = arith.constant 0 : i32
    return %arg0, %arg1 : i32, i32
  }
  func.func @transform_4(%arg0: i32, %arg1: i32, %arg2: i32) -> (i32, i32) {
    %c0_i32 = arith.constant 0 : i32
    return %arg0, %arg1 : i32, i32
  }
}

module attributes {stable_mosaic.version = 11 : i64} {
  func.func @_layernorm_kernel(%arg0: i32, %arg1: memref<40x128xf32, #tpu.memory_space<vmem>>, %arg2: memref<1x128xf32, #tpu.memory_space<vmem>>, %arg3: memref<1x128xf32, #tpu.memory_space<vmem>>, %arg4: memref<40x128xf32, #tpu.memory_space<vmem>>) attributes {dimension_semantics = [#tpu.dimension_semantics<parallel>], iteration_bounds = array<i64: 1>, scalar_prefetch = 0 : i64, scratch_operands = 0 : i64, tpu.core_type = #tpu.core_type<tc>, window_params = [{transform_indices = @transform_0, window_bounds = array<i64: 40, 128>}, {pipeline_mode = #tpu.pipeline_mode<synchronous>, transform_indices = @transform_1, window_bounds = array<i64: 1, 128>}, {pipeline_mode = #tpu.pipeline_mode<synchronous>, transform_indices = @transform_2, window_bounds = array<i64: 1, 128>}, {transform_indices = @transform_3, window_bounds = array<i64: 40, 128>}]} {
    %c0 = arith.constant 0 : index
    %c0_0 = arith.constant 0 : index
    %0 = vector.load %arg1[%c0, %c0_0] : memref<40x128xf32, #tpu.memory_space<vmem>>, vector<40x128xf32>
    %cst = arith.constant dense<0.000000e+00> : vector<40xf32>
    %1 = vector.multi_reduction <add>, %0, %cst [1] : vector<40x128xf32> to vector<40xf32>
    %2 = vector.shape_cast %1 : vector<40xf32> to vector<40x1xf32>
    %cst_1 = arith.constant 1.280000e+02 : f32
    %3 = vector.broadcast %cst_1 : f32 to vector<40x1xf32>
    %4 = arith.divf %2, %3 : vector<40x1xf32>
    %5 = vector.broadcast %4 : vector<40x1xf32> to vector<40x128xf32>
    %6 = arith.subf %0, %5 : vector<40x128xf32>
    %7 = arith.mulf %6, %6 : vector<40x128xf32>
    %cst_2 = arith.constant dense<0.000000e+00> : vector<40xf32>
    %8 = vector.multi_reduction <add>, %7, %cst_2 [1] : vector<40x128xf32> to vector<40xf32>
    %9 = vector.shape_cast %8 : vector<40xf32> to vector<40x1xf32>
    %cst_3 = arith.constant 1.280000e+02 : f32
    %10 = vector.broadcast %cst_3 : f32 to vector<40x1xf32>
    %11 = arith.divf %9, %10 : vector<40x1xf32>
    %12 = vector.broadcast %4 : vector<40x1xf32> to vector<40x128xf32>
    %13 = arith.subf %0, %12 : vector<40x128xf32>
    %cst_4 = arith.constant 9.99999974E-5 : f32
    %14 = vector.broadcast %cst_4 : f32 to vector<40x1xf32>
    %15 = arith.addf %11, %14 : vector<40x1xf32>
    %16 = math.rsqrt %15 : vector<40x1xf32>
    %17 = vector.broadcast %16 : vector<40x1xf32> to vector<40x128xf32>
    %18 = arith.mulf %13, %17 : vector<40x128xf32>
    %c0_5 = arith.constant 0 : index
    %c0_6 = arith.constant 0 : index
    %19 = vector.load %arg2[%c0_5, %c0_6] : memref<1x128xf32, #tpu.memory_space<vmem>>, vector<1x128xf32>
    %20 = vector.broadcast %19 : vector<1x128xf32> to vector<40x128xf32>
    %21 = arith.mulf %18, %20 : vector<40x128xf32>
    %c0_7 = arith.constant 0 : index
    %c0_8 = arith.constant 0 : index
    %22 = vector.load %arg3[%c0_7, %c0_8] : memref<1x128xf32, #tpu.memory_space<vmem>>, vector<1x128xf32>
    %23 = vector.broadcast %22 : vector<1x128xf32> to vector<40x128xf32>
    %24 = arith.addf %21, %23 : vector<40x128xf32>
    %c0_9 = arith.constant 0 : index
    %c0_10 = arith.constant 0 : index
    %25 = vector.load %arg4[%c0_9, %c0_10] : memref<40x128xf32, #tpu.memory_space<vmem>>, vector<40x128xf32>
    tpu.vector_store %arg4[%c0_9, %c0_10], %24 {strides = array<i32>} : memref<40x128xf32, #tpu.memory_space<vmem>>, vector<40x128xf32>,
    return
  }
  func.func @transform_0(%arg0: i32) -> (i32, i32) {
    %c0_i32 = arith.constant 0 : i32
    %c0_i32_0 = arith.constant 0 : i32
    return %arg0, %c0_i32 : i32, i32
  }
  func.func @transform_1(%arg0: i32) -> (i32, i32) {
    %c0_i32 = arith.constant 0 : i32
    %c0_i32_0 = arith.constant 0 : i32
    %c0_i32_1 = arith.constant 0 : i32
    return %c0_i32, %c0_i32_0 : i32, i32
  }
  func.func @transform_2(%arg0: i32) -> (i32, i32) {
    %c0_i32 = arith.constant 0 : i32
    %c0_i32_0 = arith.constant 0 : i32
    %c0_i32_1 = arith.constant 0 : i32
    return %c0_i32, %c0_i32_0 : i32, i32
  }
  func.func @transform_3(%arg0: i32) -> (i32, i32) {
    %c0_i32 = arith.constant 0 : i32
    %c0_i32_0 = arith.constant 0 : i32
    return %arg0, %c0_i32 : i32, i32
  }
}

</mosaic_0001>

<bundles_post_ra>
// kernel: hubert_forward.18
= control target key start
LH: loop header
LB: loop body
LE: loop exit
PB: predicated region body
PF: predicated region fallthrough
CT: control target
= control target key end

     0   :  { %vm34_vm0 = vcmask 523264   ;;  %s1174_s0 = inlined_call_operand.vmem [shape: f32[160,64], index: 0, kind: input, shape index: {}]   ;;  %s1175_s1 = inlined_call_operand.vmem [shape: f32[1,64], index: 1, kind: input, shape index: {}]   ;;  %s1176_s2 = inlined_call_operand.vmem [shape: f32[1,64], index: 2, kind: input, shape index: {}]   ;;  %s1177_s3 = inlined_call_operand.vmem [shape: f32[160,64], index: 3, kind: output, shape index: {}]  }
   0x1   :  { %v659_v0 = vld [vmem:[%s1174_s0] sm:$0xff]  ;;  %v664_v1 = vld [vmem:[%s1174_s0 + $0x10] sm:$0xff]  ;;  %v669_v2 = vld [vmem:[%s1174_s0 + $0x8] sm:$0xff] }
   0x2   :  { %v35_v3 = vsel %vm34_vm0, %v659_v0, 0.0  ;;  %v41_v4 = vsel %vm34_vm0, %v664_v1, 0.0  ;;  %v678_v5 = vld [vmem:[%s1174_s0 + $0x18] sm:$0xff]  ;;  %v38_v6 = vsel %vm34_vm0, %v669_v2, 0.0  ;;  %v687_v8 = vld [vmem:[%s1174_s0 + $0x20] sm:$0xff]  ;;  %v692_v9 = vld [vmem:[%s1174_s0 + $0x28] sm:$0xff] }
   0x3   :  { %36 = vadd.xlane.f32.xlu0 %v35_v3  ;;  %42 = vadd.xlane.f32.xlu1 %v41_v4  ;;  %v44_v7 = vsel %vm34_vm0, %v678_v5, 0.0  ;;  %v47_v10 = vsel %vm34_vm0, %v687_v8, 0.0  ;;  %v50_v11 = vsel %vm34_vm0, %v692_v9, 0.0  ;;  %v701_v12 = vld [vmem:[%s1174_s0 + $0x30] sm:$0xff]  ;;  %v706_v13 = vld [vmem:[%s1174_s0 + $0x38] sm:$0xff]  ;;  %v715_v16 = vld [vmem:[%s1174_s0 + $0x40] sm:$0xff] }
   0x4   :  { %v53_v14 = vsel %vm34_vm0, %v701_v12, 0.0  ;;  %v56_v15 = vsel %vm34_vm0, %v706_v13, 0.0  ;;  %v720_v17 = vld [vmem:[%s1174_s0 + $0x48] sm:$0xff]  ;;  %v59_v18 = vsel %vm34_vm0, %v715_v16, 0.0  ;;  %v729_v20 = vld [vmem:[%s1174_s0 + $0x50] sm:$0xff]  ;;  %v734_v21 = vld [vmem:[%s1174_s0 + $0x58] sm:$0xff] }
   0x5   :  { %v62_v19 = vsel %vm34_vm0, %v720_v17, 0.0  ;;  %v65_v22 = vsel %vm34_vm0, %v729_v20, 0.0  ;;  %v68_v23 = vsel %vm34_vm0, %v734_v21, 0.0  ;;  %v743_v24 = vld [vmem:[%s1174_s0 + $0x60] sm:$0xff]  ;;  %v748_v25 = vld [vmem:[%s1174_s0 + $0x68] sm:$0xff]  ;;  %v757_v28 = vld [vmem:[%s1174_s0 + $0x70] sm:$0xff] }
   0x6   :  { %v71_v26 = vsel %vm34_vm0, %v743_v24, 0.0  ;;  %v74_v27 = vsel %vm34_vm0, %v748_v25, 0.0  ;;  %v762_v29 = vld [vmem:[%s1174_s0 + $0x78] sm:$0xff]  ;;  %v77_v30 = vsel %vm34_vm0, %v757_v28, 0.0  ;;  %v771_v32 = vld [vmem:[%s1174_s0 + $0x80] sm:$0xff]  ;;  %v776_v33 = vld [vmem:[%s1174_s0 + $0x88] sm:$0xff] }
   0x7   :  { %39 = vadd.xlane.f32.xlu0 %v38_v6  ;;  %45 = vadd.xlane.f32.xlu1 %v44_v7  ;;  %v80_v31 = vsel %vm34_vm0, %v762_v29, 0.0  ;;  %v83_v34 = vsel %vm34_vm0, %v771_v32, 0.0  ;;  %v86_v35 = vsel %vm34_vm0, %v776_v33, 0.0  ;;  %v785_v36 = vld [vmem:[%s1174_s0 + $0x90] sm:$0xff]  ;;  %v790_v37 = vld [vmem:[%s1174_s0 + $0x98] sm:$0xff] }
   0x8   :  { %v89_v38 = vsel %vm34_vm0, %v785_v36, 0.0  ;;  %v92_v39 = vsel %vm34_vm0, %v790_v37, 0.0 }
   0xb   :  { %48 = vadd.xlane.f32.xlu0 %v47_v10  ;;  %51 = vadd.xlane.f32.xlu1 %v50_v11 }
   0xf   :  { %54 = vadd.xlane.f32.xlu0 %v53_v14  ;;  %57 = vadd.xlane.f32.xlu1 %v56_v15 }
  0x13   :  { %60 = vadd.xlane.f32.xlu0 %v59_v18  ;;  %63 = vadd.xlane.f32.xlu1 %v62_v19 }
  0x17   :  { %66 = vadd.xlane.f32.xlu0 %v65_v22  ;;  %69 = vadd.xlane.f32.xlu1 %v68_v23 }
  0x1b   :  { %72 = vadd.xlane.f32.xlu0 %v71_v26  ;;  %75 = vadd.xlane.f32.xlu1 %v74_v27 }
  0x1f   :  { %78 = vadd.xlane.f32.xlu0 %v77_v30  ;;  %81 = vadd.xlane.f32.xlu1 %v80_v31 }
  0x23   :  { %84 = vadd.xlane.f32.xlu0 %v83_v34  ;;  %87 = vadd.xlane.f32.xlu1 %v86_v35 }
  0x27   :  { %90 = vadd.xlane.f32.xlu0 %v89_v38  ;;  %93 = vadd.xlane.f32.xlu1 %v92_v39 }
  0x8c   :  { %v37_v40 = vpop.xlane.xlu0 %36  ;;  %v43_v41 = vpop.xlane.xlu1 %42 }
  0x8d   :  { %v96_v42 = vmul.f32 0.015625, %v37_v40  ;;  %v98_v43 = vmul.f32 0.015625, %v43_v41 }
  0x8f   :  { %v797_v44 = vsub.f32 %v659_v0, %v96_v42  ;;  %v800_v45 = vsub.f32 %v664_v1, %v98_v43 }
  0x90   :  { %v40_v46 = vpop.xlane.xlu0 %39  ;;  %v46_v47 = vpop.xlane.xlu1 %45 }
  0x91   :  { %v97_v48 = vmul.f32 0.015625, %v40_v46  ;;  %v99_v49 = vmul.f32 0.015625, %v46_v47  ;;  %v136_v50 = vmul.f32 %v797_v44, %v797_v44  ;;  %v138_v51 = vmul.f32 %v800_v45, %v800_v45 }
  0x93   :  { %v807_v52 = vsub.f32 %v669_v2, %v97_v48  ;;  %v810_v53 = vsub.f32 %v678_v5, %v99_v49  ;;  %v156_v54 = vsel %vm34_vm0, %v136_v50, 0.0  ;;  %v162_v57 = vsel %vm34_vm0, %v138_v51, 0.0 }
  0x94   :  { %157 = vadd.xlane.f32.xlu0 %v156_v54  ;;  %v49_v55 = vpop.xlane.xlu0 %48  ;;  %v52_v56 = vpop.xlane.xlu1 %51 }
  0x95   :  { %v100_v58 = vmul.f32 0.015625, %v49_v55  ;;  %v101_v59 = vmul.f32 0.015625, %v52_v56  ;;  %v137_v60 = vmul.f32 %v807_v52, %v807_v52  ;;  %v139_v61 = vmul.f32 %v810_v53, %v810_v53 }
  0x97   :  { %v819_v62 = vsub.f32 %v687_v8, %v100_v58  ;;  %v822_v63 = vsub.f32 %v692_v9, %v101_v59  ;;  %v159_v0 = vsel %vm34_vm0, %v137_v60, 0.0  ;;  %v165_v3 = vsel %vm34_vm0, %v139_v61, 0.0 }
  0x98   :  { %163 = vadd.xlane.f32.xlu0 %v162_v57  ;;  %160 = vadd.xlane.f32.xlu1 %v159_v0  ;;  %v55_v1 = vpop.xlane.xlu0 %54  ;;  %v58_v2 = vpop.xlane.xlu1 %57 }
  0x99   :  { %v102_v4 = vmul.f32 0.015625, %v55_v1  ;;  %v103_v5 = vmul.f32 0.015625, %v58_v2  ;;  %v140_v6 = vmul.f32 %v819_v62, %v819_v62  ;;  %v141_v7 = vmul.f32 %v822_v63, %v822_v63 }
  0x9b   :  { %v831_v8 = vsub.f32 %v701_v12, %v102_v4  ;;  %v834_v9 = vsub.f32 %v706_v13, %v103_v5  ;;  %v168_v10 = vsel %vm34_vm0, %v140_v6, 0.0  ;;  %v171_v15 = vsel %vm34_vm0, %v141_v7, 0.0 }
  0x9c   :  { %166 = vadd.xlane.f32.xlu1 %v165_v3  ;;  %169 = vadd.xlane.f32.xlu0 %v168_v10  ;;  %v61_v11 = vpop.xlane.xlu0 %60  ;;  %v64_v14 = vpop.xlane.xlu1 %63 }
  0x9d   :  { %v104_v18 = vmul.f32 0.015625, %v61_v11  ;;  %v105_v19 = vmul.f32 0.015625, %v64_v14  ;;  %v142_v22 = vmul.f32 %v831_v8, %v831_v8  ;;  %v143_v12 = vmul.f32 %v834_v9, %v834_v9 }
  0x9f   :  { %v843_v23 = vsub.f32 %v715_v16, %v104_v18  ;;  %v846_v13 = vsub.f32 %v720_v17, %v105_v19  ;;  %v174_v26 = vsel %vm34_vm0, %v142_v22, 0.0  ;;  %v177_v31 = vsel %vm34_vm0, %v143_v12, 0.0 }
  0xa0   :  { %172 = vadd.xlane.f32.xlu1 %v171_v15  ;;  %175 = vadd.xlane.f32.xlu0 %v174_v26  ;;  %v67_v27 = vpop.xlane.xlu0 %66  ;;  %v70_v30 = vpop.xlane.xlu1 %69 }
  0xa1   :  { %v106_v34 = vmul.f32 0.015625, %v67_v27  ;;  %v107_v35 = vmul.f32 0.015625, %v70_v30  ;;  %v144_v38 = vmul.f32 %v843_v23, %v843_v23  ;;  %v145_v16 = vmul.f32 %v846_v13, %v846_v13 }
  0xa3   :  { %v855_v39 = vsub.f32 %v729_v20, %v106_v34  ;;  %v858_v17 = vsub.f32 %v734_v21, %v107_v35  ;;  %v180_v40 = vsel %vm34_vm0, %v144_v38, 0.0  ;;  %v183_v43 = vsel %vm34_vm0, %v145_v16, 0.0 }
  0xa4   :  { %178 = vadd.xlane.f32.xlu1 %v177_v31  ;;  %181 = vadd.xlane.f32.xlu0 %v180_v40  ;;  %v73_v41 = vpop.xlane.xlu0 %72  ;;  %v76_v42 = vpop.xlane.xlu1 %75 }
  0xa5   :  { %v108_v46 = vmul.f32 0.015625, %v73_v41  ;;  %v109_v47 = vmul.f32 0.015625, %v76_v42  ;;  %v146_v48 = vmul.f32 %v855_v39, %v855_v39  ;;  %v147_v20 = vmul.f32 %v858_v17, %v858_v17 }
  0xa7   :  { %v867_v49 = vsub.f32 %v743_v24, %v108_v46  ;;  %v870_v21 = vsub.f32 %v748_v25, %v109_v47  ;;  %v186_v50 = vsel %vm34_vm0, %v146_v48, 0.0  ;;  %v189_v55 = vsel %vm34_vm0, %v147_v20, 0.0 }
  0xa8   :  { %184 = vadd.xlane.f32.xlu1 %v183_v43  ;;  %187 = vadd.xlane.f32.xlu0 %v186_v50  ;;  %v79_v51 = vpop.xlane.xlu0 %78  ;;  %v82_v54 = vpop.xlane.xlu1 %81 }
  0xa9   :  { %v110_v56 = vmul.f32 0.015625, %v79_v51  ;;  %v111_v57 = vmul.f32 0.015625, %v82_v54  ;;  %v148_v58 = vmul.f32 %v867_v49, %v867_v49  ;;  %v149_v24 = vmul.f32 %v870_v21, %v870_v21 }
  0xab   :  { %v879_v59 = vsub.f32 %v757_v28, %v110_v56  ;;  %v882_v25 = vsub.f32 %v762_v29, %v111_v57  ;;  %v192_v60 = vsel %vm34_vm0, %v148_v58, 0.0  ;;  %v195_v1 = vsel %vm34_vm0, %v149_v24, 0.0 }
  0xac   :  { %190 = vadd.xlane.f32.xlu1 %v189_v55  ;;  %193 = vadd.xlane.f32.xlu0 %v192_v60  ;;  %v85_v61 = vpop.xlane.xlu0 %84  ;;  %v88_v0 = vpop.xlane.xlu1 %87 }
  0xad   :  { %v112_v2 = vmul.f32 0.015625, %v85_v61  ;;  %v113_v3 = vmul.f32 0.015625, %v88_v0  ;;  %v150_v4 = vmul.f32 %v879_v59, %v879_v59  ;;  %v151_v28 = vmul.f32 %v882_v25, %v882_v25 }
  0xaf   :  { %v891_v5 = vsub.f32 %v771_v32, %v112_v2  ;;  %v894_v29 = vsub.f32 %v776_v33, %v113_v3  ;;  %v198_v6 = vsel %vm34_vm0, %v150_v4, 0.0  ;;  %v201_v11 = vsel %vm34_vm0, %v151_v28, 0.0  ;;  %v919_v2 = vld [vmem:[%s1175_s1] ss:$0 sm:$0xff] }
  0xb0   :  { %196 = vadd.xlane.f32.xlu1 %v195_v1  ;;  %199 = vadd.xlane.f32.xlu0 %v198_v6  ;;  %v91_v7 = vpop.xlane.xlu0 %90  ;;  %v94_v10 = vpop.xlane.xlu1 %93  ;;  %v925_v6 = vld [vmem:[%s1176_s2] ss:$0 sm:$0xff] }
  0xb1   :  { %v114_v14 = vmul.f32 0.015625, %v91_v7  ;;  %v115_v15 = vmul.f32 0.015625, %v94_v10  ;;  %v152_v18 = vmul.f32 %v891_v5, %v891_v5  ;;  %v153_v32 = vmul.f32 %v894_v29, %v894_v29 }
  0xb3   :  { %v903_v19 = vsub.f32 %v785_v36, %v114_v14  ;;  %v906_v33 = vsub.f32 %v790_v37, %v115_v15  ;;  %v204_v22 = vsel %vm34_vm0, %v152_v18, 0.0  ;;  %v207_v12 = vsel %vm34_vm0, %v153_v32, 0.0 }
  0xb4   :  { %202 = vadd.xlane.f32.xlu1 %v201_v11  ;;  %205 = vadd.xlane.f32.xlu0 %v204_v22 }
  0xb5   :  { %v154_v26 = vmul.f32 %v903_v19, %v903_v19  ;;  %v155_v27 = vmul.f32 %v906_v33, %v906_v33 }
  0xb7   :  { %v210_v30 = vsel %vm34_vm0, %v154_v26, 0.0  ;;  %v213_v36 = vsel %vm34_vm0, %v155_v27, 0.0 }
  0xb8   :  { %208 = vadd.xlane.f32.xlu1 %v207_v12  ;;  %211 = vadd.xlane.f32.xlu0 %v210_v30 }
  0xbc   :  { %214 = vadd.xlane.f32.xlu1 %v213_v36 }
 0x11d   :  { %v158_v37 = vpop.xlane.xlu0 %157 }
 0x11e   :  { %v216_v31 = vmul.f32 0.015625, %v158_v37 }
 0x120   :  { %v236_v34 = vadd.f32 1e-05, %v216_v31 }
 0x121   :  { %v161_v35 = vpop.xlane.xlu1 %160  ;;  %v164_v38 = vpop.xlane.xlu0 %163 }
 0x122   :  { %556 = vrsqrt.f32 %v236_v34  ;;  %v217_v16 = vmul.f32 0.015625, %v161_v35  ;;  %v218_v40 = vmul.f32 0.015625, %v164_v38 }
 0x124   :  { %v237_v41 = vadd.f32 1e-05, %v217_v16  ;;  %v238_v42 = vadd.f32 1e-05, %v218_v40 }
 0x125   :  { %v167_v43 = vpop.xlane.xlu1 %166  ;;  %v170_v46 = vpop.xlane.xlu0 %169 }
 0x126   :  { %558 = vrsqrt.f32 %v237_v41  ;;  %v219_v47 = vmul.f32 0.015625, %v167_v43  ;;  %v220_v48 = vmul.f32 0.015625, %v170_v46 }
 0x127   :  { %560 = vrsqrt.f32 %v238_v42 }
 0x128   :  { %v239_v20 = vadd.f32 1e-05, %v219_v47  ;;  %v240_v50 = vadd.f32 1e-05, %v220_v48 }
 0x129   :  { %v173_v51 = vpop.xlane.xlu1 %172  ;;  %v176_v54 = vpop.xlane.xlu0 %175 }
 0x12a   :  { %562 = vrsqrt.f32 %v239_v20  ;;  %v221_v55 = vmul.f32 0.015625, %v173_v51  ;;  %v222_v56 = vmul.f32 0.015625, %v176_v54 }
 0x12b   :  { %564 = vrsqrt.f32 %v240_v50 }
 0x12c   :  { %v241_v57 = vadd.f32 1e-05, %v221_v55  ;;  %v242_v58 = vadd.f32 1e-05, %v222_v56 }
 0x12d   :  { %v179_v24 = vpop.xlane.xlu1 %178  ;;  %v182_v60 = vpop.xlane.xlu0 %181 }
 0x12e   :  { %566 = vrsqrt.f32 %v241_v57  ;;  %v223_v61 = vmul.f32 0.015625, %v179_v24  ;;  %v224_v0 = vmul.f32 0.015625, %v182_v60 }
 0x12f   :  { %v557_v1 = vpop.eup %556  ;;  %568 = vrsqrt.f32 %v242_v58 }
 0x130   :  { %v276_v3 = vmul.f32 %v557_v1, %v797_v44  ;;  %v243_v4 = vadd.f32 1e-05, %v223_v61  ;;  %v244_v28 = vadd.f32 1e-05, %v224_v0 }
 0x131   :  { %v185_v7 = vpop.xlane.xlu1 %184  ;;  %v188_v10 = vpop.xlane.xlu0 %187 }
 0x132   :  { %v303_v11 = vmul.f32 %v919_v2, %v276_v3  ;;  %570 = vrsqrt.f32 %v243_v4  ;;  %v225_v14 = vmul.f32 0.015625, %v185_v7  ;;  %v226_v15 = vmul.f32 0.015625, %v188_v10 }
 0x133   :  { %v559_v18 = vpop.eup %558  ;;  %572 = vrsqrt.f32 %v244_v28 }
 0x134   :  { %v561_v32 = vpop.eup %560  ;;  %v929_v22 = vadd.f32 %v925_v6, %v303_v11  ;;  %v277_v44 = vmul.f32 %v559_v18, %v807_v52  ;;  %v245_v12 = vadd.f32 1e-05, %v225_v14  ;;  %v246_v26 = vadd.f32 1e-05, %v226_v15 }
 0x135   :  { %v278_v27 = vmul.f32 %v561_v32, %v800_v45  ;;  %v191_v30 = vpop.xlane.xlu1 %190  ;;  %v194_v36 = vpop.xlane.xlu0 %193 }
 0x136   :  { %v370_v37 = vmul.f32 0.044715, %v929_v22  ;;  %v304_v31 = vmul.f32 %v919_v2, %v277_v44  ;;  %574 = vrsqrt.f32 %v245_v12  ;;  %v227_v38 = vmul.f32 0.015625, %v191_v30 }
 0x137   :  { %v563_v34 = vpop.eup %562  ;;  %v305_v35 = vmul.f32 %v919_v2, %v278_v27  ;;  %576 = vrsqrt.f32 %v246_v26  ;;  %v228_v16 = vmul.f32 0.015625, %v194_v36 }
 0x138   :  { %v565_v40 = vpop.eup %564  ;;  %v390_v52 = vmul.f32 %v370_v37, %v929_v22  ;;  %v938_v41 = vadd.f32 %v925_v6, %v304_v31  ;;  %v279_v45 = vmul.f32 %v563_v34, %v810_v53  ;;  %v247_v46 = vadd.f32 1e-05, %v227_v38 }
 0x139   :  { %v942_v42 = vadd.f32 %v925_v6, %v305_v35  ;;  %v280_v43 = vmul.f32 %v565_v40, %v819_v62  ;;  %v248_v55 = vadd.f32 1e-05, %v228_v16  ;;  %v350_v38 = vmul.f32 0.5, %v929_v22 }
 0x13a   :  { %v410_v47 = vmul.f32 %v390_v52, %v929_v22  ;;  %v371_v48 = vmul.f32 0.044715, %v938_v41  ;;  %v306_v20 = vmul.f32 %v919_v2, %v279_v45  ;;  %578 = vrsqrt.f32 %v247_v46 }
 0x13b   :  { %v567_v50 = vpop.eup %566  ;;  %v372_v51 = vmul.f32 0.044715, %v942_v42  ;;  %v307_v54 = vmul.f32 %v919_v2, %v280_v43  ;;  %580 = vrsqrt.f32 %v248_v55 }
 0x13c   :  { %v569_v53 = vpop.eup %568  ;;  %v430_v56 = vadd.f32 %v410_v47, %v929_v22  ;;  %v391_v57 = vmul.f32 %v371_v48, %v938_v41  ;;  %v953_v62 = vadd.f32 %v925_v6, %v306_v20  ;;  %v281_v58 = vmul.f32 %v567_v50, %v822_v63 }
 0x13d   :  { %v392_v24 = vmul.f32 %v372_v51, %v942_v42  ;;  %v958_v60 = vadd.f32 %v925_v6, %v307_v54  ;;  %v282_v61 = vmul.f32 %v569_v53, %v831_v8 }
 0x13e   :  { %v450_v0 = vmul.f32 0.7978846, %v430_v56  ;;  %v411_v1 = vmul.f32 %v391_v57, %v938_v41  ;;  %v373_v3 = vmul.f32 0.044715, %v953_v62  ;;  %v308_v10 = vmul.f32 %v919_v2, %v281_v58  ;;  %v1001_v56 = vpop.xlane.xlu1 %196 }
 0x13f   :  { %v571_v4 = vpop.eup %570  ;;  %v412_v28 = vmul.f32 %v392_v24, %v942_v42  ;;  %v374_v7 = vmul.f32 0.044715, %v958_v60  ;;  %v309_v8 = vmul.f32 %v919_v2, %v282_v61 }
 0x140   :  { %v573_v63 = vpop.eup %572  ;;  %582 = vtanh.f32 %v450_v0  ;;  %v431_v11 = vadd.f32 %v411_v1, %v938_v41  ;;  %v393_v14 = vmul.f32 %v373_v3, %v953_v62  ;;  %v972_v32 = vadd.f32 %v925_v6, %v308_v10 }
 0x141   :  { %v432_v15 = vadd.f32 %v412_v28, %v942_v42  ;;  %v394_v18 = vmul.f32 %v374_v7, %v958_v60  ;;  %v283_v44 = vmul.f32 %v571_v4, %v834_v9  ;;  %v977_v27 = vadd.f32 %v925_v6, %v309_v8 }
 0x142   :  { %v451_v12 = vmul.f32 0.7978846, %v431_v11  ;;  %v413_v26 = vmul.f32 %v393_v14, %v953_v62  ;;  %v284_v30 = vmul.f32 %v573_v63, %v843_v23  ;;  %v375_v34 = vmul.f32 0.044715, %v972_v32 }
 0x143   :  { %v575_v36 = vpop.eup %574  ;;  %v452_v37 = vmul.f32 0.7978846, %v432_v15  ;;  %v414_v31 = vmul.f32 %v394_v18, %v958_v60  ;;  %v376_v16 = vmul.f32 0.044715, %v977_v27  ;;  %v310_v23 = vmul.f32 %v919_v2, %v283_v44  ;;  %v200_v18 = vpop.xlane.xlu0 %199 }
 0x144   :  { %v577_v35 = vpop.eup %576  ;;  %584 = vtanh.f32 %v451_v12  ;;  %v433_v9 = vadd.f32 %v413_v26, %v953_v62  ;;  %v395_v52 = vmul.f32 %v375_v34, %v972_v32  ;;  %v311_v46 = vmul.f32 %v919_v2, %v284_v30  ;;  %v203_v12 = vpop.xlane.xlu1 %202 }
 0x145   :  { %586 = vtanh.f32 %v452_v37  ;;  %v434_v40 = vadd.f32 %v414_v31, %v958_v60  ;;  %v396_v43 = vmul.f32 %v376_v16, %v977_v27  ;;  %v285_v47 = vmul.f32 %v575_v36, %v846_v13 }
 0x146   :  { %v453_v45 = vmul.f32 0.7978846, %v433_v9  ;;  %v415_v48 = vmul.f32 %v395_v52, %v972_v32  ;;  %v993_v20 = vadd.f32 %v925_v6, %v310_v23  ;;  %v286_v50 = vmul.f32 %v577_v35, %v855_v39 }
 0x147   :  { %v454_v22 = vmul.f32 0.7978846, %v434_v40  ;;  %v579_v51 = vpop.eup %578  ;;  %v416_v54 = vmul.f32 %v396_v43, %v977_v27  ;;  %v998_v55 = vadd.f32 %v925_v6, %v311_v46  ;;  %v312_v53 = vmul.f32 %v919_v2, %v285_v47 }
 0x148   :  { %588 = vtanh.f32 %v453_v45  ;;  %v351_v13 = vmul.f32 0.5, %v938_v41  ;;  %v435_v57 = vadd.f32 %v415_v48, %v972_v32  ;;  %v377_v58 = vmul.f32 0.044715, %v993_v20  ;;  %v581_v28 = vpop.eup %580  ;;  %v206_v48 = vpop.xlane.xlu0 %205 }
 0x149   :  { %590 = vtanh.f32 %v454_v22  ;;  %v352_v39 = vmul.f32 0.5, %v942_v42  ;;  %v436_v24 = vadd.f32 %v416_v54, %v977_v27  ;;  %v378_v61 = vmul.f32 0.044715, %v998_v55 }
 0x14a   :  { %v1010_v0 = vadd.f32 %v925_v6, %v312_v53  ;;  %v455_v1 = vmul.f32 0.7978846, %v435_v57  ;;  %v397_v3 = vmul.f32 %v377_v58, %v993_v20  ;;  %v313_v4 = vmul.f32 %v919_v2, %v286_v50  ;;  %v209_v53 = vpop.xlane.xlu1 %208 }
 0x14b   :  { %v287_v41 = vmul.f32 %v579_v51, %v858_v17  ;;  %v353_v7 = vmul.f32 0.5, %v953_v62  ;;  %v456_v10 = vmul.f32 0.7978846, %v436_v24  ;;  %v398_v42 = vmul.f32 %v378_v61, %v998_v55 }
 0x14c   :  { %v379_v63 = vmul.f32 0.044715, %v1010_v0  ;;  %592 = vtanh.f32 %v455_v1  ;;  %v417_v14 = vmul.f32 %v397_v3, %v993_v20  ;;  %v1020_v8 = vadd.f32 %v925_v6, %v313_v4 }
 0x14d   :  { %v583_v11 = vpop.eup %582  ;;  %v314_v15 = vmul.f32 %v919_v2, %v287_v41  ;;  %594 = vtanh.f32 %v456_v10  ;;  %v418_v17 = vmul.f32 %v398_v42, %v998_v55  ;;  %v354_v26 = vmul.f32 0.5, %v958_v60 }
 0x14e   :  { %v490_v44 = vadd.f32 1.0, %v583_v11  ;;  %v399_v62 = vmul.f32 %v379_v63, %v1010_v0  ;;  %v437_v30 = vadd.f32 %v417_v14, %v993_v20  ;;  %v380_v36 = vmul.f32 0.044715, %v1020_v8 }
 0x14f   :  { %v1029_v37 = vadd.f32 %v925_v6, %v314_v15  ;;  %v438_v34 = vadd.f32 %v418_v17, %v998_v55  ;;  %v288_v9 = vmul.f32 %v581_v28, %v867_v49  ;;  %v355_v40 = vmul.f32 0.5, %v972_v32  ;;  %v212_v17 = vpop.xlane.xlu0 %211 }
 0x150   :  { %v510_v31 = vmul.f32 %v490_v44, %v350_v38  ;;  %v419_v35 = vmul.f32 %v399_v62, %v1010_v0  ;;  %v457_v52 = vmul.f32 0.7978846, %v437_v30  ;;  %v400_v60 = vmul.f32 %v380_v36, %v1020_v8 }
 0x151   :  { %v585_v16 = vpop.eup %584  ;;  %v381_v23 = vmul.f32 0.044715, %v1029_v37  ;;  %v458_v43 = vmul.f32 0.7978846, %v438_v34  ;;  %v315_v49 = vmul.f32 %v919_v2, %v288_v9  ;;  %v229_v1 = vmul.f32 0.015625, %v1001_v56 }
 0x152   :  { %v587_v45 = vpop.eup %586  ;;  %530 = vst.msk [vmem:[%s1177_s3] sm:$0xff] %vm34_vm0, %v510_v31  ;;  %v491_v38 = vadd.f32 1.0, %v585_v16  ;;  %v439_v46 = vadd.f32 %v419_v35, %v1010_v0  ;;  %596 = vtanh.f32 %v457_v52  ;;  %v420_v32 = vmul.f32 %v400_v60, %v1020_v8  ;;  %v215_v31 = vpop.xlane.xlu1 %214 }
 0x153   :  { %v492_v47 = vadd.f32 1.0, %v587_v45  ;;  %v401_v22 = vmul.f32 %v381_v23, %v1029_v37  ;;  %598 = vtanh.f32 %v458_v43  ;;  %v1046_v54 = vadd.f32 %v925_v6, %v315_v49 }
 0x154   :  { %v511_v50 = vmul.f32 %v491_v38, %v351_v13  ;;  %v459_v51 = vmul.f32 0.7978846, %v439_v46  ;;  %v440_v24 = vadd.f32 %v420_v32, %v1020_v8  ;;  %v356_v4 = vmul.f32 0.5, %v977_v27 }
 0x155   :  { %v589_v57 = vpop.eup %588  ;;  %v512_v58 = vmul.f32 %v492_v47, %v352_v39  ;;  %v421_v61 = vmul.f32 %v401_v22, %v1029_v37  ;;  %v382_v41 = vmul.f32 0.044715, %v1046_v54  ;;  %v249_v10 = vadd.f32 1e-05, %v229_v1 }
 0x156   :  { %v591_v3 = vpop.eup %590  ;;  %531 = vst.msk [vmem:[%s1177_s3 + $0x8] sm:$0xff] %vm34_vm0, %v511_v50  ;;  %v493_v13 = vadd.f32 1.0, %v589_v57  ;;  %600 = vtanh.f32 %v459_v51  ;;  %v460_v28 = vmul.f32 0.7978846, %v440_v24  ;;  %v230_v11 = vmul.f32 0.015625, %v200_v18 }
 0x157   :  { %532 = vst.msk [vmem:[%s1177_s3 + $0x10] sm:$0xff] %vm34_vm0, %v512_v58  ;;  %v494_v39 = vadd.f32 1.0, %v591_v3  ;;  %v441_v56 = vadd.f32 %v421_v61, %v1029_v37  ;;  %v402_v63 = vmul.f32 %v382_v41, %v1046_v54  ;;  %v231_v14 = vmul.f32 0.015625, %v203_v12 }
 0x158   :  { %v513_v42 = vmul.f32 %v493_v13, %v353_v7  ;;  %602 = vtanh.f32 %v460_v28  ;;  %v232_v44 = vmul.f32 0.015625, %v206_v48  ;;  %v250_v36 = vadd.f32 1e-05, %v230_v11 }
 0x159   :  { %v514_v15 = vmul.f32 %v494_v39, %v354_v26  ;;  %v461_v27 = vmul.f32 0.7978846, %v441_v56  ;;  %v593_v62 = vpop.eup %592  ;;  %v422_v30 = vmul.f32 %v402_v63, %v1046_v54  ;;  %604 = vrsqrt.f32 %v249_v10 }
 0x15a   :  { %533 = vst.msk [vmem:[%s1177_s3 + $0x18] sm:$0xff] %vm34_vm0, %v513_v42  ;;  %v251_v7 = vadd.f32 1e-05, %v231_v14  ;;  %v595_v34 = vpop.eup %594  ;;  %v495_v18 = vadd.f32 1.0, %v593_v62  ;;  %v252_v12 = vadd.f32 1e-05, %v232_v44 }
 0x15b   :  { %534 = vst.msk [vmem:[%s1177_s3 + $0x20] sm:$0xff] %vm34_vm0, %v514_v15  ;;  %606 = vtanh.f32 %v461_v27  ;;  %v233_v26 = vmul.f32 0.015625, %v209_v53  ;;  %v496_v35 = vadd.f32 1.0, %v595_v34  ;;  %v442_v9 = vadd.f32 %v422_v30, %v1046_v54 }
 0x15c   :  { %608 = vrsqrt.f32 %v250_v36  ;;  %v234_v16 = vmul.f32 0.015625, %v212_v17  ;;  %v515_v52 = vmul.f32 %v495_v18, %v355_v40  ;;  %v235_v23 = vmul.f32 0.015625, %v215_v31 }
 0x15d   :  { %610 = vrsqrt.f32 %v251_v7  ;;  %v253_v60 = vadd.f32 1e-05, %v233_v26  ;;  %v516_v45 = vmul.f32 %v496_v35, %v356_v4  ;;  %v462_v38 = vmul.f32 0.7978846, %v442_v9 }
 0x15e   :  { %612 = vrsqrt.f32 %v252_v12  ;;  %v254_v43 = vadd.f32 1e-05, %v234_v16  ;;  %535 = vst.msk [vmem:[%s1177_s3 + $0x28] sm:$0xff] %vm34_vm0, %v515_v52  ;;  %v255_v46 = vadd.f32 1e-05, %v235_v23  ;;  %v357_v47 = vmul.f32 0.5, %v993_v20 }
 0x15f   :  { %614 = vrsqrt.f32 %v253_v60  ;;  %v597_v49 = vpop.eup %596  ;;  %536 = vst.msk [vmem:[%s1177_s3 + $0x30] sm:$0xff] %vm34_vm0, %v516_v45  ;;  %v358_v22 = vmul.f32 0.5, %v998_v55  ;;  %v359_v57 = vmul.f32 0.5, %v1010_v0  ;;  %v360_v61 = vmul.f32 0.5, %v1020_v8 }
 0x160   :  { %616 = vtanh.f32 %v462_v38  ;;  %v599_v40 = vpop.eup %598  ;;  %v497_v32 = vadd.f32 1.0, %v597_v49  ;;  %v361_v41 = vmul.f32 0.5, %v1029_v37 }
 0x161   :  { %618 = vrsqrt.f32 %v254_v43  ;;  %v498_v48 = vadd.f32 1.0, %v599_v40 }
 0x162   :  { %620 = vrsqrt.f32 %v255_v46  ;;  %v517_v51 = vmul.f32 %v497_v32, %v357_v47 }
 0x163   :  { %v601_v50 = vpop.eup %600  ;;  %v518_v53 = vmul.f32 %v498_v48, %v358_v22 }
 0x164   :  { %v499_v58 = vadd.f32 1.0, %v601_v50  ;;  %537 = vst.msk [vmem:[%s1177_s3 + $0x38] sm:$0xff] %vm34_vm0, %v517_v51 }
 0x165   :  { %v603_v24 = vpop.eup %602  ;;  %538 = vst.msk [vmem:[%s1177_s3 + $0x40] sm:$0xff] %vm34_vm0, %v518_v53 }
 0x166   :  { %v519_v20 = vmul.f32 %v499_v58, %v359_v57  ;;  %v605_v55 = vpop.eup %604  ;;  %v500_v1 = vadd.f32 1.0, %v603_v24 }
 0x167   :  { %v289_v0 = vmul.f32 %v605_v55, %v870_v21 }
 0x168   :  { %v607_v3 = vpop.eup %606  ;;  %539 = vst.msk [vmem:[%s1177_s3 + $0x48] sm:$0xff] %vm34_vm0, %v519_v20  ;;  %v520_v4 = vmul.f32 %v500_v1, %v360_v61 }
 0x169   :  { %v609_v13 = vpop.eup %608  ;;  %v501_v39 = vadd.f32 1.0, %v607_v3  ;;  %v316_v56 = vmul.f32 %v919_v2, %v289_v0 }
 0x16a   :  { %v611_v28 = vpop.eup %610  ;;  %v290_v10 = vmul.f32 %v609_v13, %v879_v59  ;;  %540 = vst.msk [vmem:[%s1177_s3 + $0x50] sm:$0xff] %vm34_vm0, %v520_v4 }
 0x16b   :  { %v613_v8 = vpop.eup %612  ;;  %v521_v42 = vmul.f32 %v501_v39, %v361_v41  ;;  %v291_v63 = vmul.f32 %v611_v28, %v882_v25  ;;  %v1107_v11 = vadd.f32 %v925_v6, %v316_v56  ;;  %v362_v25 = vmul.f32 0.5, %v1046_v54 }
 0x16c   :  { %v615_v21 = vpop.eup %614  ;;  %v317_v37 = vmul.f32 %v919_v2, %v290_v10  ;;  %v292_v14 = vmul.f32 %v613_v8, %v891_v5 }
 0x16d   :  { %v617_v15 = vpop.eup %616  ;;  %541 = vst.msk [vmem:[%s1177_s3 + $0x58] sm:$0xff] %vm34_vm0, %v521_v42  ;;  %v318_v59 = vmul.f32 %v919_v2, %v291_v63  ;;  %v293_v27 = vmul.f32 %v615_v21, %v894_v29  ;;  %v383_v62 = vmul.f32 0.044715, %v1107_v11  ;;  %v363_v10 = vmul.f32 0.5, %v1107_v11 }
 0x16e   :  { %v619_v44 = vpop.eup %618  ;;  %v502_v17 = vadd.f32 1.0, %v617_v15  ;;  %v344_v30 = vadd.f32 %v925_v6, %v317_v37  ;;  %v319_v7 = vmul.f32 %v919_v2, %v292_v14 }
 0x16f   :  { %v621_v36 = vpop.eup %620  ;;  %v345_v5 = vadd.f32 %v925_v6, %v318_v59  ;;  %v320_v31 = vmul.f32 %v919_v2, %v293_v27  ;;  %v294_v34 = vmul.f32 %v619_v44, %v903_v19  ;;  %v403_v29 = vmul.f32 %v383_v62, %v1107_v11 }
 0x170   :  { %v522_v18 = vmul.f32 %v502_v17, %v362_v25  ;;  %v384_v12 = vmul.f32 0.044715, %v344_v30  ;;  %v346_v54 = vadd.f32 %v925_v6, %v319_v7  ;;  %v295_v52 = vmul.f32 %v621_v36, %v906_v33 }
 0x171   :  { %v385_v26 = vmul.f32 0.044715, %v345_v5  ;;  %v1127_v35 = vadd.f32 %v925_v6, %v320_v31  ;;  %v423_v9 = vmul.f32 %v403_v29, %v1107_v11  ;;  %v321_v19 = vmul.f32 %v919_v2, %v294_v34 }
 0x172   :  { %542 = vst.msk [vmem:[%s1177_s3 + $0x60] sm:$0xff] %vm34_vm0, %v522_v18  ;;  %v404_v16 = vmul.f32 %v384_v12, %v344_v30  ;;  %v386_v23 = vmul.f32 0.044715, %v346_v54  ;;  %v322_v47 = vmul.f32 %v919_v2, %v295_v52  ;;  %v364_v37 = vmul.f32 0.5, %v344_v30 }
 0x173   :  { %v405_v60 = vmul.f32 %v385_v26, %v345_v5  ;;  %v443_v45 = vadd.f32 %v423_v9, %v1107_v11  ;;  %v387_v43 = vmul.f32 0.044715, %v1127_v35  ;;  %v348_v46 = vadd.f32 %v925_v6, %v321_v19 }
 0x174   :  { %v424_v38 = vmul.f32 %v404_v16, %v344_v30  ;;  %v406_v40 = vmul.f32 %v386_v23, %v346_v54  ;;  %v349_v53 = vadd.f32 %v925_v6, %v322_v47  ;;  %v365_v15 = vmul.f32 0.5, %v345_v5 }
 0x175   :  { %v425_v49 = vmul.f32 %v405_v60, %v345_v5  ;;  %v463_v32 = vmul.f32 0.7978846, %v443_v45  ;;  %v407_v48 = vmul.f32 %v387_v43, %v1127_v35  ;;  %v388_v33 = vmul.f32 0.044715, %v348_v46 }
 0x176   :  { %v444_v22 = vadd.f32 %v424_v38, %v344_v30  ;;  %v426_v51 = vmul.f32 %v406_v40, %v346_v54  ;;  %v389_v2 = vmul.f32 0.044715, %v349_v53  ;;  %v366_v62 = vmul.f32 0.5, %v346_v54 }
 0x177   :  { %v445_v50 = vadd.f32 %v425_v49, %v345_v5  ;;  %622 = vtanh.f32 %v463_v32  ;;  %v427_v58 = vmul.f32 %v407_v48, %v1127_v35  ;;  %v408_v55 = vmul.f32 %v388_v33, %v348_v46 }
 0x178   :  { %v464_v57 = vmul.f32 0.7978846, %v444_v22  ;;  %v446_v20 = vadd.f32 %v426_v51, %v346_v54  ;;  %v409_v13 = vmul.f32 %v389_v2, %v349_v53  ;;  %v367_v11 = vmul.f32 0.5, %v1127_v35 }
 0x179   :  { %v465_v24 = vmul.f32 0.7978846, %v445_v50  ;;  %v447_v61 = vadd.f32 %v427_v58, %v1127_v35  ;;  %v428_v3 = vmul.f32 %v408_v55, %v348_v46  ;;  %v368_v34 = vmul.f32 0.5, %v348_v46 }
 0x17a   :  { %624 = vtanh.f32 %v464_v57  ;;  %v466_v1 = vmul.f32 0.7978846, %v446_v20  ;;  %v429_v6 = vmul.f32 %v409_v13, %v349_v53  ;;  %v369_v26 = vmul.f32 0.5, %v349_v53 }
 0x17b   :  { %626 = vtanh.f32 %v465_v24  ;;  %v467_v0 = vmul.f32 0.7978846, %v447_v61  ;;  %v448_v4 = vadd.f32 %v428_v3, %v348_v46 }
 0x17c   :  { %628 = vtanh.f32 %v466_v1  ;;  %v449_v39 = vadd.f32 %v429_v6, %v349_v53 }
 0x17d   :  { %630 = vtanh.f32 %v467_v0  ;;  %v468_v41 = vmul.f32 0.7978846, %v448_v4 }
 0x17e   :  { %v469_v28 = vmul.f32 0.7978846, %v449_v39 }
 0x17f   :  { %632 = vtanh.f32 %v468_v41 }
 0x180   :  { %634 = vtanh.f32 %v469_v28 }
 0x184   :  { %v623_v56 = vpop.eup %622 }
 0x185   :  { %v503_v8 = vadd.f32 1.0, %v623_v56 }
 0x187   :  { %v625_v42 = vpop.eup %624  ;;  %v523_v21 = vmul.f32 %v503_v8, %v363_v10 }
 0x188   :  { %v627_v63 = vpop.eup %626  ;;  %v504_v14 = vadd.f32 1.0, %v625_v42 }
 0x189   :  { %v505_v59 = vadd.f32 1.0, %v627_v63  ;;  %v629_v27 = vpop.eup %628  ;;  %543 = vst.msk [vmem:[%s1177_s3 + $0x68] sm:$0xff] %vm34_vm0, %v523_v21 }
 0x18a   :  { %v524_v44 = vmul.f32 %v504_v14, %v364_v37  ;;  %v631_v25 = vpop.eup %630  ;;  %v506_v36 = vadd.f32 1.0, %v629_v27 }
 0x18b   :  { %v525_v17 = vmul.f32 %v505_v59, %v365_v15  ;;  %v507_v30 = vadd.f32 1.0, %v631_v25 }
 0x18c   :  { %544 = vst.msk [vmem:[%s1177_s3 + $0x70] sm:$0xff] %vm34_vm0, %v524_v44  ;;  %v526_v5 = vmul.f32 %v506_v36, %v366_v62  ;;  %v633_v7 = vpop.eup %632 }
 0x18d   :  { %545 = vst.msk [vmem:[%s1177_s3 + $0x78] sm:$0xff] %vm34_vm0, %v525_v17  ;;  %v527_v31 = vmul.f32 %v507_v30, %v367_v11  ;;  %v508_v18 = vadd.f32 1.0, %v633_v7  ;;  %v635_v29 = vpop.eup %634 }
 0x18e   :  { %546 = vst.msk [vmem:[%s1177_s3 + $0x80] sm:$0xff] %vm34_vm0, %v526_v5  ;;  %v509_v54 = vadd.f32 1.0, %v635_v29 }
 0x18f   :  { %547 = vst.msk [vmem:[%s1177_s3 + $0x88] sm:$0xff] %vm34_vm0, %v527_v31  ;;  %v528_v12 = vmul.f32 %v508_v18, %v368_v34 }
 0x190   :  { %v529_v35 = vmul.f32 %v509_v54, %v369_v26 }
 0x191   :  { %548 = vst.msk [vmem:[%s1177_s3 + $0x90] sm:$0xff] %vm34_vm0, %v528_v12 }
 0x192   :  { %549 = vst.msk [vmem:[%s1177_s3 + $0x98] sm:$0xff] %vm34_vm0, %v529_v35 }

// kernel: hubert_forward.17
= control target key start
LH: loop header
LB: loop body
LE: loop exit
PB: predicated region body
PF: predicated region fallthrough
CT: control target
= control target key end

     0   :  { %s674_s1 = inlined_call_operand.vmem [shape: bf16[128,128], index: 1, kind: input, shape index: {}]   ;;  %s675_s0 = inlined_call_operand.vmem [shape: bf16[160,128], index: 0, kind: input, shape index: {}]   ;;  %s676_s2 = inlined_call_operand.vmem [shape: f32[1,128], index: 2, kind: input, shape index: {}]   ;;  %s677_s3 = inlined_call_operand.vmem [shape: f32[160,128], index: 3, kind: output, shape index: {}]  }
   0x1   :  { %v519_v0 = vld [vmem:[%s674_s1 + $0x38] sm:$0xff]   ;;  %v520_v1 = vld [vmem:[%s674_s1 + $0x30] sm:$0xff]   ;;  %v521_v2 = vld [vmem:[%s674_s1 + $0x28] sm:$0xff]  }
   0x2   :  { %467 = vmatprep.subr.bf16.mxu0 %v519_v0  ;;  %503 = vmatprep.subr.bf16.mxu1 %v519_v0  ;;  %v522_v3 = vld [vmem:[%s674_s1 + $0x20] sm:$0xff]   ;;  %v529_v5 = vld [vmem:[%s675_s0 + $0x30] sm:$0xff]   ;;  %v523_v6 = vld [vmem:[%s674_s1 + $0x18] sm:$0xff]  }
   0x3   :  { %468 = vmatpush3.bf16.msra.mxu0 %v519_v0  ;;  %511 = vmatpush3.bf16.msra.mxu1 %v519_v0  ;;  %v527_v4 = vld [vmem:[%s675_s0] sm:$0xff]   ;;  %v524_v7 = vld [vmem:[%s674_s1 + $0x10] sm:$0xff]   ;;  %v525_v8 = vld [vmem:[%s674_s1 + $0x8] sm:$0xff]  }
   0x4   :  { %469 = vmatprep.subr.bf16.mxu0 %v520_v1  ;;  %504 = vmatprep.subr.bf16.mxu1 %v520_v1  ;;  %v526_v9 = vld [vmem:[%s674_s1] sm:$0xff]   ;;  %v528_v10 = vld [vmem:[%s675_s0 + $0x8] sm:$0xff]   ;;  %v530_v11 = vld [vmem:[%s675_s0 + $0x38] sm:$0xff]  }
   0x5   :  { %483 = vmatprep.mubr.bf16.mxu0 %v527_v4  ;;  %495 = vmatprep.mubr.bf16.mxu1 %v529_v5  ;;  %v531_v12 = vld [vmem:[%s675_s0 + $0x10] sm:$0xff]   ;;  %v533_v13 = vld [vmem:[%s675_s0 + $0x40] sm:$0xff]   ;;  %v532_v14 = vld [vmem:[%s675_s0 + $0x18] sm:$0xff]  }
   0x6   :  { %v534_v15 = vld [vmem:[%s675_s0 + $0x48] sm:$0xff]   ;;  %v535_v16 = vld [vmem:[%s675_s0 + $0x20] sm:$0xff]  }
   0x7   :  { %470 = vmatpush3.bf16.msra.mxu0 %v520_v1  ;;  %512 = vmatpush3.bf16.msra.mxu1 %v520_v1  ;;  %v536_v17 = vld [vmem:[%s675_s0 + $0x28] sm:$0xff]   ;;  %v448_v18 = vld [vmem:[%s676_s2] ss:$0 sm:$0xff] }
   0x8   :  { %471 = vmatprep.subr.bf16.mxu0 %v521_v2  ;;  %505 = vmatprep.subr.bf16.mxu1 %v521_v2 }
   0xb   :  { %472 = vmatpush3.bf16.msra.mxu0 %v521_v2  ;;  %513 = vmatpush3.bf16.msra.mxu1 %v521_v2 }
   0xc   :  { %473 = vmatprep.subr.bf16.mxu0 %v522_v3  ;;  %506 = vmatprep.subr.bf16.mxu1 %v522_v3 }
   0xf   :  { %474 = vmatpush3.bf16.msra.mxu0 %v522_v3  ;;  %514 = vmatpush3.bf16.msra.mxu1 %v522_v3 }
  0x10   :  { %475 = vmatprep.subr.bf16.mxu0 %v523_v6  ;;  %507 = vmatprep.subr.bf16.mxu1 %v523_v6 }
  0x13   :  { %476 = vmatpush3.bf16.msra.mxu0 %v523_v6  ;;  %515 = vmatpush3.bf16.msra.mxu1 %v523_v6 }
  0x14   :  { %477 = vmatprep.subr.bf16.mxu0 %v524_v7  ;;  %508 = vmatprep.subr.bf16.mxu1 %v524_v7 }
  0x17   :  { %478 = vmatpush3.bf16.msra.mxu0 %v524_v7  ;;  %516 = vmatpush3.bf16.msra.mxu1 %v524_v7 }
  0x18   :  { %479 = vmatprep.subr.bf16.mxu0 %v525_v8  ;;  %509 = vmatprep.subr.bf16.mxu1 %v525_v8 }
  0x1b   :  { %480 = vmatpush3.bf16.msra.mxu0 %v525_v8  ;;  %517 = vmatpush3.bf16.msra.mxu1 %v525_v8 }
  0x1c   :  { %481 = vmatprep.subr.bf16.mxu0 %v526_v9  ;;  %510 = vmatprep.subr.bf16.mxu1 %v526_v9 }
  0x1f   :  { %482 = vmatpush3.bf16.msra.mxu0 %v526_v9  ;;  %518 = vmatpush3.bf16.msra.mxu1 %v526_v9 }
  0x22   :  { %484 = vmatmul.mubr.bf16.vlgmr.msra.gmra.mxu0 %v528_v10  ;;  %496 = vmatmul.mubr.bf16.vlgmr.msra.gmra.mxu1 %v530_v11 }
  0x23   :  { %487 = vmatprep.mubr.bf16.mxu0 %v531_v12  ;;  %499 = vmatprep.mubr.bf16.mxu1 %v533_v13 }
  0x2a   :  { %488 = vmatmul.mubr.bf16.gmra.mxu0 %v532_v14  ;;  %500 = vmatmul.mubr.bf16.gmra.mxu1 %v534_v15 }
  0x2b   :  { %491 = vmatprep.mubr.bf16.mxu0 %v535_v16 }
  0x32   :  { %492 = vmatmul.mubr.bf16.gmra.mxu0 %v536_v17 }
  0xe2   :  { %v485_v19 = vpop.f32.mrf.mxu0  ;;  %v497_v20 = vpop.f32.mrf.mxu1 }
  0xe3   :  { %v388_v21 = vadd.f32 %v485_v19, %v448_v18  ;;  %v400_v22 = vadd.f32 %v497_v20, %v448_v18 }
  0xe4   :  { %v237_v23 = vpop.f32.mrf.mxu0  ;;  %v285_v24 = vpop.f32.mrf.mxu1 }
  0xe5   :  { %408 = vst [vmem:[%s677_s3 + $0x10] sm:$0xff] %v388_v21  ;;  %v386_v25 = vadd.f32 %v448_v18, %v237_v23  ;;  %420 = vst [vmem:[%s677_s3 + $0x70] sm:$0xff] %v400_v22  ;;  %v398_v26 = vadd.f32 %v448_v18, %v285_v24 }
  0xe6   :  { %v486_v27 = vpop.f32.mrf.mxu0  ;;  %v498_v28 = vpop.f32.mrf.mxu1 }
  0xe7   :  { %406 = vst [vmem:[%s677_s3] sm:$0xff] %v386_v25  ;;  %v389_v29 = vadd.f32 %v486_v27, %v448_v18  ;;  %418 = vst [vmem:[%s677_s3 + $0x60] sm:$0xff] %v398_v26  ;;  %v401_v30 = vadd.f32 %v498_v28, %v448_v18 }
  0xe8   :  { %v240_v31 = vpop.f32.mrf.mxu0  ;;  %v288_v32 = vpop.f32.mrf.mxu1 }
  0xe9   :  { %409 = vst [vmem:[%s677_s3 + $0x18] sm:$0xff] %v389_v29  ;;  %v387_v33 = vadd.f32 %v448_v18, %v240_v31  ;;  %421 = vst [vmem:[%s677_s3 + $0x78] sm:$0xff] %v401_v30  ;;  %v399_v34 = vadd.f32 %v448_v18, %v288_v32 }
  0xea   :  { %v489_v35 = vpop.f32.mrf.mxu0  ;;  %v501_v36 = vpop.f32.mrf.mxu1 }
  0xeb   :  { %407 = vst [vmem:[%s677_s3 + $0x8] sm:$0xff] %v387_v33  ;;  %v392_v37 = vadd.f32 %v489_v35, %v448_v18  ;;  %419 = vst [vmem:[%s677_s3 + $0x68] sm:$0xff] %v399_v34  ;;  %v404_v38 = vadd.f32 %v501_v36, %v448_v18 }
  0xec   :  { %v253_v39 = vpop.f32.mrf.mxu0  ;;  %v301_v40 = vpop.f32.mrf.mxu1 }
  0xed   :  { %412 = vst [vmem:[%s677_s3 + $0x30] sm:$0xff] %v392_v37  ;;  %v390_v41 = vadd.f32 %v448_v18, %v253_v39  ;;  %424 = vst [vmem:[%s677_s3 + $0x90] sm:$0xff] %v404_v38  ;;  %v402_v42 = vadd.f32 %v448_v18, %v301_v40 }
  0xee   :  { %v490_v43 = vpop.f32.mrf.mxu0  ;;  %v502_v44 = vpop.f32.mrf.mxu1 }
  0xef   :  { %410 = vst [vmem:[%s677_s3 + $0x20] sm:$0xff] %v390_v41  ;;  %v393_v45 = vadd.f32 %v490_v43, %v448_v18  ;;  %422 = vst [vmem:[%s677_s3 + $0x80] sm:$0xff] %v402_v42  ;;  %v405_v46 = vadd.f32 %v502_v44, %v448_v18 }
  0xf0   :  { %v256_v47 = vpop.f32.mrf.mxu0  ;;  %v304_v48 = vpop.f32.mrf.mxu1 }
  0xf1   :  { %413 = vst [vmem:[%s677_s3 + $0x38] sm:$0xff] %v393_v45  ;;  %v391_v49 = vadd.f32 %v448_v18, %v256_v47  ;;  %425 = vst [vmem:[%s677_s3 + $0x98] sm:$0xff] %v405_v46  ;;  %v403_v50 = vadd.f32 %v448_v18, %v304_v48 }
  0xf2   :  { %v493_v51 = vpop.f32.mrf.mxu0 }
  0xf3   :  { %411 = vst [vmem:[%s677_s3 + $0x28] sm:$0xff] %v391_v49  ;;  %v396_v52 = vadd.f32 %v493_v51, %v448_v18  ;;  %423 = vst [vmem:[%s677_s3 + $0x88] sm:$0xff] %v403_v50 }
  0xf4   :  { %v269_v53 = vpop.f32.mrf.mxu0 }
  0xf5   :  { %416 = vst [vmem:[%s677_s3 + $0x50] sm:$0xff] %v396_v52  ;;  %v394_v54 = vadd.f32 %v448_v18, %v269_v53 }
  0xf6   :  { %v494_v55 = vpop.f32.mrf.mxu0 }
  0xf7   :  { %414 = vst [vmem:[%s677_s3 + $0x40] sm:$0xff] %v394_v54  ;;  %v397_v56 = vadd.f32 %v494_v55, %v448_v18 }
  0xf8   :  { %v272_v57 = vpop.f32.mrf.mxu0 }
  0xf9   :  { %417 = vst [vmem:[%s677_s3 + $0x58] sm:$0xff] %v397_v56  ;;  %v395_v58 = vadd.f32 %v448_v18, %v272_v57 }
  0xfb   :  { %415 = vst [vmem:[%s677_s3 + $0x48] sm:$0xff] %v395_v58 }

// kernel: hubert_forward.20
= control target key start
LH: loop header
LB: loop body
LE: loop exit
PB: predicated region body
PF: predicated region fallthrough
CT: control target
= control target key end

     0   :  { %vm24_vm0 = vcmask 523264   ;;  %s596_s0 = inlined_call_operand.vmem [shape: f32[80,64], index: 0, kind: input, shape index: {}]   ;;  %s597_s1 = inlined_call_operand.vmem [shape: f32[1,64], index: 1, kind: input, shape index: {}]   ;;  %s598_s2 = inlined_call_operand.vmem [shape: f32[1,64], index: 2, kind: input, shape index: {}]   ;;  %s599_s3 = inlined_call_operand.vmem [shape: f32[80,64], index: 3, kind: output, shape index: {}]  }
   0x1   :  { %v14_v0 = vld [vmem:[%s596_s0] sm:$0xff]  ;;  %v16_v1 = vld [vmem:[%s596_s0 + $0x10] sm:$0xff]  ;;  %v15_v2 = vld [vmem:[%s596_s0 + $0x8] sm:$0xff] }
   0x2   :  { %v25_v3 = vsel %vm24_vm0, %v14_v0, 0.0  ;;  %v31_v4 = vsel %vm24_vm0, %v16_v1, 0.0  ;;  %v17_v5 = vld [vmem:[%s596_s0 + $0x18] sm:$0xff]  ;;  %v28_v6 = vsel %vm24_vm0, %v15_v2, 0.0  ;;  %v18_v8 = vld [vmem:[%s596_s0 + $0x20] sm:$0xff]  ;;  %v19_v9 = vld [vmem:[%s596_s0 + $0x28] sm:$0xff] }
   0x3   :  { %26 = vadd.xlane.f32.xlu0 %v25_v3  ;;  %32 = vadd.xlane.f32.xlu1 %v31_v4  ;;  %v34_v7 = vsel %vm24_vm0, %v17_v5, 0.0  ;;  %v37_v10 = vsel %vm24_vm0, %v18_v8, 0.0  ;;  %v40_v11 = vsel %vm24_vm0, %v19_v9, 0.0  ;;  %v20_v12 = vld [vmem:[%s596_s0 + $0x30] sm:$0xff]  ;;  %v21_v13 = vld [vmem:[%s596_s0 + $0x38] sm:$0xff]  ;;  %v22_v16 = vld [vmem:[%s596_s0 + $0x40] sm:$0xff] }
   0x4   :  { %v43_v14 = vsel %vm24_vm0, %v20_v12, 0.0  ;;  %v46_v15 = vsel %vm24_vm0, %v21_v13, 0.0  ;;  %v23_v17 = vld [vmem:[%s596_s0 + $0x48] sm:$0xff]  ;;  %v49_v18 = vsel %vm24_vm0, %v22_v16, 0.0 }
   0x5   :  { %v52_v19 = vsel %vm24_vm0, %v23_v17, 0.0 }
   0x7   :  { %29 = vadd.xlane.f32.xlu0 %v28_v6  ;;  %35 = vadd.xlane.f32.xlu1 %v34_v7 }
   0xb   :  { %38 = vadd.xlane.f32.xlu0 %v37_v10  ;;  %41 = vadd.xlane.f32.xlu1 %v40_v11 }
   0xf   :  { %44 = vadd.xlane.f32.xlu0 %v43_v14  ;;  %47 = vadd.xlane.f32.xlu1 %v46_v15 }
  0x13   :  { %50 = vadd.xlane.f32.xlu0 %v49_v18  ;;  %53 = vadd.xlane.f32.xlu1 %v52_v19 }
  0x8c   :  { %v27_v20 = vpop.xlane.xlu0 %26  ;;  %v33_v21 = vpop.xlane.xlu1 %32 }
  0x8d   :  { %v56_v22 = vmul.f32 0.015625, %v27_v20  ;;  %v58_v23 = vmul.f32 0.015625, %v33_v21 }
  0x8f   :  { %v396_v24 = vsub.f32 %v14_v0, %v56_v22  ;;  %v398_v25 = vsub.f32 %v16_v1, %v58_v23 }
  0x90   :  { %v30_v26 = vpop.xlane.xlu0 %29  ;;  %v36_v27 = vpop.xlane.xlu1 %35 }
  0x91   :  { %v57_v28 = vmul.f32 0.015625, %v30_v26  ;;  %v59_v29 = vmul.f32 0.015625, %v36_v27  ;;  %v76_v30 = vmul.f32 %v396_v24, %v396_v24  ;;  %v78_v31 = vmul.f32 %v398_v25, %v398_v25 }
  0x93   :  { %v404_v32 = vsub.f32 %v15_v2, %v57_v28  ;;  %v406_v33 = vsub.f32 %v17_v5, %v59_v29  ;;  %v86_v34 = vsel %vm24_vm0, %v76_v30, 0.0  ;;  %v92_v37 = vsel %vm24_vm0, %v78_v31, 0.0 }
  0x94   :  { %87 = vadd.xlane.f32.xlu0 %v86_v34  ;;  %v39_v35 = vpop.xlane.xlu0 %38  ;;  %v42_v36 = vpop.xlane.xlu1 %41 }
  0x95   :  { %v60_v38 = vmul.f32 0.015625, %v39_v35  ;;  %v61_v39 = vmul.f32 0.015625, %v42_v36  ;;  %v77_v40 = vmul.f32 %v404_v32, %v404_v32  ;;  %v79_v41 = vmul.f32 %v406_v33, %v406_v33  ;;  %v449_v36 = vld [vmem:[%s597_s1] ss:$0 sm:$0xff] }
  0x97   :  { %v414_v42 = vsub.f32 %v18_v8, %v60_v38  ;;  %v416_v43 = vsub.f32 %v19_v9, %v61_v39  ;;  %v89_v44 = vsel %vm24_vm0, %v77_v40, 0.0  ;;  %v95_v47 = vsel %vm24_vm0, %v79_v41, 0.0  ;;  %v455_v40 = vld [vmem:[%s598_s2] ss:$0 sm:$0xff] }
  0x98   :  { %93 = vadd.xlane.f32.xlu0 %v92_v37  ;;  %90 = vadd.xlane.f32.xlu1 %v89_v44  ;;  %v45_v45 = vpop.xlane.xlu0 %44  ;;  %v48_v46 = vpop.xlane.xlu1 %47 }
  0x99   :  { %v62_v48 = vmul.f32 0.015625, %v45_v45  ;;  %v63_v49 = vmul.f32 0.015625, %v48_v46  ;;  %v80_v50 = vmul.f32 %v414_v42, %v414_v42  ;;  %v81_v51 = vmul.f32 %v416_v43, %v416_v43 }
  0x9b   :  { %v424_v52 = vsub.f32 %v20_v12, %v62_v48  ;;  %v426_v53 = vsub.f32 %v21_v13, %v63_v49  ;;  %v98_v54 = vsel %vm24_vm0, %v80_v50, 0.0  ;;  %v101_v57 = vsel %vm24_vm0, %v81_v51, 0.0 }
  0x9c   :  { %96 = vadd.xlane.f32.xlu1 %v95_v47  ;;  %99 = vadd.xlane.f32.xlu0 %v98_v54  ;;  %v51_v55 = vpop.xlane.xlu0 %50  ;;  %v54_v56 = vpop.xlane.xlu1 %53 }
  0x9d   :  { %v64_v58 = vmul.f32 0.015625, %v51_v55  ;;  %v65_v59 = vmul.f32 0.015625, %v54_v56  ;;  %v82_v60 = vmul.f32 %v424_v52, %v424_v52  ;;  %v83_v61 = vmul.f32 %v426_v53, %v426_v53 }
  0x9f   :  { %v434_v62 = vsub.f32 %v22_v16, %v64_v58  ;;  %v436_v63 = vsub.f32 %v23_v17, %v65_v59  ;;  %v104_v0 = vsel %vm24_vm0, %v82_v60, 0.0  ;;  %v107_v1 = vsel %vm24_vm0, %v83_v61, 0.0 }
  0xa0   :  { %102 = vadd.xlane.f32.xlu1 %v101_v57  ;;  %105 = vadd.xlane.f32.xlu0 %v104_v0 }
  0xa1   :  { %v84_v2 = vmul.f32 %v434_v62, %v434_v62  ;;  %v85_v3 = vmul.f32 %v436_v63, %v436_v63 }
  0xa3   :  { %v110_v4 = vsel %vm24_vm0, %v84_v2, 0.0  ;;  %v113_v5 = vsel %vm24_vm0, %v85_v3, 0.0 }
  0xa4   :  { %108 = vadd.xlane.f32.xlu1 %v107_v1  ;;  %111 = vadd.xlane.f32.xlu0 %v110_v4 }
  0xa8   :  { %114 = vadd.xlane.f32.xlu1 %v113_v5 }
 0x11d   :  { %v88_v6 = vpop.xlane.xlu0 %87 }
 0x11e   :  { %v116_v7 = vmul.f32 0.015625, %v88_v6 }
 0x120   :  { %v126_v8 = vadd.f32 1e-05, %v116_v7 }
 0x121   :  { %v91_v9 = vpop.xlane.xlu1 %90  ;;  %v94_v10 = vpop.xlane.xlu0 %93 }
 0x122   :  { %296 = vrsqrt.f32 %v126_v8  ;;  %v117_v11 = vmul.f32 0.015625, %v91_v9  ;;  %v118_v12 = vmul.f32 0.015625, %v94_v10 }
 0x124   :  { %v127_v13 = vadd.f32 1e-05, %v117_v11  ;;  %v128_v14 = vadd.f32 1e-05, %v118_v12 }
 0x125   :  { %v97_v15 = vpop.xlane.xlu1 %96  ;;  %v100_v16 = vpop.xlane.xlu0 %99 }
 0x126   :  { %298 = vrsqrt.f32 %v127_v13  ;;  %v119_v17 = vmul.f32 0.015625, %v97_v15  ;;  %v120_v18 = vmul.f32 0.015625, %v100_v16 }
 0x127   :  { %300 = vrsqrt.f32 %v128_v14 }
 0x128   :  { %v129_v19 = vadd.f32 1e-05, %v119_v17  ;;  %v130_v20 = vadd.f32 1e-05, %v120_v18 }
 0x129   :  { %v103_v21 = vpop.xlane.xlu1 %102  ;;  %v106_v22 = vpop.xlane.xlu0 %105 }
 0x12a   :  { %302 = vrsqrt.f32 %v129_v19  ;;  %v121_v23 = vmul.f32 0.015625, %v103_v21  ;;  %v122_v26 = vmul.f32 0.015625, %v106_v22 }
 0x12b   :  { %304 = vrsqrt.f32 %v130_v20 }
 0x12c   :  { %v131_v27 = vadd.f32 1e-05, %v121_v23  ;;  %v132_v28 = vadd.f32 1e-05, %v122_v26 }
 0x12d   :  { %v109_v29 = vpop.xlane.xlu1 %108  ;;  %v112_v30 = vpop.xlane.xlu0 %111 }
 0x12e   :  { %306 = vrsqrt.f32 %v131_v27  ;;  %v123_v31 = vmul.f32 0.015625, %v109_v29  ;;  %v124_v34 = vmul.f32 0.015625, %v112_v30 }
 0x12f   :  { %v297_v35 = vpop.eup %296  ;;  %308 = vrsqrt.f32 %v132_v28 }
 0x130   :  { %v146_v37 = vmul.f32 %v297_v35, %v396_v24  ;;  %v133_v38 = vadd.f32 1e-05, %v123_v31  ;;  %v134_v39 = vadd.f32 1e-05, %v124_v34 }
 0x131   :  { %v115_v41 = vpop.xlane.xlu1 %114 }
 0x132   :  { %v163_v44 = vmul.f32 %v449_v36, %v146_v37  ;;  %310 = vrsqrt.f32 %v133_v38  ;;  %v125_v45 = vmul.f32 0.015625, %v115_v41 }
 0x133   :  { %v299_v46 = vpop.eup %298  ;;  %312 = vrsqrt.f32 %v134_v39 }
 0x134   :  { %v301_v47 = vpop.eup %300  ;;  %v459_v48 = vadd.f32 %v455_v40, %v163_v44  ;;  %v147_v24 = vmul.f32 %v299_v46, %v404_v32  ;;  %v135_v49 = vadd.f32 1e-05, %v125_v45 }
 0x135   :  { %v148_v50 = vmul.f32 %v301_v47, %v398_v25 }
 0x136   :  { %v200_v51 = vmul.f32 0.044715, %v459_v48  ;;  %v164_v54 = vmul.f32 %v449_v36, %v147_v24  ;;  %314 = vrsqrt.f32 %v135_v49 }
 0x137   :  { %v303_v55 = vpop.eup %302  ;;  %v165_v56 = vmul.f32 %v449_v36, %v148_v50 }
 0x138   :  { %v305_v57 = vpop.eup %304  ;;  %v210_v58 = vmul.f32 %v200_v51, %v459_v48  ;;  %v468_v59 = vadd.f32 %v455_v40, %v164_v54  ;;  %v149_v60 = vmul.f32 %v303_v55, %v406_v33 }
 0x139   :  { %v472_v32 = vadd.f32 %v455_v40, %v165_v56  ;;  %v150_v25 = vmul.f32 %v305_v57, %v414_v42 }
 0x13a   :  { %v220_v61 = vmul.f32 %v210_v58, %v459_v48  ;;  %v201_v0 = vmul.f32 0.044715, %v468_v59  ;;  %v166_v1 = vmul.f32 %v449_v36, %v149_v60 }
 0x13b   :  { %v307_v2 = vpop.eup %306  ;;  %v202_v3 = vmul.f32 0.044715, %v472_v32  ;;  %v167_v4 = vmul.f32 %v449_v36, %v150_v25 }
 0x13c   :  { %v309_v5 = vpop.eup %308  ;;  %v230_v6 = vadd.f32 %v220_v61, %v459_v48  ;;  %v211_v33 = vmul.f32 %v201_v0, %v468_v59  ;;  %v483_v7 = vadd.f32 %v455_v40, %v166_v1  ;;  %v151_v42 = vmul.f32 %v307_v2, %v416_v43 }
 0x13d   :  { %v212_v8 = vmul.f32 %v202_v3, %v472_v32  ;;  %v488_v9 = vadd.f32 %v455_v40, %v167_v4  ;;  %v152_v10 = vmul.f32 %v309_v5, %v424_v52  ;;  %v190_v2 = vmul.f32 0.5, %v459_v48 }
 0x13e   :  { %v240_v11 = vmul.f32 0.7978846, %v230_v6  ;;  %v221_v12 = vmul.f32 %v211_v33, %v468_v59  ;;  %v203_v13 = vmul.f32 0.044715, %v483_v7  ;;  %v168_v17 = vmul.f32 %v449_v36, %v151_v42 }
 0x13f   :  { %v311_v14 = vpop.eup %310  ;;  %v222_v15 = vmul.f32 %v212_v8, %v472_v32  ;;  %v204_v16 = vmul.f32 0.044715, %v488_v9  ;;  %v169_v52 = vmul.f32 %v449_v36, %v152_v10  ;;  %v191_v48 = vmul.f32 0.5, %v468_v59 }
 0x140   :  { %v313_v43 = vpop.eup %312  ;;  %316 = vtanh.f32 %v240_v11  ;;  %v231_v18 = vadd.f32 %v221_v12, %v468_v59  ;;  %v213_v19 = vmul.f32 %v203_v13, %v483_v7  ;;  %v502_v22 = vadd.f32 %v455_v40, %v168_v17 }
 0x141   :  { %v232_v20 = vadd.f32 %v222_v15, %v472_v32  ;;  %v214_v21 = vmul.f32 %v204_v16, %v488_v9  ;;  %v153_v23 = vmul.f32 %v311_v14, %v426_v53  ;;  %v507_v28 = vadd.f32 %v455_v40, %v169_v52 }
 0x142   :  { %v241_v26 = vmul.f32 0.7978846, %v231_v18  ;;  %v223_v27 = vmul.f32 %v213_v19, %v483_v7  ;;  %v154_v29 = vmul.f32 %v313_v43, %v434_v62  ;;  %v205_v35 = vmul.f32 0.044715, %v502_v22 }
 0x143   :  { %v315_v30 = vpop.eup %314  ;;  %v242_v31 = vmul.f32 0.7978846, %v232_v20  ;;  %v224_v34 = vmul.f32 %v214_v21, %v488_v9  ;;  %v206_v38 = vmul.f32 0.044715, %v507_v28  ;;  %v170_v41 = vmul.f32 %v449_v36, %v153_v23 }
 0x144   :  { %318 = vtanh.f32 %v241_v26  ;;  %v233_v37 = vadd.f32 %v223_v27, %v483_v7  ;;  %v215_v39 = vmul.f32 %v205_v35, %v502_v22  ;;  %v171_v45 = vmul.f32 %v449_v36, %v154_v29 }
 0x145   :  { %320 = vtanh.f32 %v242_v31  ;;  %v234_v53 = vadd.f32 %v224_v34, %v488_v9  ;;  %v216_v62 = vmul.f32 %v206_v38, %v507_v28  ;;  %v155_v46 = vmul.f32 %v315_v30, %v436_v63 }
 0x146   :  { %v243_v44 = vmul.f32 0.7978846, %v233_v37  ;;  %v225_v24 = vmul.f32 %v215_v39, %v502_v22  ;;  %v522_v49 = vadd.f32 %v455_v40, %v170_v41  ;;  %v526_v51 = vadd.f32 %v455_v40, %v171_v45 }
 0x147   :  { %v244_v47 = vmul.f32 0.7978846, %v234_v53  ;;  %v226_v50 = vmul.f32 %v216_v62, %v507_v28  ;;  %v172_v54 = vmul.f32 %v449_v36, %v155_v46  ;;  %v192_v16 = vmul.f32 0.5, %v472_v32 }
 0x148   :  { %322 = vtanh.f32 %v243_v44  ;;  %v235_v55 = vadd.f32 %v225_v24, %v502_v22  ;;  %v207_v56 = vmul.f32 0.044715, %v522_v49  ;;  %v208_v57 = vmul.f32 0.044715, %v526_v51 }
 0x149   :  { %324 = vtanh.f32 %v244_v47  ;;  %v236_v63 = vadd.f32 %v226_v50, %v507_v28  ;;  %v534_v58 = vadd.f32 %v455_v40, %v172_v54  ;;  %v193_v59 = vmul.f32 0.5, %v483_v7 }
 0x14a   :  { %v245_v60 = vmul.f32 0.7978846, %v235_v55  ;;  %v217_v25 = vmul.f32 %v207_v56, %v522_v49  ;;  %v218_v0 = vmul.f32 %v208_v57, %v526_v51  ;;  %v194_v32 = vmul.f32 0.5, %v488_v9 }
 0x14b   :  { %v246_v61 = vmul.f32 0.7978846, %v236_v63  ;;  %v209_v36 = vmul.f32 0.044715, %v534_v58  ;;  %v195_v7 = vmul.f32 0.5, %v502_v22  ;;  %v196_v9 = vmul.f32 0.5, %v507_v28 }
 0x14c   :  { %326 = vtanh.f32 %v245_v60  ;;  %v227_v3 = vmul.f32 %v217_v25, %v522_v49  ;;  %v228_v5 = vmul.f32 %v218_v0, %v526_v51  ;;  %v197_v22 = vmul.f32 0.5, %v522_v49 }
 0x14d   :  { %v317_v1 = vpop.eup %316  ;;  %328 = vtanh.f32 %v246_v61  ;;  %v219_v40 = vmul.f32 %v209_v36, %v534_v58  ;;  %v198_v28 = vmul.f32 0.5, %v526_v51  ;;  %v199_v46 = vmul.f32 0.5, %v534_v58 }
 0x14e   :  { %v260_v4 = vadd.f32 1.0, %v317_v1  ;;  %v237_v6 = vadd.f32 %v227_v3, %v522_v49  ;;  %v238_v42 = vadd.f32 %v228_v5, %v526_v51 }
 0x14f   :  { %v229_v8 = vmul.f32 %v219_v40, %v534_v58 }
 0x150   :  { %v270_v33 = vmul.f32 %v260_v4, %v190_v2  ;;  %v247_v11 = vmul.f32 0.7978846, %v237_v6  ;;  %v248_v14 = vmul.f32 0.7978846, %v238_v42 }
 0x151   :  { %v319_v10 = vpop.eup %318  ;;  %v239_v15 = vadd.f32 %v229_v8, %v534_v58 }
 0x152   :  { %v321_v12 = vpop.eup %320  ;;  %280 = vst.msk [vmem:[%s599_s3] sm:$0xff] %vm24_vm0, %v270_v33  ;;  %v261_v13 = vadd.f32 1.0, %v319_v10  ;;  %330 = vtanh.f32 %v247_v11 }
 0x153   :  { %v262_v17 = vadd.f32 1.0, %v321_v12  ;;  %332 = vtanh.f32 %v248_v14  ;;  %v249_v18 = vmul.f32 0.7978846, %v239_v15 }
 0x154   :  { %v271_v43 = vmul.f32 %v261_v13, %v191_v48 }
 0x155   :  { %v323_v19 = vpop.eup %322  ;;  %v272_v52 = vmul.f32 %v262_v17, %v192_v16  ;;  %334 = vtanh.f32 %v249_v18 }
 0x156   :  { %v325_v20 = vpop.eup %324  ;;  %281 = vst.msk [vmem:[%s599_s3 + $0x8] sm:$0xff] %vm24_vm0, %v271_v43  ;;  %v263_v21 = vadd.f32 1.0, %v323_v19 }
 0x157   :  { %282 = vst.msk [vmem:[%s599_s3 + $0x10] sm:$0xff] %vm24_vm0, %v272_v52  ;;  %v264_v23 = vadd.f32 1.0, %v325_v20 }
 0x158   :  { %v273_v26 = vmul.f32 %v263_v21, %v193_v59 }
 0x159   :  { %v274_v27 = vmul.f32 %v264_v23, %v194_v32  ;;  %v327_v29 = vpop.eup %326 }
 0x15a   :  { %283 = vst.msk [vmem:[%s599_s3 + $0x18] sm:$0xff] %vm24_vm0, %v273_v26  ;;  %v329_v30 = vpop.eup %328  ;;  %v265_v31 = vadd.f32 1.0, %v327_v29 }
 0x15b   :  { %284 = vst.msk [vmem:[%s599_s3 + $0x20] sm:$0xff] %vm24_vm0, %v274_v27  ;;  %v266_v34 = vadd.f32 1.0, %v329_v30 }
 0x15c   :  { %v275_v35 = vmul.f32 %v265_v31, %v195_v7 }
 0x15d   :  { %v276_v37 = vmul.f32 %v266_v34, %v196_v9 }
 0x15e   :  { %285 = vst.msk [vmem:[%s599_s3 + $0x28] sm:$0xff] %vm24_vm0, %v275_v35 }
 0x15f   :  { %v331_v38 = vpop.eup %330  ;;  %286 = vst.msk [vmem:[%s599_s3 + $0x30] sm:$0xff] %vm24_vm0, %v276_v37 }
 0x160   :  { %v333_v53 = vpop.eup %332  ;;  %v267_v39 = vadd.f32 1.0, %v331_v38 }
 0x161   :  { %v268_v41 = vadd.f32 1.0, %v333_v53 }
 0x162   :  { %v335_v44 = vpop.eup %334  ;;  %v277_v62 = vmul.f32 %v267_v39, %v197_v22 }
 0x163   :  { %v278_v45 = vmul.f32 %v268_v41, %v198_v28  ;;  %v269_v47 = vadd.f32 1.0, %v335_v44 }
 0x164   :  { %287 = vst.msk [vmem:[%s599_s3 + $0x38] sm:$0xff] %vm24_vm0, %v277_v62 }
 0x165   :  { %288 = vst.msk [vmem:[%s599_s3 + $0x40] sm:$0xff] %vm24_vm0, %v278_v45  ;;  %v279_v24 = vmul.f32 %v269_v47, %v199_v46 }
 0x167   :  { %289 = vst.msk [vmem:[%s599_s3 + $0x48] sm:$0xff] %vm24_vm0, %v279_v24 }

// kernel: hubert_forward.19
= control target key start
LH: loop header
LB: loop body
LE: loop exit
PB: predicated region body
PF: predicated region fallthrough
CT: control target
= control target key end

     0   :  { %s615_s1 = inlined_call_operand.vmem [shape: bf16[256,128], index: 1, kind: input, shape index: {}]   ;;  %s616_s0 = inlined_call_operand.vmem [shape: bf16[80,256], index: 0, kind: input, shape index: {}]   ;;  %s617_s2 = inlined_call_operand.vmem [shape: f32[1,128], index: 2, kind: input, shape index: {}]   ;;  %s618_s3 = inlined_call_operand.vmem [shape: f32[80,128], index: 3, kind: output, shape index: {}]  }
   0x1   :  { %v453_v0 = vld [vmem:[%s615_s1 + $0x78] sm:$0xff]   ;;  %v455_v2 = vld [vmem:[%s615_s1 + $0x70] sm:$0xff]   ;;  %v457_v4 = vld [vmem:[%s615_s1 + $0x68] sm:$0xff]  }
   0x2   :  { %v454_v1 = vld [vmem:[%s615_s1 + $0x38] sm:$0xff]   ;;  %391 = vmatprep.subr.bf16.mxu0 %v453_v0  ;;  %437 = vmatprep.subr.bf16.mxu1 %v453_v0  ;;  %v456_v3 = vld [vmem:[%s615_s1 + $0x30] sm:$0xff]   ;;  %v458_v5 = vld [vmem:[%s615_s1 + $0x28] sm:$0xff]  }
   0x3   :  { %392 = vmatpush3.bf16.msra.mxu0 %v454_v1  ;;  %445 = vmatpush3.bf16.msra.mxu1 %v454_v1  ;;  %v459_v6 = vld [vmem:[%s615_s1 + $0x60] sm:$0xff]   ;;  %v461_v8 = vld [vmem:[%s615_s1 + $0x58] sm:$0xff]   ;;  %v463_v10 = vld [vmem:[%s615_s1 + $0x50] sm:$0xff]  }
   0x4   :  { %393 = vmatprep.subr.bf16.mxu0 %v455_v2  ;;  %438 = vmatprep.subr.bf16.mxu1 %v455_v2  ;;  %v460_v7 = vld [vmem:[%s615_s1 + $0x20] sm:$0xff]   ;;  %v462_v9 = vld [vmem:[%s615_s1 + $0x18] sm:$0xff]   ;;  %v464_v13 = vld [vmem:[%s615_s1 + $0x10] sm:$0xff]  }
   0x5   :  { %v471_v11 = vld [vmem:[%s616_s0 + $0x4] ss:$8 sps:$4 sm:$0xff]   ;;  %v474_v12 = vld [vmem:[%s616_s0 + $0x34] ss:$8 sps:$4 sm:$0xff]   ;;  %v469_v18 = vld [vmem:[%s616_s0] ss:$8 sps:$4 sm:$0xff]  }
   0x6   :  { %v465_v14 = vld [vmem:[%s615_s1 + $0x48] sm:$0xff]   ;;  %259 = vmatprep.mubr.bf16.mxu0 %v471_v11  ;;  %283 = vmatprep.mubr.bf16.mxu1 %v474_v12  ;;  %v467_v16 = vld [vmem:[%s615_s1 + $0x40] sm:$0xff]   ;;  %v472_v19 = vld [vmem:[%s616_s0 + $0x30] ss:$8 sps:$4 sm:$0xff]  }
   0x7   :  { %394 = vmatpush3.bf16.msra.mxu0 %v456_v3  ;;  %446 = vmatpush3.bf16.msra.mxu1 %v456_v3  ;;  %v466_v15 = vld [vmem:[%s615_s1 + $0x8] sm:$0xff]   ;;  %v468_v17 = vld [vmem:[%s615_s1] sm:$0xff]   ;;  %v475_v20 = vld [vmem:[%s616_s0 + $0x14] ss:$8 sps:$4 sm:$0xff]  }
   0x8   :  { %395 = vmatprep.subr.bf16.mxu0 %v457_v4  ;;  %439 = vmatprep.subr.bf16.mxu1 %v457_v4  ;;  %v478_v21 = vld [vmem:[%s616_s0 + $0x44] ss:$8 sps:$4 sm:$0xff]   ;;  %v477_v22 = vld [vmem:[%s616_s0 + $0x10] ss:$8 sps:$4 sm:$0xff]   ;;  %v480_v23 = vld [vmem:[%s616_s0 + $0x40] ss:$8 sps:$4 sm:$0xff]  }
   0x9   :  { %v481_v24 = vld [vmem:[%s616_s0 + $0x24] ss:$8 sps:$4 sm:$0xff]   ;;  %v483_v25 = vld [vmem:[%s616_s0 + $0x20] ss:$8 sps:$4 sm:$0xff]  }
   0xa   :  { %v390_v29 = vld [vmem:[%s617_s2] ss:$0 sm:$0xff] }
   0xb   :  { %396 = vmatpush3.bf16.msra.mxu0 %v458_v5  ;;  %447 = vmatpush3.bf16.msra.mxu1 %v458_v5 }
   0xc   :  { %397 = vmatprep.subr.bf16.mxu0 %v459_v6  ;;  %440 = vmatprep.subr.bf16.mxu1 %v459_v6 }
   0xf   :  { %398 = vmatpush3.bf16.msra.mxu0 %v460_v7  ;;  %448 = vmatpush3.bf16.msra.mxu1 %v460_v7 }
  0x10   :  { %399 = vmatprep.subr.bf16.mxu0 %v461_v8  ;;  %441 = vmatprep.subr.bf16.mxu1 %v461_v8 }
  0x13   :  { %400 = vmatpush3.bf16.msra.mxu0 %v462_v9  ;;  %449 = vmatpush3.bf16.msra.mxu1 %v462_v9 }
  0x14   :  { %401 = vmatprep.subr.bf16.mxu0 %v463_v10  ;;  %442 = vmatprep.subr.bf16.mxu1 %v463_v10 }
  0x17   :  { %402 = vmatpush3.bf16.msra.mxu0 %v464_v13  ;;  %450 = vmatpush3.bf16.msra.mxu1 %v464_v13 }
  0x18   :  { %403 = vmatprep.subr.bf16.mxu0 %v465_v14  ;;  %443 = vmatprep.subr.bf16.mxu1 %v465_v14 }
  0x1b   :  { %404 = vmatpush3.bf16.msra.mxu0 %v466_v15  ;;  %451 = vmatpush3.bf16.msra.mxu1 %v466_v15 }
  0x1c   :  { %405 = vmatprep.subr.bf16.mxu0 %v467_v16  ;;  %444 = vmatprep.subr.bf16.mxu1 %v467_v16 }
  0x1f   :  { %406 = vmatpush3.bf16.msra.mxu0 %v468_v17  ;;  %452 = vmatpush3.bf16.msra.mxu1 %v468_v17 }
  0x22   :  { %260 = vmatmul.mubr.bf16.vlgmr.msra.gmra.mxu0 %v469_v18  ;;  %284 = vmatmul.mubr.bf16.vlgmr.msra.gmra.mxu1 %v472_v19 }
  0x23   :  { %267 = vmatprep.mubr.bf16.mxu0 %v475_v20  ;;  %291 = vmatprep.mubr.bf16.mxu1 %v478_v21 }
  0x2a   :  { %268 = vmatmul.mubr.bf16.gmra.mxu0 %v477_v22  ;;  %292 = vmatmul.mubr.bf16.gmra.mxu1 %v480_v23 }
  0x2b   :  { %275 = vmatprep.mubr.bf16.mxu0 %v481_v24 }
  0x32   :  { %276 = vmatmul.mubr.bf16.gmra.mxu0 %v483_v25 }
  0xe2   :  { %v407_v26 = vpop.f32.mrf.mxu0  ;;  %v425_v27 = vpop.f32.mrf.mxu1 }
  0xe4   :  { %v408_v28 = vpop.f32.mrf.mxu0  ;;  %v426_v30 = vpop.f32.mrf.mxu1 }
  0xe5   :  { %v409_v31 = vadd.f32 %v408_v28, %v407_v26  ;;  %v427_v32 = vadd.f32 %v426_v30, %v425_v27 }
  0xe6   :  { %v410_v33 = vpop.f32.mrf.mxu0  ;;  %v428_v34 = vpop.f32.mrf.mxu1 }
  0xe7   :  { %v340_v35 = vadd.f32 %v409_v31, %v390_v29  ;;  %v346_v36 = vadd.f32 %v427_v32, %v390_v29 }
  0xe8   :  { %v411_v37 = vpop.f32.mrf.mxu0  ;;  %v429_v38 = vpop.f32.mrf.mxu1 }
  0xe9   :  { %350 = vst [vmem:[%s618_s3] sm:$0xff] %v340_v35  ;;  %356 = vst [vmem:[%s618_s3 + $0x30] sm:$0xff] %v346_v36  ;;  %v412_v39 = vadd.f32 %v411_v37, %v410_v33  ;;  %v430_v40 = vadd.f32 %v429_v38, %v428_v34 }
  0xea   :  { %v413_v41 = vpop.f32.mrf.mxu0  ;;  %v431_v42 = vpop.f32.mrf.mxu1 }
  0xeb   :  { %v341_v43 = vadd.f32 %v412_v39, %v390_v29  ;;  %v347_v44 = vadd.f32 %v430_v40, %v390_v29 }
  0xec   :  { %v414_v45 = vpop.f32.mrf.mxu0  ;;  %v432_v46 = vpop.f32.mrf.mxu1 }
  0xed   :  { %351 = vst [vmem:[%s618_s3 + $0x8] sm:$0xff] %v341_v43  ;;  %357 = vst [vmem:[%s618_s3 + $0x38] sm:$0xff] %v347_v44  ;;  %v415_v47 = vadd.f32 %v414_v45, %v413_v41  ;;  %v433_v48 = vadd.f32 %v432_v46, %v431_v42 }
  0xee   :  { %v416_v49 = vpop.f32.mrf.mxu0  ;;  %v434_v50 = vpop.f32.mrf.mxu1 }
  0xef   :  { %v342_v51 = vadd.f32 %v415_v47, %v390_v29  ;;  %v348_v52 = vadd.f32 %v433_v48, %v390_v29 }
  0xf0   :  { %v417_v53 = vpop.f32.mrf.mxu0  ;;  %v435_v54 = vpop.f32.mrf.mxu1 }
  0xf1   :  { %352 = vst [vmem:[%s618_s3 + $0x10] sm:$0xff] %v342_v51  ;;  %358 = vst [vmem:[%s618_s3 + $0x40] sm:$0xff] %v348_v52  ;;  %v418_v55 = vadd.f32 %v417_v53, %v416_v49  ;;  %v436_v56 = vadd.f32 %v435_v54, %v434_v50 }
  0xf2   :  { %v419_v57 = vpop.f32.mrf.mxu0 }
  0xf3   :  { %v343_v58 = vadd.f32 %v418_v55, %v390_v29  ;;  %v349_v59 = vadd.f32 %v436_v56, %v390_v29 }
  0xf4   :  { %v420_v60 = vpop.f32.mrf.mxu0 }
  0xf5   :  { %353 = vst [vmem:[%s618_s3 + $0x18] sm:$0xff] %v343_v58  ;;  %359 = vst [vmem:[%s618_s3 + $0x48] sm:$0xff] %v349_v59  ;;  %v421_v61 = vadd.f32 %v420_v60, %v419_v57 }
  0xf6   :  { %v422_v62 = vpop.f32.mrf.mxu0 }
  0xf7   :  { %v344_v63 = vadd.f32 %v421_v61, %v390_v29 }
  0xf8   :  { %v423_v0 = vpop.f32.mrf.mxu0 }
  0xf9   :  { %354 = vst [vmem:[%s618_s3 + $0x20] sm:$0xff] %v344_v63  ;;  %v424_v1 = vadd.f32 %v423_v0, %v422_v62 }
  0xfb   :  { %v345_v2 = vadd.f32 %v424_v1, %v390_v29 }
  0xfd   :  { %355 = vst [vmem:[%s618_s3 + $0x28] sm:$0xff] %v345_v2 }

// kernel: hubert_forward.22
= control target key start
LH: loop header
LB: loop body
LE: loop exit
PB: predicated region body
PF: predicated region fallthrough
CT: control target
= control target key end

     0   :  { %vm19_vm0 = vcmask 523264   ;;  %s257_s0 = inlined_call_operand.vmem [shape: f32[40,64], index: 0, kind: input, shape index: {}]   ;;  %s258_s1 = inlined_call_operand.vmem [shape: f32[1,64], index: 1, kind: input, shape index: {}]   ;;  %s259_s2 = inlined_call_operand.vmem [shape: f32[1,64], index: 2, kind: input, shape index: {}]   ;;  %s260_s3 = inlined_call_operand.vmem [shape: f32[40,64], index: 3, kind: output, shape index: {}]  }
   0x1   :  { %v14_v0 = vld [vmem:[%s257_s0] sm:$0xff]  ;;  %v16_v1 = vld [vmem:[%s257_s0 + $0x10] sm:$0xff]  ;;  %v15_v2 = vld [vmem:[%s257_s0 + $0x8] sm:$0xff] }
   0x2   :  { %v20_v3 = vsel %vm19_vm0, %v14_v0, 0.0  ;;  %v26_v4 = vsel %vm19_vm0, %v16_v1, 0.0  ;;  %v17_v5 = vld [vmem:[%s257_s0 + $0x18] sm:$0xff]  ;;  %v23_v6 = vsel %vm19_vm0, %v15_v2, 0.0  ;;  %v18_v8 = vld [vmem:[%s257_s0 + $0x20] sm:$0xff] }
   0x3   :  { %21 = vadd.xlane.f32.xlu0 %v20_v3  ;;  %27 = vadd.xlane.f32.xlu1 %v26_v4  ;;  %v29_v7 = vsel %vm19_vm0, %v17_v5, 0.0  ;;  %v32_v9 = vsel %vm19_vm0, %v18_v8, 0.0  ;;  %v164_v51 = vld [vmem:[%s258_s1] ss:$0 sm:$0xff] }
   0x4   :  { %v165_v53 = vld [vmem:[%s259_s2] ss:$0 sm:$0xff] }
   0x7   :  { %24 = vadd.xlane.f32.xlu0 %v23_v6  ;;  %30 = vadd.xlane.f32.xlu1 %v29_v7 }
   0xb   :  { %33 = vadd.xlane.f32.xlu0 %v32_v9 }
  0x8c   :  { %v22_v10 = vpop.xlane.xlu0 %21  ;;  %v28_v11 = vpop.xlane.xlu1 %27 }
  0x8d   :  { %v36_v12 = vmul.f32 0.015625, %v22_v10  ;;  %v38_v13 = vmul.f32 0.015625, %v28_v11 }
  0x8f   :  { %v41_v14 = vsub.f32 %v14_v0, %v36_v12  ;;  %v43_v15 = vsub.f32 %v16_v1, %v38_v13 }
  0x90   :  { %v25_v16 = vpop.xlane.xlu0 %24  ;;  %v31_v17 = vpop.xlane.xlu1 %30 }
  0x91   :  { %v37_v18 = vmul.f32 0.015625, %v25_v16  ;;  %v39_v19 = vmul.f32 0.015625, %v31_v17  ;;  %v46_v20 = vmul.f32 %v41_v14, %v41_v14  ;;  %v48_v21 = vmul.f32 %v43_v15, %v43_v15 }
  0x93   :  { %v42_v22 = vsub.f32 %v15_v2, %v37_v18  ;;  %v44_v23 = vsub.f32 %v17_v5, %v39_v19  ;;  %v51_v24 = vsel %vm19_vm0, %v46_v20, 0.0  ;;  %v57_v27 = vsel %vm19_vm0, %v48_v21, 0.0 }
  0x94   :  { %52 = vadd.xlane.f32.xlu1 %v51_v24  ;;  %v34_v25 = vpop.xlane.xlu0 %33 }
  0x95   :  { %v40_v26 = vmul.f32 0.015625, %v34_v25  ;;  %v47_v28 = vmul.f32 %v42_v22, %v42_v22  ;;  %v49_v29 = vmul.f32 %v44_v23, %v44_v23 }
  0x97   :  { %v45_v30 = vsub.f32 %v18_v8, %v40_v26  ;;  %v54_v31 = vsel %vm19_vm0, %v47_v28, 0.0  ;;  %v60_v32 = vsel %vm19_vm0, %v49_v29, 0.0 }
  0x98   :  { %58 = vadd.xlane.f32.xlu1 %v57_v27  ;;  %55 = vadd.xlane.f32.xlu0 %v54_v31 }
  0x99   :  { %v50_v33 = vmul.f32 %v45_v30, %v45_v30 }
  0x9b   :  { %v63_v34 = vsel %vm19_vm0, %v50_v33, 0.0 }
  0x9c   :  { %61 = vadd.xlane.f32.xlu0 %v60_v32  ;;  %64 = vadd.xlane.f32.xlu1 %v63_v34 }
 0x11d   :  { %v53_v35 = vpop.xlane.xlu1 %52 }
 0x11e   :  { %v66_v36 = vmul.f32 0.015625, %v53_v35 }
 0x120   :  { %v71_v37 = vadd.f32 1e-05, %v66_v36 }
 0x121   :  { %v59_v38 = vpop.xlane.xlu1 %58  ;;  %v56_v39 = vpop.xlane.xlu0 %55 }
 0x122   :  { %166 = vrsqrt.f32 %v71_v37  ;;  %v68_v40 = vmul.f32 0.015625, %v59_v38  ;;  %v67_v41 = vmul.f32 0.015625, %v56_v39 }
 0x124   :  { %v73_v42 = vadd.f32 1e-05, %v68_v40  ;;  %v72_v43 = vadd.f32 1e-05, %v67_v41 }
 0x125   :  { %v65_v44 = vpop.xlane.xlu1 %64  ;;  %v62_v45 = vpop.xlane.xlu0 %61 }
 0x126   :  { %168 = vrsqrt.f32 %v73_v42  ;;  %v70_v46 = vmul.f32 0.015625, %v65_v44  ;;  %v69_v47 = vmul.f32 0.015625, %v62_v45 }
 0x127   :  { %170 = vrsqrt.f32 %v72_v43 }
 0x128   :  { %v75_v48 = vadd.f32 1e-05, %v70_v46  ;;  %v74_v49 = vadd.f32 1e-05, %v69_v47 }
 0x12a   :  { %172 = vrsqrt.f32 %v75_v48 }
 0x12b   :  { %174 = vrsqrt.f32 %v74_v49 }
 0x12f   :  { %v167_v50 = vpop.eup %166 }
 0x130   :  { %v81_v52 = vmul.f32 %v167_v50, %v41_v14 }
 0x132   :  { %v93_v54 = vmul.f32 %v164_v51, %v81_v52 }
 0x133   :  { %v169_v55 = vpop.eup %168 }
 0x134   :  { %v171_v56 = vpop.eup %170  ;;  %v105_v57 = vadd.f32 %v165_v53, %v93_v54  ;;  %v83_v58 = vmul.f32 %v169_v55, %v43_v15 }
 0x135   :  { %v82_v59 = vmul.f32 %v171_v56, %v42_v22 }
 0x136   :  { %v115_v60 = vmul.f32 0.044715, %v105_v57  ;;  %v95_v61 = vmul.f32 %v164_v51, %v83_v58  ;;  %v110_v34 = vmul.f32 0.5, %v105_v57 }
 0x137   :  { %v173_v62 = vpop.eup %172  ;;  %v94_v63 = vmul.f32 %v164_v51, %v82_v59 }
 0x138   :  { %v175_v0 = vpop.eup %174  ;;  %v120_v1 = vmul.f32 %v115_v60, %v105_v57  ;;  %v107_v2 = vadd.f32 %v165_v53, %v95_v61  ;;  %v85_v3 = vmul.f32 %v173_v62, %v45_v30 }
 0x139   :  { %v106_v4 = vadd.f32 %v165_v53, %v94_v63  ;;  %v84_v5 = vmul.f32 %v175_v0, %v44_v23 }
 0x13a   :  { %v125_v6 = vmul.f32 %v120_v1, %v105_v57  ;;  %v117_v7 = vmul.f32 0.044715, %v107_v2  ;;  %v97_v8 = vmul.f32 %v164_v51, %v85_v3  ;;  %v112_v39 = vmul.f32 0.5, %v107_v2 }
 0x13b   :  { %v116_v9 = vmul.f32 0.044715, %v106_v4  ;;  %v96_v10 = vmul.f32 %v164_v51, %v84_v5  ;;  %v111_v41 = vmul.f32 0.5, %v106_v4 }
 0x13c   :  { %v130_v11 = vadd.f32 %v125_v6, %v105_v57  ;;  %v122_v12 = vmul.f32 %v117_v7, %v107_v2  ;;  %v109_v13 = vadd.f32 %v165_v53, %v97_v8 }
 0x13d   :  { %v121_v14 = vmul.f32 %v116_v9, %v106_v4  ;;  %v108_v15 = vadd.f32 %v165_v53, %v96_v10 }
 0x13e   :  { %v135_v16 = vmul.f32 0.7978846, %v130_v11  ;;  %v127_v17 = vmul.f32 %v122_v12, %v107_v2  ;;  %v119_v18 = vmul.f32 0.044715, %v109_v13  ;;  %v114_v47 = vmul.f32 0.5, %v109_v13 }
 0x13f   :  { %v126_v19 = vmul.f32 %v121_v14, %v106_v4  ;;  %v118_v20 = vmul.f32 0.044715, %v108_v15  ;;  %v113_v49 = vmul.f32 0.5, %v108_v15 }
 0x140   :  { %176 = vtanh.f32 %v135_v16  ;;  %v132_v21 = vadd.f32 %v127_v17, %v107_v2  ;;  %v124_v22 = vmul.f32 %v119_v18, %v109_v13 }
 0x141   :  { %v131_v24 = vadd.f32 %v126_v19, %v106_v4  ;;  %v123_v23 = vmul.f32 %v118_v20, %v108_v15 }
 0x142   :  { %v137_v25 = vmul.f32 0.7978846, %v132_v21  ;;  %v129_v26 = vmul.f32 %v124_v22, %v109_v13 }
 0x143   :  { %v136_v27 = vmul.f32 0.7978846, %v131_v24  ;;  %v128_v28 = vmul.f32 %v123_v23, %v108_v15 }
 0x144   :  { %178 = vtanh.f32 %v137_v25  ;;  %v134_v29 = vadd.f32 %v129_v26, %v109_v13 }
 0x145   :  { %180 = vtanh.f32 %v136_v27  ;;  %v133_v30 = vadd.f32 %v128_v28, %v108_v15 }
 0x146   :  { %v139_v31 = vmul.f32 0.7978846, %v134_v29 }
 0x147   :  { %v138_v32 = vmul.f32 0.7978846, %v133_v30 }
 0x148   :  { %182 = vtanh.f32 %v139_v31 }
 0x149   :  { %184 = vtanh.f32 %v138_v32 }
 0x14d   :  { %v177_v33 = vpop.eup %176 }
 0x14e   :  { %v145_v35 = vadd.f32 1.0, %v177_v33 }
 0x150   :  { %v150_v36 = vmul.f32 %v145_v35, %v110_v34 }
 0x151   :  { %v179_v37 = vpop.eup %178 }
 0x152   :  { %v181_v38 = vpop.eup %180  ;;  %155 = vst.msk [vmem:[%s260_s3] sm:$0xff] %vm19_vm0, %v150_v36  ;;  %v147_v40 = vadd.f32 1.0, %v179_v37 }
 0x153   :  { %v146_v42 = vadd.f32 1.0, %v181_v38 }
 0x154   :  { %v152_v43 = vmul.f32 %v147_v40, %v112_v39 }
 0x155   :  { %v183_v44 = vpop.eup %182  ;;  %v151_v45 = vmul.f32 %v146_v42, %v111_v41 }
 0x156   :  { %v185_v46 = vpop.eup %184  ;;  %157 = vst.msk [vmem:[%s260_s3 + $0x10] sm:$0xff] %vm19_vm0, %v152_v43  ;;  %v149_v48 = vadd.f32 1.0, %v183_v44 }
 0x157   :  { %156 = vst.msk [vmem:[%s260_s3 + $0x8] sm:$0xff] %vm19_vm0, %v151_v45  ;;  %v148_v50 = vadd.f32 1.0, %v185_v46 }
 0x158   :  { %v154_v51 = vmul.f32 %v149_v48, %v114_v47 }
 0x159   :  { %v153_v52 = vmul.f32 %v148_v50, %v113_v49 }
 0x15a   :  { %159 = vst.msk [vmem:[%s260_s3 + $0x20] sm:$0xff] %vm19_vm0, %v154_v51 }
 0x15b   :  { %158 = vst.msk [vmem:[%s260_s3 + $0x18] sm:$0xff] %vm19_vm0, %v153_v52 }

// kernel: hubert_forward.21
= control target key start
LH: loop header
LB: loop body
LE: loop exit
PB: predicated region body
PF: predicated region fallthrough
CT: control target
= control target key end

     0   :  { %s482_s1 = inlined_call_operand.vmem [shape: bf16[256,128], index: 1, kind: input, shape index: {}]   ;;  %s483_s0 = inlined_call_operand.vmem [shape: bf16[40,256], index: 0, kind: input, shape index: {}]   ;;  %s484_s2 = inlined_call_operand.vmem [shape: f32[1,128], index: 2, kind: input, shape index: {}]   ;;  %s485_s3 = inlined_call_operand.vmem [shape: f32[40,128], index: 3, kind: output, shape index: {}]  }
   0x1   :  { %v357_v0 = vld [vmem:[%s482_s1 + $0x78] sm:$0xff]   ;;  %v359_v2 = vld [vmem:[%s482_s1 + $0x70] sm:$0xff]   ;;  %v361_v4 = vld [vmem:[%s482_s1 + $0x68] sm:$0xff]  }
   0x2   :  { %v358_v1 = vld [vmem:[%s482_s1 + $0x38] sm:$0xff]   ;;  %307 = vmatprep.subr.bf16.mxu0 %v357_v0  ;;  %341 = vmatprep.subr.bf16.mxu1 %v357_v0  ;;  %v360_v3 = vld [vmem:[%s482_s1 + $0x30] sm:$0xff]   ;;  %v362_v5 = vld [vmem:[%s482_s1 + $0x28] sm:$0xff]  }
   0x3   :  { %308 = vmatpush3.bf16.msra.mxu0 %v358_v1  ;;  %349 = vmatpush3.bf16.msra.mxu1 %v358_v1  ;;  %v363_v6 = vld [vmem:[%s482_s1 + $0x60] sm:$0xff]   ;;  %v365_v8 = vld [vmem:[%s482_s1 + $0x58] sm:$0xff]   ;;  %v367_v10 = vld [vmem:[%s482_s1 + $0x50] sm:$0xff]  }
   0x4   :  { %309 = vmatprep.subr.bf16.mxu0 %v359_v2  ;;  %342 = vmatprep.subr.bf16.mxu1 %v359_v2  ;;  %v364_v7 = vld [vmem:[%s482_s1 + $0x20] sm:$0xff]   ;;  %v366_v9 = vld [vmem:[%s482_s1 + $0x18] sm:$0xff]   ;;  %v368_v13 = vld [vmem:[%s482_s1 + $0x10] sm:$0xff]  }
   0x5   :  { %v375_v11 = vld [vmem:[%s483_s0 + $0x4] ss:$8 sps:$4 sm:$0xff]   ;;  %v378_v12 = vld [vmem:[%s483_s0 + $0x14] ss:$8 sps:$4 sm:$0xff]   ;;  %v373_v19 = vld [vmem:[%s483_s0] ss:$8 sps:$4 sm:$0xff]  }
   0x6   :  { %v369_v14 = vld [vmem:[%s482_s1 + $0x48] sm:$0xff]   ;;  %221 = vmatprep.mubr.bf16.mxu0 %v375_v11  ;;  %229 = vmatprep.mubr.bf16.mxu1 %v378_v12  ;;  %v371_v16 = vld [vmem:[%s482_s1 + $0x40] sm:$0xff]   ;;  %v376_v20 = vld [vmem:[%s483_s0 + $0x10] ss:$8 sps:$4 sm:$0xff]  }
   0x7   :  { %310 = vmatpush3.bf16.msra.mxu0 %v360_v3  ;;  %350 = vmatpush3.bf16.msra.mxu1 %v360_v3  ;;  %v370_v15 = vld [vmem:[%s482_s1 + $0x8] sm:$0xff]   ;;  %v372_v17 = vld [vmem:[%s482_s1] sm:$0xff]  }
   0x8   :  { %311 = vmatprep.subr.bf16.mxu0 %v361_v4  ;;  %343 = vmatprep.subr.bf16.mxu1 %v361_v4  ;;  %v33_v18 = vld [vmem:[%s483_s0 + $0x20] sm:$0xff] }
   0x9   :  { %v289_v21 = vcombine.high %v33_v18, %v33_v18  ;;  %v288_v22 = vcombine.low %v33_v18, %v33_v18  ;;  %v306_v26 = vld [vmem:[%s484_s2] ss:$0 sm:$0xff] }
   0xb   :  { %312 = vmatpush3.bf16.msra.mxu0 %v362_v5  ;;  %351 = vmatpush3.bf16.msra.mxu1 %v362_v5 }
   0xc   :  { %313 = vmatprep.subr.bf16.mxu0 %v363_v6  ;;  %344 = vmatprep.subr.bf16.mxu1 %v363_v6 }
   0xf   :  { %314 = vmatpush3.bf16.msra.mxu0 %v364_v7  ;;  %352 = vmatpush3.bf16.msra.mxu1 %v364_v7 }
  0x10   :  { %315 = vmatprep.subr.bf16.mxu0 %v365_v8  ;;  %345 = vmatprep.subr.bf16.mxu1 %v365_v8 }
  0x13   :  { %316 = vmatpush3.bf16.msra.mxu0 %v366_v9  ;;  %353 = vmatpush3.bf16.msra.mxu1 %v366_v9 }
  0x14   :  { %317 = vmatprep.subr.bf16.mxu0 %v367_v10  ;;  %346 = vmatprep.subr.bf16.mxu1 %v367_v10 }
  0x17   :  { %318 = vmatpush3.bf16.msra.mxu0 %v368_v13  ;;  %354 = vmatpush3.bf16.msra.mxu1 %v368_v13 }
  0x18   :  { %319 = vmatprep.subr.bf16.mxu0 %v369_v14  ;;  %347 = vmatprep.subr.bf16.mxu1 %v369_v14 }
  0x1b   :  { %320 = vmatpush3.bf16.msra.mxu0 %v370_v15  ;;  %355 = vmatpush3.bf16.msra.mxu1 %v370_v15 }
  0x1c   :  { %321 = vmatprep.subr.bf16.mxu0 %v371_v16  ;;  %348 = vmatprep.subr.bf16.mxu1 %v371_v16 }
  0x1f   :  { %322 = vmatpush3.bf16.msra.mxu0 %v372_v17  ;;  %356 = vmatpush3.bf16.msra.mxu1 %v372_v17 }
  0x22   :  { %222 = vmatmul.mubr.bf16.vlgmr.msra.gmra.mxu0 %v373_v19  ;;  %230 = vmatmul.mubr.bf16.vlgmr.msra.gmra.mxu1 %v376_v20 }
  0x23   :  { %237 = vmatprep.mubr.bf16.mxu1 %v289_v21 }
  0x2a   :  { %238 = vmatmul.mubr.bf16.gmra.mxu1 %v288_v22 }
  0xe2   :  { %v323_v23 = vpop.f32.mrf.mxu0  ;;  %v329_v24 = vpop.f32.mrf.mxu1 }
  0xe4   :  { %v324_v25 = vpop.f32.mrf.mxu0  ;;  %v330_v27 = vpop.f32.mrf.mxu1 }
  0xe5   :  { %v325_v28 = vadd.f32 %v324_v25, %v323_v23  ;;  %v331_v29 = vadd.f32 %v330_v27, %v329_v24 }
  0xe6   :  { %v326_v30 = vpop.f32.mrf.mxu0  ;;  %v332_v31 = vpop.f32.mrf.mxu1 }
  0xe7   :  { %v270_v32 = vadd.f32 %v325_v28, %v306_v26  ;;  %v272_v33 = vadd.f32 %v331_v29, %v306_v26 }
  0xe8   :  { %v327_v34 = vpop.f32.mrf.mxu0  ;;  %v333_v35 = vpop.f32.mrf.mxu1 }
  0xe9   :  { %275 = vst [vmem:[%s485_s3] sm:$0xff] %v270_v32  ;;  %277 = vst [vmem:[%s485_s3 + $0x10] sm:$0xff] %v272_v33  ;;  %v328_v36 = vadd.f32 %v327_v34, %v326_v30  ;;  %v334_v37 = vadd.f32 %v333_v35, %v332_v31 }
  0xea   :  { %v335_v38 = vpop.f32.mrf.mxu1 }
  0xeb   :  { %v271_v39 = vadd.f32 %v328_v36, %v306_v26  ;;  %v273_v40 = vadd.f32 %v334_v37, %v306_v26 }
  0xec   :  { %v336_v41 = vpop.f32.mrf.mxu1 }
  0xed   :  { %276 = vst [vmem:[%s485_s3 + $0x8] sm:$0xff] %v271_v39  ;;  %278 = vst [vmem:[%s485_s3 + $0x18] sm:$0xff] %v273_v40  ;;  %v337_v42 = vadd.f32 %v336_v41, %v335_v38 }
  0xee   :  { %v338_v43 = vpop.f32.mrf.mxu1 }
  0xef   :  { %v274_v44 = vadd.f32 %v337_v42, %v306_v26 }
  0xf0   :  { %v339_v45 = vpop.f32.mrf.mxu1 }
  0xf1   :  { %279 = vst [vmem:[%s485_s3 + $0x20] sm:$0xff] %v274_v44 }

// kernel: hubert_forward.23
= control target key start
LH: loop header
LB: loop body
LE: loop exit
PB: predicated region body
PF: predicated region fallthrough
CT: control target
= control target key end

     0   :  { %vm26_vm0 = vcmask 523264   ;;  %v294_v35 = vmov 0.0   ;;  %vm295_vm1 = vmmov 0   ;;  %s429_s0 = inlined_call_operand.vmem [shape: f32[40,64], index: 0, kind: input, shape index: {}]   ;;  %s430_s3 = inlined_call_operand.vmem [shape: bf16[64,128], index: 3, kind: input, shape index: {}]   ;;  %s431_s1 = inlined_call_operand.vmem [shape: f32[1,64], index: 1, kind: input, shape index: {}]   ;;  %s432_s2 = inlined_call_operand.vmem [shape: f32[1,64], index: 2, kind: input, shape index: {}]   ;;  %s433_s4 = inlined_call_operand.vmem [shape: f32[1,128], index: 4, kind: input, shape index: {}]   ;;  %s434_s5 = inlined_call_operand.vmem [shape: f32[40,128], index: 5, kind: output, shape index: {}]  }
   0x1   :  { %v23_v0 = vld [vmem:[%s429_s0 + $0x10] sm:$0xff]  ;;  %v24_v1 = vld [vmem:[%s429_s0 + $0x18] sm:$0xff]  ;;  %v21_v2 = vld [vmem:[%s429_s0] sm:$0xff]  ;;  %270 = vmatprep.subr.bf16.mxu1 %v294_v35  ;;  %250 = vmatprep.subr.bf16.mxu0 %v294_v35 }
   0x2   :  { %v33_v3 = vsel %vm26_vm0, %v23_v0, 0.0  ;;  %v27_v4 = vsel %vm26_vm0, %v21_v2, 0.0  ;;  %v22_v5 = vld [vmem:[%s429_s0 + $0x8] sm:$0xff]  ;;  %v36_v6 = vsel %vm26_vm0, %v24_v1, 0.0  ;;  %v25_v8 = vld [vmem:[%s429_s0 + $0x20] sm:$0xff]  ;;  %v280_v36 = vld [vmem:[%s430_s3 + $0x18] sm:$0xff]   ;;  %262 = vmatprep.mubr.msk.bf16.mxu1 %vm295_vm1, %v294_v35  ;;  %258 = vmatprep.mubr.msk.bf16.mxu0 %vm295_vm1, %v294_v35 }
   0x3   :  { %34 = vadd.xlane.f32.xlu0 %v33_v3  ;;  %28 = vadd.xlane.f32.xlu1 %v27_v4  ;;  %v30_v7 = vsel %vm26_vm0, %v22_v5, 0.0  ;;  %v39_v9 = vsel %vm26_vm0, %v25_v8, 0.0  ;;  %v281_v37 = vld [vmem:[%s430_s3 + $0x10] sm:$0xff]   ;;  %v282_v38 = vld [vmem:[%s430_s3 + $0x8] sm:$0xff]   ;;  %v283_v39 = vld [vmem:[%s430_s3] sm:$0xff]  }
   0x4   :  { %274 = vmatpush3.bf16.msra.mxu1 %v280_v36  ;;  %251 = vmatpush3.bf16.msra.mxu0 %v280_v36  ;;  %v233_v57 = vld [vmem:[%s431_s1] ss:$0 sm:$0xff] }
   0x5   :  { %271 = vmatprep.subr.bf16.mxu1 %v294_v35  ;;  %252 = vmatprep.subr.bf16.mxu0 %v294_v35  ;;  %v234_v62 = vld [vmem:[%s432_s2] ss:$0 sm:$0xff] }
   0x7   :  { %37 = vadd.xlane.f32.xlu0 %v36_v6  ;;  %31 = vadd.xlane.f32.xlu1 %v30_v7 }
   0x8   :  { %275 = vmatpush3.bf16.msra.mxu1 %v281_v37  ;;  %253 = vmatpush3.bf16.msra.mxu0 %v281_v37 }
   0x9   :  { %272 = vmatprep.subr.bf16.mxu1 %v294_v35  ;;  %254 = vmatprep.subr.bf16.mxu0 %v294_v35 }
   0xb   :  { %40 = vadd.xlane.f32.xlu0 %v39_v9 }
   0xc   :  { %276 = vmatpush3.bf16.msra.mxu1 %v282_v38  ;;  %255 = vmatpush3.bf16.msra.mxu0 %v282_v38 }
   0xd   :  { %273 = vmatprep.subr.bf16.mxu1 %v294_v35  ;;  %256 = vmatprep.subr.bf16.mxu0 %v294_v35 }
  0x10   :  { %277 = vmatpush3.bf16.msra.mxu1 %v283_v39  ;;  %257 = vmatpush3.bf16.msra.mxu0 %v283_v39 }
  0x8c   :  { %v35_v10 = vpop.xlane.xlu0 %34  ;;  %v29_v11 = vpop.xlane.xlu1 %28 }
  0x8d   :  { %v45_v12 = vmul.f32 0.015625, %v35_v10  ;;  %v43_v13 = vmul.f32 0.015625, %v29_v11 }
  0x8f   :  { %v346_v14 = vsub.f32 %v23_v0, %v45_v12  ;;  %v348_v15 = vsub.f32 %v21_v2, %v43_v13 }
  0x90   :  { %v38_v16 = vpop.xlane.xlu0 %37  ;;  %v32_v17 = vpop.xlane.xlu1 %31 }
  0x91   :  { %v46_v18 = vmul.f32 0.015625, %v38_v16  ;;  %v55_v19 = vmul.f32 %v346_v14, %v346_v14  ;;  %v44_v20 = vmul.f32 0.015625, %v32_v17  ;;  %v53_v21 = vmul.f32 %v348_v15, %v348_v15  ;;  %v235_v16 = vld [vmem:[%s433_s4] ss:$0 sm:$0xff] }
  0x93   :  { %v354_v22 = vsub.f32 %v24_v1, %v46_v18  ;;  %v64_v23 = vsel %vm26_vm0, %v55_v19, 0.0  ;;  %v357_v24 = vsub.f32 %v22_v5, %v44_v20  ;;  %v58_v28 = vsel %vm26_vm0, %v53_v21, 0.0 }
  0x94   :  { %v41_v25 = vpop.xlane.xlu0 %40  ;;  %65 = vadd.xlane.f32.xlu1 %v64_v23 }
  0x95   :  { %v47_v26 = vmul.f32 0.015625, %v41_v25  ;;  %v56_v27 = vmul.f32 %v354_v22, %v354_v22  ;;  %v54_v29 = vmul.f32 %v357_v24, %v357_v24 }
  0x97   :  { %v364_v30 = vsub.f32 %v25_v8, %v47_v26  ;;  %v67_v31 = vsel %vm26_vm0, %v56_v27, 0.0  ;;  %v61_v33 = vsel %vm26_vm0, %v54_v29, 0.0 }
  0x98   :  { %68 = vadd.xlane.f32.xlu0 %v67_v31  ;;  %59 = vadd.xlane.f32.xlu1 %v58_v28 }
  0x99   :  { %v57_v32 = vmul.f32 %v364_v30, %v364_v30 }
  0x9b   :  { %v70_v34 = vsel %vm26_vm0, %v57_v32, 0.0 }
  0x9c   :  { %71 = vadd.xlane.f32.xlu1 %v70_v34  ;;  %62 = vadd.xlane.f32.xlu0 %v61_v33 }
 0x11d   :  { %v66_v40 = vpop.xlane.xlu1 %65 }
 0x11e   :  { %v75_v41 = vmul.f32 0.015625, %v66_v40 }
 0x120   :  { %v80_v42 = vadd.f32 0.0001, %v75_v41 }
 0x121   :  { %v69_v43 = vpop.xlane.xlu0 %68  ;;  %v60_v44 = vpop.xlane.xlu1 %59 }
 0x122   :  { %284 = vrsqrt.f32 %v80_v42  ;;  %v76_v45 = vmul.f32 0.015625, %v69_v43  ;;  %v73_v46 = vmul.f32 0.015625, %v60_v44 }
 0x124   :  { %v81_v47 = vadd.f32 0.0001, %v76_v45  ;;  %v78_v48 = vadd.f32 0.0001, %v73_v46 }
 0x125   :  { %v63_v49 = vpop.xlane.xlu0 %62  ;;  %v72_v50 = vpop.xlane.xlu1 %71 }
 0x126   :  { %286 = vrsqrt.f32 %v81_v47  ;;  %v74_v51 = vmul.f32 0.015625, %v63_v49  ;;  %v77_v52 = vmul.f32 0.015625, %v72_v50 }
 0x127   :  { %288 = vrsqrt.f32 %v78_v48 }
 0x128   :  { %v79_v53 = vadd.f32 0.0001, %v74_v51  ;;  %v82_v54 = vadd.f32 0.0001, %v77_v52 }
 0x12a   :  { %290 = vrsqrt.f32 %v79_v53 }
 0x12b   :  { %292 = vrsqrt.f32 %v82_v54 }
 0x12f   :  { %v285_v55 = vpop.eup %284 }
 0x130   :  { %v90_v56 = vmul.f32 %v285_v55, %v346_v14 }
 0x132   :  { %v102_v61 = vmul.f32 %v233_v57, %v90_v56 }
 0x133   :  { %v287_v58 = vpop.eup %286 }
 0x134   :  { %v289_v59 = vpop.eup %288  ;;  %v91_v60 = vmul.f32 %v287_v58, %v354_v22  ;;  %v114_v3 = vadd.f32 %v234_v62, %v102_v61 }
 0x135   :  { %v88_v63 = vmul.f32 %v289_v59, %v348_v15 }
 0x136   :  { %v103_v0 = vmul.f32 %v233_v57, %v91_v60 }
 0x137   :  { %v291_v1 = vpop.eup %290  ;;  %v100_v6 = vmul.f32 %v233_v57, %v88_v63 }
 0x138   :  { %v293_v2 = vpop.eup %292  ;;  %v115_v4 = vadd.f32 %v234_v62, %v103_v0  ;;  %v89_v5 = vmul.f32 %v291_v1, %v357_v24 }
 0x139   :  { %v92_v7 = vmul.f32 %v293_v2, %v364_v30  ;;  %v112_v11 = vadd.f32 %v234_v62, %v100_v6 }
 0x13a   :  { %v118_v8 = vpack.c.bf16 %v115_v4, %v114_v3  ;;  %v101_v9 = vmul.f32 %v233_v57, %v89_v5 }
 0x13b   :  { %v104_v10 = vmul.f32 %v233_v57, %v92_v7 }
 0x13c   :  { %263 = vmatmul.mubr.msk.bf16.vlgmr.msra.gmra.mxu1 %vm26_vm0, %v118_v8  ;;  %v113_v12 = vadd.f32 %v234_v62, %v101_v9 }
 0x13d   :  { %266 = vmatprep.mubr.msk.bf16.mxu1 %vm295_vm1, %v294_v35  ;;  %v116_v14 = vadd.f32 %v234_v62, %v104_v10 }
 0x13e   :  { %v117_v13 = vpack.c.bf16 %v113_v12, %v112_v11 }
 0x13f   :  { %v119_v15 = vpack.c.bf16 %v116_v14, %v116_v14 }
 0x140   :  { %259 = vmatmul.mubr.msk.bf16.vlgmr.msra.gmra.mxu0 %vm26_vm0, %v117_v13 }
 0x144   :  { %267 = vmatmul.mubr.msk.bf16.gmra.mxu1 %vm26_vm0, %v119_v15 }
 0x1fc   :  { %v210_v17 = vpop.f32.mrf.mxu1 }
 0x1fd   :  { %v211_v18 = vadd.f32 %v235_v16, %v210_v17 }
 0x1fe   :  { %v264_v19 = vpop.f32.mrf.mxu1 }
 0x1ff   :  { %226 = vst [vmem:[%s434_s5 + $0x10] sm:$0xff] %v211_v18 }
 0x200   :  { %v202_v20 = vpop.f32.mrf.mxu0  ;;  %v213_v21 = vpop.f32.mrf.mxu1 }
 0x201   :  { %v203_v22 = vadd.f32 %v235_v16, %v202_v20  ;;  %v214_v23 = vadd.f32 %v235_v16, %v213_v21 }
 0x202   :  { %v260_v24 = vpop.f32.mrf.mxu0  ;;  %v265_v25 = vpop.f32.mrf.mxu1 }
 0x203   :  { %224 = vst [vmem:[%s434_s5] sm:$0xff] %v203_v22  ;;  %227 = vst [vmem:[%s434_s5 + $0x18] sm:$0xff] %v214_v23 }
 0x204   :  { %v205_v26 = vpop.f32.mrf.mxu0  ;;  %v218_v27 = vpop.f32.mrf.mxu1 }
 0x205   :  { %v206_v28 = vadd.f32 %v235_v16, %v205_v26  ;;  %v219_v29 = vadd.f32 %v235_v16, %v218_v27 }
 0x206   :  { %v261_v30 = vpop.f32.mrf.mxu0  ;;  %v268_v31 = vpop.f32.mrf.mxu1 }
 0x207   :  { %225 = vst [vmem:[%s434_s5 + $0x8] sm:$0xff] %v206_v28  ;;  %228 = vst [vmem:[%s434_s5 + $0x20] sm:$0xff] %v219_v29 }
 0x208   :  { %v221_v32 = vpop.f32.mrf.mxu1 }
 0x20a   :  { %v269_v33 = vpop.f32.mrf.mxu1 }

// kernel: hubert_forward.24
= control target key start
LH: loop header
LB: loop body
LE: loop exit
PB: predicated region body
PF: predicated region fallthrough
CT: control target
= control target key end

     0   :  { %s1315_s15 = smov 0   ;;  %s1317_s16 = smov 0   ;;  %s1461_s0 = inlined_call_operand.vmem [shape: bf16[40,2048], index: 0, kind: input, shape index: {}]   ;;  %s1462_s1 = inlined_call_operand.vmem [shape: bf16[2048,128], index: 1, kind: input, shape index: {}]   ;;  %s1463_s2 = inlined_call_operand.vmem [shape: f32[1,128], index: 2, kind: input, shape index: {}]   ;;  %s1464_s3 = inlined_call_operand.vmem [shape: f32[40,128], index: 3, kind: input, shape index: {}]   ;;  %s1465_s4 = inlined_call_operand.vmem [shape: f32[40,128], index: 4, kind: output, shape index: {}]  }
   0x1   :  { %s1319_s17 = smov 0   ;;  %s1321_s18 = smov 0  }
   0x2   :  { %s1323_s19 = smov 0  }
   0x3 LB: > { %s26_s20 = sadd.s32 1, %s1283_s18  ;;  %p49_p1 = scmp.ne.s32.totalorder %s1275_s16, %s1271_s15  ;;  %s1287_s19 = sphi %s1323_s19, %s14_s19   ;;  %s1283_s18 = sphi %s1321_s18, %s1469_s18   ;;  %s1279_s17 = sphi %s1319_s17, %s1468_s17   ;;  %s1275_s16 = sphi %s1317_s16, %s1467_s16   ;;  %s1271_s15 = sphi %s1315_s15, %s1466_s15  }
   0x4   : > { %p27_p0 = scmp.ge.s32.totalorder %s26_s20, 4  ;;  %p50_p2 = scmp.eq.s32.totalorder %s1287_s19, 0 }
   0x5   : > { %s42_s22 = sadd.s32 1, %s1275_s16  ;;  %p1022_p5 = scmp.ge.s32.totalorder %s1287_s19, 4 }
   0x6   : > { %s1471_s20 = smov (%p27_p0, %s26_s20), 0  ;;  %p51_p3 = por %p50_p2, %p49_p1 }
   0x7   : > { %s38_s21 = ssub.s32 %s1283_s18, %s1471_s20  ;;  %203 = sbr.rel (%p1022_p5) target bundleno = 21 (0x15), region = 24 }
   0x8   : > { %p40_p4 = scmp.eq.s32.totalorder %s38_s21, 0 }
   0xa   : > { %s1350_s23 = scalar_select %p40_p4, %s1275_s16, %s42_s22  }
   0xc   : > { %206 = sbr.rel (!%p51_p3) target bundleno = 21 (0x15), region = 28  ;;  %s208_s24 = sand.u32 (%p51_p3), 1, %s1275_s16  }
   0xd   : > { %s1079_s25 = sshll.u32 (%p51_p3), %s1283_s18, 4  ;;  %s1148_s26 = smul.u32 (%p51_p3), 80, %s208_s24 }
   0xe   : > { %s216_s29 = scalar_lea.vmem (%p51_p3), %s1461_s0, %s1079_s25 }
   0xf   : > { %v229_v0 = vld [vmem:[%s216_s29] sm:$0xff] (%p51_p3)  ;;  %v231_v1 = vld [vmem:[%s216_s29 + $0x8] sm:$0xff] (%p51_p3)  ;;  %s210_s30 = scalar_lea.vmem (%p51_p3), [#allocation3], %s1148_s26 }
  0x10   : > { %v233_v2 = vld [vmem:[%s216_s29 + $0x40] sm:$0xff] (%p51_p3)  ;;  %v235_v3 = vld [vmem:[%s216_s29 + $0x48] sm:$0xff] (%p51_p3)  ;;  %230 = vst [vmem:[%s210_s30] sm:$0xff] (%p51_p3), %v229_v0  ;;  %232 = vst [vmem:[%s210_s30 + $0x8] sm:$0xff] (%p51_p3), %v231_v1 }
  0x11   : > { %v237_v4 = vld [vmem:[%s216_s29 + $0x80] sm:$0xff]  ;;  %v239_v5 = vld [vmem:[%s216_s29 + $0x88] sm:$0xff]  ;;  %234 = vst [vmem:[%s210_s30 + $0x10] sm:$0xff] %v233_v2  ;;  %236 = vst [vmem:[%s210_s30 + $0x18] sm:$0xff] %v235_v3 }
  0x12   : > { %238 = vst [vmem:[%s210_s30 + $0x20] sm:$0xff] %v237_v4  ;;  %240 = vst [vmem:[%s210_s30 + $0x28] sm:$0xff] %v239_v5  ;;  %v241_v6 = vld [vmem:[%s216_s29 + $0xc0] sm:$0xff]  ;;  %v243_v7 = vld [vmem:[%s216_s29 + $0xc8] sm:$0xff] }
  0x13   : > { %v245_v8 = vld [vmem:[%s216_s29 + $0x100] sm:$0xff]  ;;  %242 = vst [vmem:[%s210_s30 + $0x30] sm:$0xff] %v241_v6  ;;  %244 = vst [vmem:[%s210_s30 + $0x38] sm:$0xff] %v243_v7  ;;  %v247_v9 = vld [vmem:[%s216_s29 + $0x108] sm:$0xff] }
  0x14   : > { %246 = vst [vmem:[%s210_s30 + $0x40] sm:$0xff] %v245_v8  ;;  %248 = vst [vmem:[%s210_s30 + $0x48] sm:$0xff] %v247_v9 }
  0x15 PF: > { %p1025_p6 = scmp.ge.s32.totalorder %s1287_s19, 1  ;;  %p265_p7 = scmp.lt.s32.totalorder %s1287_s19, 5 }
  0x17   : > { %p266_p8 = pnand %p1025_p6, %p265_p7 }
  0x18   : > { %s272_s5 = sand.u32 (!%p266_p8), 1, %s1271_s15   ;;  %s1026_s6 = sshll.u32 (!%p266_p8), %s1279_s17, 6 }
  0x19   : > { %269 = sbr.rel (%p266_p8) target bundleno = 332 (0x14c), region = 55  ;;  %p322_p9 = scmp.lt.s32.totalorder (!%p266_p8), %s1026_s6, 255 }
  0x1a   : > { %s1149_s7 = smul.u32 (!%p266_p8), 80, %s272_s5  ;;  %p1028_p10 = scmp.ne.s32.totalorder (!%p266_p8), %s1279_s17, 0 }
  0x1c   : > { %s1367_s12 = scalar_lea.vmem (!%p266_p8), [#allocation3], %s1149_s7 }
  0x1e   : > { %s1473_s6 = smov (!%p322_p9, %s1026_s6), 255  ;;  %355 = sbr.rel (%p1028_p10) target bundleno = 39 (0x27), region = 63 }
  0x1f   : > { %s1027_s8 = sshll.u32 %s1473_s6, 2 }
  0x20   : > { %s1365_s11 = scalar_lea.vmem %s1462_s1, %s1027_s8 }
  0x23   : > { %v1289_v10 = vmov 0.0  }
  0x24   : > { %356 = vst [vmem:[#allocation2 + $0x8] sm:$0xff] %v1289_v10  ;;  %357 = vst [vmem:[#allocation2] sm:$0xff] %v1289_v10 }
  0x25   : > { %358 = vst [vmem:[#allocation2 + $0x20] sm:$0xff] %v1289_v10  ;;  %359 = vst [vmem:[#allocation2 + $0x10] sm:$0xff] %v1289_v10 }
  0x26   : > { %360 = vst [vmem:[#allocation2 + $0x18] sm:$0xff] %v1289_v10 }
  0x27 PF: > { %v1191_v11 = vld [vmem:[%s1365_s11 + $0x78] sm:$0xff]   ;;  %v1195_v15 = vld [vmem:[%s1365_s11 + $0x70] sm:$0xff]   ;;  %v1199_v19 = vld [vmem:[%s1365_s11 + $0x68] sm:$0xff]   ;;  %p1073_p11 = scmp.ne.s32.totalorder %s1279_s17, 3 }
  0x28   : > { %v1192_v12 = vld [vmem:[%s1365_s11 + $0xf8] sm:$0xff]   ;;  %1080 = vmatprep.subr.bf16.mxu0 %v1191_v11  ;;  %v1196_v16 = vld [vmem:[%s1365_s11 + $0xf0] sm:$0xff]   ;;  %v1200_v20 = vld [vmem:[%s1365_s11 + $0xe8] sm:$0xff]  }
  0x29   : > { %v1193_v13 = vld [vmem:[%s1365_s11 + $0x38] sm:$0xff]   ;;  %1114 = vmatprep.subr.bf16.mxu1 %v1192_v12  ;;  %v1197_v17 = vld [vmem:[%s1365_s11 + $0x30] sm:$0xff]   ;;  %v1201_v21 = vld [vmem:[%s1365_s11 + $0x28] sm:$0xff]  }
  0x2a   : > { %v1194_v14 = vld [vmem:[%s1365_s11 + $0xb8] sm:$0xff]   ;;  %1081 = vmatpush3.bf16.msra.mxu0 %v1193_v13  ;;  %v1198_v18 = vld [vmem:[%s1365_s11 + $0xb0] sm:$0xff]   ;;  %v1202_v22 = vld [vmem:[%s1365_s11 + $0xa8] sm:$0xff]  }
  0x2b   : > { %1115 = vmatpush3.bf16.msra.mxu1 %v1194_v14  ;;  %1082 = vmatprep.subr.bf16.mxu0 %v1195_v15  ;;  %v1203_v23 = vld [vmem:[%s1365_s11 + $0x60] sm:$0xff]   ;;  %v1207_v27 = vld [vmem:[%s1365_s11 + $0x58] sm:$0xff]   ;;  %v1211_v31 = vld [vmem:[%s1365_s11 + $0x50] sm:$0xff]  }
  0x2c   : > { %1116 = vmatprep.subr.bf16.mxu1 %v1196_v16  ;;  %v1204_v24 = vld [vmem:[%s1365_s11 + $0xe0] sm:$0xff]   ;;  %v1208_v28 = vld [vmem:[%s1365_s11 + $0xd8] sm:$0xff]   ;;  %v1212_v32 = vld [vmem:[%s1365_s11 + $0xd0] sm:$0xff]  }
  0x2d   : > { %v1205_v25 = vld [vmem:[%s1365_s11 + $0x20] sm:$0xff]   ;;  %v1209_v29 = vld [vmem:[%s1365_s11 + $0x18] sm:$0xff]   ;;  %v1213_v33 = vld [vmem:[%s1365_s11 + $0x10] sm:$0xff]  }
  0x2e   : > { %1083 = vmatpush3.bf16.msra.mxu0 %v1197_v17  ;;  %v1206_v26 = vld [vmem:[%s1365_s11 + $0xa0] sm:$0xff]   ;;  %v1210_v30 = vld [vmem:[%s1365_s11 + $0x98] sm:$0xff]   ;;  %v1214_v34 = vld [vmem:[%s1365_s11 + $0x90] sm:$0xff]  }
  0x2f   : > { %1117 = vmatpush3.bf16.msra.mxu1 %v1198_v18  ;;  %1084 = vmatprep.subr.bf16.mxu0 %v1199_v19  ;;  %v1215_v35 = vld [vmem:[%s1365_s11 + $0x48] sm:$0xff]   ;;  %v1219_v39 = vld [vmem:[%s1365_s11 + $0x40] sm:$0xff]  }
  0x30   : > { %1118 = vmatprep.subr.bf16.mxu1 %v1200_v20  ;;  %v1216_v36 = vld [vmem:[%s1365_s11 + $0xc8] sm:$0xff]   ;;  %v1220_v40 = vld [vmem:[%s1365_s11 + $0xc0] sm:$0xff]  }
  0x31   : > { %v1217_v37 = vld [vmem:[%s1365_s11 + $0x8] sm:$0xff]   ;;  %v1221_v41 = vld [vmem:[%s1365_s11] sm:$0xff]  }
  0x32   : > { %1085 = vmatpush3.bf16.msra.mxu0 %v1201_v21  ;;  %v1218_v38 = vld [vmem:[%s1365_s11 + $0x88] sm:$0xff]   ;;  %v1222_v42 = vld [vmem:[%s1365_s11 + $0x80] sm:$0xff]  }
  0x33   : > { %1119 = vmatpush3.bf16.msra.mxu1 %v1202_v22  ;;  %1086 = vmatprep.subr.bf16.mxu0 %v1203_v23  ;;  %v1223_v43 = vld [vmem:[%s1367_s12] ss:$16 sps:$4 sm:$0xff]   ;;  %v1225_v44 = vld [vmem:[%s1367_s12 + $0x4] ss:$16 sps:$4 sm:$0xff]   ;;  %v1226_v45 = vld [vmem:[%s1367_s12 + $0x8] ss:$16 sps:$4 sm:$0xff]  }
  0x34   : > { %1120 = vmatprep.subr.bf16.mxu1 %v1204_v24  ;;  %v1228_v46 = vld [vmem:[%s1367_s12 + $0xc] ss:$16 sps:$4 sm:$0xff]   ;;  %718 = vmatprep.mubr.bf16.mxu0 %v1225_v44  ;;  %v1229_v47 = vld [vmem:[%s1367_s12 + $0x24] ss:$16 sps:$4 sm:$0xff]   ;;  %v1233_v51 = vld [vmem:[%s1367_s12 + $0x20] ss:$16 sps:$4 sm:$0xff]  }
  0x35   : > { %774 = vmatprep.mubr.bf16.mxu1 %v1228_v46  ;;  %v1231_v48 = vld [vmem:[%s1367_s12 + $0x2c] ss:$16 sps:$4 sm:$0xff]   ;;  %v374_v49 = vld [vmem:[%s1367_s12 + $0x40] sm:$0xff]  ;;  %v1234_v52 = vld [vmem:[%s1367_s12 + $0x28] ss:$16 sps:$4 sm:$0xff]  }
  0x36   : > { %1087 = vmatpush3.bf16.msra.mxu0 %v1205_v25  ;;  %v375_v50 = vld [vmem:[%s1367_s12 + $0x48] sm:$0xff]  ;;  %v1038_v53 = vcombine.high %v374_v49, %v374_v49  ;;  %v1037_v55 = vcombine.low %v374_v49, %v374_v49  ;;  %v361_v0 = vld [vmem:[#allocation2 + $0x8] sm:$0xff] }
  0x37   : > { %1121 = vmatpush3.bf16.msra.mxu1 %v1206_v26  ;;  %1088 = vmatprep.subr.bf16.mxu0 %v1207_v27  ;;  %v1040_v54 = vcombine.high %v375_v50, %v375_v50  ;;  %v1039_v56 = vcombine.low %v375_v50, %v375_v50  ;;  %v362_v9 = vld [vmem:[#allocation2] sm:$0xff]  ;;  %v364_v27 = vld [vmem:[#allocation2 + $0x10] sm:$0xff] }
  0x38   : > { %1122 = vmatprep.subr.bf16.mxu1 %v1208_v28  ;;  %v363_v18 = vld [vmem:[#allocation2 + $0x20] sm:$0xff] }
  0x3a   : > { %1089 = vmatpush3.bf16.msra.mxu0 %v1209_v29 }
  0x3b   : > { %1123 = vmatpush3.bf16.msra.mxu1 %v1210_v30  ;;  %1090 = vmatprep.subr.bf16.mxu0 %v1211_v31 }
  0x3c   : > { %1124 = vmatprep.subr.bf16.mxu1 %v1212_v32 }
  0x3e   : > { %1091 = vmatpush3.bf16.msra.mxu0 %v1213_v33 }
  0x3f   : > { %1125 = vmatpush3.bf16.msra.mxu1 %v1214_v34  ;;  %1092 = vmatprep.subr.bf16.mxu0 %v1215_v35 }
  0x40   : > { %1126 = vmatprep.subr.bf16.mxu1 %v1216_v36  ;;  %v365_v36 = vld [vmem:[#allocation2 + $0x18] sm:$0xff] }
  0x42   : > { %1093 = vmatpush3.bf16.msra.mxu0 %v1217_v37 }
  0x43   : > { %1127 = vmatpush3.bf16.msra.mxu1 %v1218_v38  ;;  %1094 = vmatprep.subr.bf16.mxu0 %v1219_v39 }
  0x44   : > { %1128 = vmatprep.subr.bf16.mxu1 %v1220_v40 }
  0x46   : > { %1095 = vmatpush3.bf16.msra.mxu0 %v1221_v41 }
  0x47   : > { %1129 = vmatpush3.bf16.msra.mxu1 %v1222_v42 }
  0x49   : > { %719 = vmatmul.mubr.bf16.vlgmr.msra.gmra.mxu0 %v1223_v43 }
  0x4a   : > { %775 = vmatmul.mubr.bf16.vlgmr.msra.gmra.mxu1 %v1226_v45  ;;  %726 = vmatprep.mubr.bf16.mxu0 %v1229_v47 }
  0x4b   : > { %782 = vmatprep.mubr.bf16.mxu1 %v1231_v48 }
  0x51   : > { %727 = vmatmul.mubr.bf16.gmra.mxu0 %v1233_v51 }
  0x52   : > { %783 = vmatmul.mubr.bf16.gmra.mxu1 %v1234_v52  ;;  %734 = vmatprep.mubr.bf16.mxu0 %v1038_v53 }
  0x53   : > { %790 = vmatprep.mubr.bf16.mxu1 %v1040_v54 }
  0x59   : > { %735 = vmatmul.mubr.bf16.gmra.mxu0 %v1037_v55 }
  0x5a   : > { %791 = vmatmul.mubr.bf16.gmra.mxu1 %v1039_v56 }
 0x109   : > { %v1096_v57 = vpop.f32.mrf.mxu0 }
 0x10a   : > { %v1130_v58 = vpop.f32.mrf.mxu1 }
 0x10b   : > { %v1097_v59 = vpop.f32.mrf.mxu0 }
 0x10c   : > { %v1098_v60 = vadd.f32 %v1097_v59, %v1096_v57  ;;  %v1131_v61 = vpop.f32.mrf.mxu1 }
 0x10d   : > { %v1132_v62 = vadd.f32 %v1131_v61, %v1130_v58  ;;  %v1099_v63 = vpop.f32.mrf.mxu0 }
 0x10e   : > { %v1133_v1 = vpop.f32.mrf.mxu1 }
 0x10f   : > { %v777_v2 = vadd.f32 %v1132_v62, %v1098_v60  ;;  %v1100_v3 = vpop.f32.mrf.mxu0 }
 0x110   : > { %v1101_v4 = vadd.f32 %v1100_v3, %v1099_v63  ;;  %v1134_v5 = vpop.f32.mrf.mxu1 }
 0x111   : > { %v798_v6 = vadd.f32 %v777_v2, %v361_v0  ;;  %v1135_v7 = vadd.f32 %v1134_v5, %v1133_v1  ;;  %v1102_v8 = vpop.f32.mrf.mxu0 }
 0x112   : > { %v1136_v10 = vpop.f32.mrf.mxu1 }
 0x113   : > { %803 = vst [vmem:[#allocation2 + $0x8] sm:$0xff] %v798_v6  ;;  %v780_v11 = vadd.f32 %v1135_v7, %v1101_v4  ;;  %v1103_v12 = vpop.f32.mrf.mxu0 }
 0x114   : > { %v1104_v13 = vadd.f32 %v1103_v12, %v1102_v8  ;;  %v1137_v14 = vpop.f32.mrf.mxu1 }
 0x115   : > { %v799_v15 = vadd.f32 %v780_v11, %v362_v9  ;;  %v1138_v16 = vadd.f32 %v1137_v14, %v1136_v10  ;;  %v1105_v17 = vpop.f32.mrf.mxu0 }
 0x116   : > { %v1139_v19 = vpop.f32.mrf.mxu1 }
 0x117   : > { %804 = vst [vmem:[#allocation2] sm:$0xff] %v799_v15  ;;  %v785_v20 = vadd.f32 %v1138_v16, %v1104_v13  ;;  %v1106_v21 = vpop.f32.mrf.mxu0 }
 0x118   : > { %v1107_v22 = vadd.f32 %v1106_v21, %v1105_v17  ;;  %v1140_v23 = vpop.f32.mrf.mxu1 }
 0x119   : > { %v800_v24 = vadd.f32 %v785_v20, %v363_v18  ;;  %v1141_v25 = vadd.f32 %v1140_v23, %v1139_v19  ;;  %v1108_v26 = vpop.f32.mrf.mxu0 }
 0x11a   : > { %v1142_v28 = vpop.f32.mrf.mxu1 }
 0x11b   : > { %805 = vst [vmem:[#allocation2 + $0x20] sm:$0xff] %v800_v24  ;;  %v788_v29 = vadd.f32 %v1141_v25, %v1107_v22  ;;  %v1109_v30 = vpop.f32.mrf.mxu0 }
 0x11c   : > { %v1110_v31 = vadd.f32 %v1109_v30, %v1108_v26  ;;  %v1143_v32 = vpop.f32.mrf.mxu1 }
 0x11d   : > { %v801_v33 = vadd.f32 %v788_v29, %v364_v27  ;;  %v1144_v34 = vadd.f32 %v1143_v32, %v1142_v28  ;;  %v1111_v35 = vpop.f32.mrf.mxu0 }
 0x11e   : > { %v1145_v37 = vpop.f32.mrf.mxu1 }
 0x11f   : > { %806 = vst [vmem:[#allocation2 + $0x10] sm:$0xff] %v801_v33  ;;  %v793_v38 = vadd.f32 %v1144_v34, %v1110_v31  ;;  %v1112_v39 = vpop.f32.mrf.mxu0  ;;  %811 = sbr.rel (%p1073_p11) target bundleno = 332 (0x14c), region = 67 }
 0x120   : > { %v1146_v40 = vpop.f32.mrf.mxu1 }
 0x121   : > { %v802_v41 = vadd.f32 %v793_v38, %v365_v36 }
 0x123   : > { %807 = vst [vmem:[#allocation2 + $0x18] sm:$0xff] %v802_v41 }
 0x124   : > { %v812_v42 = vld [vmem:[#allocation2 + $0x8] sm:$0xff]  ;;  %v1074_v43 = vld [vmem:[%s1463_s2] ss:$0 sm:$0xff]  ;;  %v876_v31 = vld [vmem:[%s1464_s3 + $0x10] sm:$0xff] }
 0x125   : > { %v824_v44 = vadd.f32 %v1074_v43, %v812_v42  ;;  %v813_v45 = vld [vmem:[#allocation2] sm:$0xff]  ;;  %v875_v26 = vld [vmem:[%s1464_s3 + $0x8] sm:$0xff]  ;;  %v877_v35 = vld [vmem:[%s1464_s3 + $0x18] sm:$0xff] }
 0x126   : > { %v814_v46 = vld [vmem:[#allocation2 + $0x20] sm:$0xff]  ;;  %v825_v47 = vadd.f32 %v1074_v43, %v813_v45  ;;  %v815_v49 = vld [vmem:[#allocation2 + $0x10] sm:$0xff] }
 0x127   : > { %v826_v48 = vadd.f32 %v1074_v43, %v814_v46  ;;  %v834_v50 = vmul.f32 0.044715, %v824_v44  ;;  %v827_v51 = vadd.f32 %v1074_v43, %v815_v49  ;;  %v829_v14 = vmul.f32 0.5, %v824_v44  ;;  %v874_v21 = vld [vmem:[%s1464_s3] sm:$0xff] }
 0x128   : > { %v835_v53 = vmul.f32 0.044715, %v825_v47  ;;  %v830_v16 = vmul.f32 0.5, %v825_v47  ;;  %v878_v39 = vld [vmem:[%s1464_s3 + $0x20] sm:$0xff] }
 0x129   : > { %v836_v54 = vmul.f32 0.044715, %v826_v48  ;;  %v839_v55 = vmul.f32 %v834_v50, %v824_v44  ;;  %v837_v56 = vmul.f32 0.044715, %v827_v51  ;;  %v831_v19 = vmul.f32 0.5, %v826_v48 }
 0x12a   : > { %v816_v52 = vld [vmem:[#allocation2 + $0x18] sm:$0xff]  ;;  %v840_v58 = vmul.f32 %v835_v53, %v825_v47  ;;  %v832_v23 = vmul.f32 0.5, %v827_v51 }
 0x12b   : > { %v828_v57 = vadd.f32 %v1074_v43, %v816_v52  ;;  %v841_v59 = vmul.f32 %v836_v54, %v826_v48  ;;  %v844_v60 = vmul.f32 %v839_v55, %v824_v44  ;;  %v842_v61 = vmul.f32 %v837_v56, %v827_v51 }
 0x12c   : > { %v845_v63 = vmul.f32 %v840_v58, %v825_v47 }
 0x12d   : > { %v838_v62 = vmul.f32 0.044715, %v828_v57  ;;  %v846_v0 = vmul.f32 %v841_v59, %v826_v48  ;;  %v849_v1 = vadd.f32 %v844_v60, %v824_v44  ;;  %v847_v2 = vmul.f32 %v842_v61, %v827_v51 }
 0x12e   : > { %v850_v4 = vadd.f32 %v845_v63, %v825_v47  ;;  %v833_v28 = vmul.f32 0.5, %v828_v57 }
 0x12f   : > { %v843_v3 = vmul.f32 %v838_v62, %v828_v57  ;;  %v851_v5 = vadd.f32 %v846_v0, %v826_v48  ;;  %v854_v6 = vmul.f32 0.7978846, %v849_v1  ;;  %v852_v7 = vadd.f32 %v847_v2, %v827_v51 }
 0x130   : > { %v855_v9 = vmul.f32 0.7978846, %v850_v4 }
 0x131   : > { %v848_v8 = vmul.f32 %v843_v3, %v828_v57  ;;  %v856_v10 = vmul.f32 0.7978846, %v851_v5  ;;  %1239 = vtanh.f32 %v854_v6  ;;  %v857_v11 = vmul.f32 0.7978846, %v852_v7 }
 0x132   : > { %1241 = vtanh.f32 %v855_v9 }
 0x133   : > { %v853_v12 = vadd.f32 %v848_v8, %v828_v57  ;;  %1243 = vtanh.f32 %v856_v10 }
 0x134   : > { %1245 = vtanh.f32 %v857_v11 }
 0x135   : > { %v858_v13 = vmul.f32 0.7978846, %v853_v12 }
 0x137   : > { %1247 = vtanh.f32 %v858_v13 }
 0x13e   : > { %v1240_v15 = vpop.eup %1239 }
 0x13f   : > { %v1242_v17 = vpop.eup %1241  ;;  %v864_v18 = vadd.f32 1.0, %v1240_v15 }
 0x140   : > { %v1244_v20 = vpop.eup %1243  ;;  %v865_v22 = vadd.f32 1.0, %v1242_v17 }
 0x141   : > { %v1246_v24 = vpop.eup %1245  ;;  %v869_v25 = vmul.f32 %v864_v18, %v829_v14  ;;  %v866_v27 = vadd.f32 1.0, %v1244_v20 }
 0x142   : > { %v870_v30 = vmul.f32 %v865_v22, %v830_v16  ;;  %v867_v32 = vadd.f32 1.0, %v1246_v24 }
 0x143   : > { %v879_v33 = vadd.f32 %v874_v21, %v869_v25  ;;  %v871_v34 = vmul.f32 %v866_v27, %v831_v19 }
 0x144   : > { %v1248_v29 = vpop.eup %1247  ;;  %v880_v37 = vadd.f32 %v875_v26, %v870_v30  ;;  %v872_v38 = vmul.f32 %v867_v32, %v832_v23 }
 0x145   : > { %v868_v36 = vadd.f32 1.0, %v1248_v29  ;;  %884 = vst [vmem:[%s1465_s4] sm:$0xff] %v879_v33  ;;  %v881_v40 = vadd.f32 %v876_v31, %v871_v34 }
 0x146   : > { %885 = vst [vmem:[%s1465_s4 + $0x8] sm:$0xff] %v880_v37  ;;  %v882_v42 = vadd.f32 %v877_v35, %v872_v38 }
 0x147   : > { %v873_v41 = vmul.f32 %v868_v36, %v833_v28  ;;  %886 = vst [vmem:[%s1465_s4 + $0x10] sm:$0xff] %v881_v40 }
 0x148   : > { %887 = vst [vmem:[%s1465_s4 + $0x18] sm:$0xff] %v882_v42 }
 0x149   : > { %v883_v43 = vadd.f32 %v878_v39, %v873_v41 }
 0x14b   : > { %888 = vst [vmem:[%s1465_s4 + $0x20] sm:$0xff] %v883_v43 }
 0x14c PF: > { %s14_s19 = sadd.s32 1, %s1287_s19   ;;  %s1466_s15 = smov %s1275_s16 }
 0x14d   : > { %p11_p12 = scmp.ge.s32.totalorder %s14_s19, 6   ;;  %s1467_s16 = smov %s1350_s23 }
 0x14e   : > { %s1468_s17 = smov %s1283_s18  ;;  %s1469_s18 = smov %s1471_s20 }
 0x14f   :  { %13 = sbr.rel (!%p11_p12) target bundleno = 3 (0x3), region = 111 }

// kernel: hubert_forward.25
= control target key start
LH: loop header
LB: loop body
LE: loop exit
PB: predicated region body
PF: predicated region fallthrough
CT: control target
= control target key end

     0   :  { %v532_v6 = vmov 0.0   ;;  %v533_v45 = vmov 0   ;;  %vm534_vm0 = vmmov 0   ;;  %s748_s0 = inlined_call_operand.vmem [shape: f32[40,128], index: 0, kind: input, shape index: {}]   ;;  %s749_s3 = inlined_call_operand.vmem [shape: bf16[128,384], index: 3, kind: input, shape index: {}]   ;;  %s750_s1 = inlined_call_operand.vmem [shape: f32[1,128], index: 1, kind: input, shape index: {}]   ;;  %s751_s2 = inlined_call_operand.vmem [shape: f32[1,128], index: 2, kind: input, shape index: {}]   ;;  %s752_s4 = inlined_call_operand.vmem [shape: f32[1,384], index: 4, kind: input, shape index: {}]   ;;  %s753_s5 = inlined_call_operand.vmem [shape: f32[40,384], index: 5, kind: output, shape index: {}]  }
   0x1   :  { %v21_v0 = vld [vmem:[%s748_s0] sm:$0xff]  ;;  %v23_v1 = vld [vmem:[%s748_s0 + $0x10] sm:$0xff]  ;;  %v22_v2 = vld [vmem:[%s748_s0 + $0x8] sm:$0xff]  ;;  %459 = vmatprep.subr.bf16.mxu1 %v532_v6  ;;  %318 = vmatprep.mubr.bf16.mxu0 %v533_v45 }
   0x2   :  { %26 = vadd.xlane.f32.xlu0 %v21_v0  ;;  %30 = vadd.xlane.f32.xlu1 %v23_v1  ;;  %v24_v3 = vld [vmem:[%s748_s0 + $0x18] sm:$0xff]  ;;  %v25_v4 = vld [vmem:[%s748_s0 + $0x20] sm:$0xff]  ;;  %v492_v7 = vld [vmem:[%s749_s3 + $0xa8] ss:$12 sps:$4 sm:$0xff]  }
   0x3   :  { %v490_v5 = vld [vmem:[%s749_s3 + $0xac] ss:$12 sps:$4 sm:$0xff]   ;;  %v493_v8 = vld [vmem:[%s749_s3 + $0xb0] ss:$12 sps:$4 sm:$0xff]   ;;  %v494_v29 = vld [vmem:[%s749_s3 + $0x94] ss:$12 sps:$4 sm:$0xff]   ;;  %475 = vmatprep.mubr.msk.bf16.mxu1 %vm534_vm0, %v532_v6 }
   0x4   :  { %286 = vmatprep.subr.bf16.mxu0 %v490_v5  ;;  %460 = vmatpush3.bf16.msra.mxu1 %v493_v8  ;;  %v496_v30 = vld [vmem:[%s749_s3 + $0x90] ss:$12 sps:$4 sm:$0xff]   ;;  %v497_v31 = vld [vmem:[%s749_s3 + $0x98] ss:$12 sps:$4 sm:$0xff]   ;;  %v501_v34 = vld [vmem:[%s749_s3 + $0x80] ss:$12 sps:$4 sm:$0xff]  }
   0x5   :  { %287 = vmatpush1.bf16.msra.mxu0 %v492_v7  ;;  %461 = vmatprep.subr.bf16.mxu1 %v532_v6  ;;  %v498_v32 = vld [vmem:[%s749_s3 + $0x7c] ss:$12 sps:$4 sm:$0xff]   ;;  %v500_v33 = vld [vmem:[%s749_s3 + $0x78] ss:$12 sps:$4 sm:$0xff]   ;;  %v504_v36 = vld [vmem:[%s749_s3 + $0x60] ss:$12 sps:$4 sm:$0xff]  }
   0x6   :  { %28 = vadd.xlane.f32.xlu0 %v22_v2  ;;  %32 = vadd.xlane.f32.xlu1 %v24_v3  ;;  %v502_v35 = vld [vmem:[%s749_s3 + $0x64] ss:$12 sps:$4 sm:$0xff]   ;;  %v505_v37 = vld [vmem:[%s749_s3 + $0x68] ss:$12 sps:$4 sm:$0xff]   ;;  %v506_v38 = vld [vmem:[%s749_s3 + $0x4c] ss:$12 sps:$4 sm:$0xff]  }
   0x7   :  { %288 = vmatprep.subr.bf16.mxu0 %v494_v29  ;;  %v508_v39 = vld [vmem:[%s749_s3 + $0x48] ss:$12 sps:$4 sm:$0xff]   ;;  %v509_v40 = vld [vmem:[%s749_s3 + $0x50] ss:$12 sps:$4 sm:$0xff]   ;;  %v513_v43 = vld [vmem:[%s749_s3 + $0x38] ss:$12 sps:$4 sm:$0xff]   ;;  %v143_v29 = vlaneseq }
   0x8   :  { %462 = vmatpush3.bf16.msra.mxu1 %v497_v31  ;;  %v510_v41 = vld [vmem:[%s749_s3 + $0x34] ss:$12 sps:$4 sm:$0xff]   ;;  %v512_v42 = vld [vmem:[%s749_s3 + $0x30] ss:$12 sps:$4 sm:$0xff]   ;;  %v516_v46 = vld [vmem:[%s749_s3 + $0x18] ss:$12 sps:$4 sm:$0xff]  }
   0x9   :  { %289 = vmatpush1.bf16.msra.mxu0 %v496_v30  ;;  %463 = vmatprep.subr.bf16.mxu1 %v532_v6  ;;  %v514_v44 = vld [vmem:[%s749_s3 + $0x1c] ss:$12 sps:$4 sm:$0xff]   ;;  %v517_v47 = vld [vmem:[%s749_s3 + $0x20] ss:$12 sps:$4 sm:$0xff]   ;;  %v518_v48 = vld [vmem:[%s749_s3 + $0x4] ss:$12 sps:$4 sm:$0xff]  }
   0xa   :  { %34 = vadd.xlane.f32.xlu0 %v25_v4  ;;  %290 = vmatprep.subr.bf16.mxu0 %v498_v32  ;;  %v520_v49 = vld [vmem:[%s749_s3] ss:$12 sps:$4 sm:$0xff]   ;;  %v521_v50 = vld [vmem:[%s749_s3 + $0x8] ss:$12 sps:$4 sm:$0xff]   ;;  %v144_v30 = vshrl.u32 %v143_v29, 7 }
   0xc   :  { %464 = vmatpush3.bf16.msra.mxu1 %v501_v34  ;;  %v145_v31 = vsub.s32 0, %v144_v30  ;;  %v153_v32 = vsub.s32 2, %v144_v30 }
   0xd   :  { %291 = vmatpush1.bf16.msra.mxu0 %v500_v33  ;;  %465 = vmatprep.subr.bf16.mxu1 %v532_v6  ;;  %v149_v33 = vsub.s32 1, %v144_v30 }
   0xe   :  { %292 = vmatprep.subr.bf16.mxu0 %v502_v35 }
  0x10   :  { %466 = vmatpush3.bf16.msra.mxu1 %v505_v37 }
  0x11   :  { %293 = vmatpush1.bf16.msra.mxu0 %v504_v36  ;;  %467 = vmatprep.subr.bf16.mxu1 %v532_v6 }
  0x12   :  { %294 = vmatprep.subr.bf16.mxu0 %v506_v38 }
  0x14   :  { %468 = vmatpush3.bf16.msra.mxu1 %v509_v40 }
  0x15   :  { %295 = vmatpush1.bf16.msra.mxu0 %v508_v39  ;;  %469 = vmatprep.subr.bf16.mxu1 %v532_v6 }
  0x16   :  { %296 = vmatprep.subr.bf16.mxu0 %v510_v41 }
  0x18   :  { %470 = vmatpush3.bf16.msra.mxu1 %v513_v43 }
  0x19   :  { %297 = vmatpush1.bf16.msra.mxu0 %v512_v42  ;;  %471 = vmatprep.subr.bf16.mxu1 %v532_v6 }
  0x1a   :  { %298 = vmatprep.subr.bf16.mxu0 %v514_v44 }
  0x1c   :  { %472 = vmatpush3.bf16.msra.mxu1 %v517_v47 }
  0x1d   :  { %299 = vmatpush1.bf16.msra.mxu0 %v516_v46  ;;  %473 = vmatprep.subr.bf16.mxu1 %v532_v6 }
  0x1e   :  { %300 = vmatprep.subr.bf16.mxu0 %v518_v48 }
  0x20   :  { %474 = vmatpush3.bf16.msra.mxu1 %v521_v50 }
  0x21   :  { %301 = vmatpush1.bf16.msra.mxu0 %v520_v49 }
  0x8b   :  { %v27_v9 = vpop.xlane.xlu0 %26  ;;  %v31_v10 = vpop.xlane.xlu1 %30 }
  0x8c   :  { %v37_v11 = vmul.f32 0.0078125, %v27_v9  ;;  %v39_v12 = vmul.f32 0.0078125, %v31_v10  ;;  %v423_v10 = vld [vmem:[%s751_s2] ss:$0 sm:$0xff] }
  0x8e   :  { %v591_v13 = vsub.f32 %v21_v0, %v37_v11  ;;  %v593_v14 = vsub.f32 %v23_v1, %v39_v12 }
  0x8f   :  { %v29_v15 = vpop.xlane.xlu0 %28  ;;  %v33_v16 = vpop.xlane.xlu1 %32 }
  0x90   :  { %v38_v17 = vmul.f32 0.0078125, %v29_v15  ;;  %v47_v18 = vmul.f32 %v591_v13, %v591_v13  ;;  %v40_v19 = vmul.f32 0.0078125, %v33_v16  ;;  %v49_v22 = vmul.f32 %v593_v14, %v593_v14 }
  0x92   :  { %v597_v20 = vsub.f32 %v22_v2, %v38_v17  ;;  %52 = vadd.xlane.f32.xlu1 %v47_v18  ;;  %v599_v21 = vsub.f32 %v24_v3, %v40_v19 }
  0x93   :  { %v35_v23 = vpop.xlane.xlu0 %34 }
  0x94   :  { %v41_v24 = vmul.f32 0.0078125, %v35_v23  ;;  %v48_v25 = vmul.f32 %v597_v20, %v597_v20  ;;  %v50_v27 = vmul.f32 %v599_v21, %v599_v21 }
  0x96   :  { %v605_v26 = vsub.f32 %v25_v4, %v41_v24  ;;  %56 = vadd.xlane.f32.xlu1 %v49_v22  ;;  %54 = vadd.xlane.f32.xlu0 %v48_v25  ;;  %v422_v4 = vld [vmem:[%s750_s1] ss:$0 sm:$0xff] }
  0x98   :  { %v51_v28 = vmul.f32 %v605_v26, %v605_v26 }
  0x9a   :  { %58 = vadd.xlane.f32.xlu0 %v50_v27  ;;  %60 = vadd.xlane.f32.xlu1 %v51_v28 }
 0x11b   :  { %v53_v51 = vpop.xlane.xlu1 %52 }
 0x11c   :  { %v62_v52 = vmul.f32 0.0078125, %v53_v51 }
 0x11e   :  { %v67_v53 = vadd.f32 0.0001, %v62_v52 }
 0x11f   :  { %v57_v54 = vpop.xlane.xlu1 %56  ;;  %v55_v55 = vpop.xlane.xlu0 %54 }
 0x120   :  { %522 = vrsqrt.f32 %v67_v53  ;;  %v64_v56 = vmul.f32 0.0078125, %v57_v54  ;;  %v63_v57 = vmul.f32 0.0078125, %v55_v55 }
 0x122   :  { %v68_v58 = vadd.f32 0.0001, %v63_v57  ;;  %v69_v59 = vadd.f32 0.0001, %v64_v56 }
 0x123   :  { %v61_v60 = vpop.xlane.xlu1 %60  ;;  %v59_v61 = vpop.xlane.xlu0 %58 }
 0x124   :  { %v65_v62 = vmul.f32 0.0078125, %v59_v61  ;;  %524 = vrsqrt.f32 %v68_v58  ;;  %v66_v63 = vmul.f32 0.0078125, %v61_v60 }
 0x125   :  { %526 = vrsqrt.f32 %v69_v59 }
 0x126   :  { %v70_v0 = vadd.f32 0.0001, %v65_v62  ;;  %v71_v1 = vadd.f32 0.0001, %v66_v63 }
 0x128   :  { %528 = vrsqrt.f32 %v70_v0 }
 0x129   :  { %530 = vrsqrt.f32 %v71_v1 }
 0x12d   :  { %v523_v2 = vpop.eup %522 }
 0x12e   :  { %v77_v3 = vmul.f32 %v523_v2, %v591_v13 }
 0x130   :  { %v89_v8 = vmul.f32 %v422_v4, %v77_v3 }
 0x131   :  { %v525_v5 = vpop.eup %524 }
 0x132   :  { %v78_v7 = vmul.f32 %v525_v5, %v597_v20  ;;  %v527_v9 = vpop.eup %526  ;;  %v101_v15 = vadd.f32 %v423_v10, %v89_v8 }
 0x133   :  { %v79_v17 = vmul.f32 %v527_v9, %v593_v14 }
 0x134   :  { %v90_v11 = vmul.f32 %v422_v4, %v78_v7 }
 0x135   :  { %v529_v12 = vpop.eup %528  ;;  %v91_v20 = vmul.f32 %v422_v4, %v79_v17 }
 0x136   :  { %v102_v16 = vadd.f32 %v423_v10, %v90_v11  ;;  %v80_v13 = vmul.f32 %v529_v12, %v599_v21  ;;  %v531_v22 = vpop.eup %530 }
 0x137   :  { %v81_v24 = vmul.f32 %v531_v22, %v605_v26  ;;  %v103_v25 = vadd.f32 %v423_v10, %v91_v20  ;;  %v141_v26 = vld [vmem:[%s752_s4] sm:$0x7] }
 0x138   :  { %v106_v18 = vpack.c.bf16 %v102_v16, %v101_v15  ;;  %v92_v19 = vmul.f32 %v422_v4, %v80_v13  ;;  %v146_v34 = vrot.slane %v141_v26, %v145_v31  ;;  %v154_v35 = vrot.slane %v141_v26, %v153_v32 }
 0x139   :  { %v93_v28 = vmul.f32 %v422_v4, %v81_v24  ;;  %v150_v36 = vrot.slane %v141_v26, %v149_v33 }
 0x13a   :  { %319 = vmatmul.mubr.bf16.vlgmr.msra.gmra.mxu0 %v106_v18  ;;  %476 = vmatmul.mubr.bf16.vlgmr.msra.gmra.mxu1 %v106_v18  ;;  %v104_v23 = vadd.f32 %v423_v10, %v92_v19 }
 0x13b   :  { %328 = vmatprep.mubr.bf16.mxu0 %v533_v45  ;;  %479 = vmatprep.mubr.msk.bf16.mxu1 %vm534_vm0, %v532_v6  ;;  %v105_v14 = vadd.f32 %v423_v10, %v93_v28 }
 0x13c   :  { %v107_v27 = vpack.c.bf16 %v104_v23, %v103_v25 }
 0x13d   :  { %v108_v21 = vpack.c.bf16 %v105_v14, %v105_v14 }
 0x142   :  { %329 = vmatmul.mubr.bf16.gmra.mxu0 %v107_v27  ;;  %480 = vmatmul.mubr.bf16.gmra.mxu1 %v107_v27 }
 0x143   :  { %338 = vmatprep.mubr.bf16.mxu0 %v533_v45  ;;  %483 = vmatprep.mubr.msk.bf16.mxu1 %vm534_vm0, %v532_v6 }
 0x14a   :  { %339 = vmatmul.mubr.bf16.gmra.mxu0 %v108_v21  ;;  %484 = vmatmul.mubr.bf16.gmra.mxu1 %v108_v21 }
 0x1fa   :  { %v320_v37 = vpop.f32.mrf.mxu0  ;;  %v381_v38 = vpop.f32.mrf.mxu1 }
 0x1fb   :  { %v321_v39 = vadd.f32 %v320_v37, %v146_v34  ;;  %v382_v6 = vadd.f32 %v381_v38, %v154_v35 }
 0x1fc   :  { %v322_v40 = vpop.f32.mrf.mxu0  ;;  %v477_v41 = vpop.f32.mrf.mxu1 }
 0x1fd   :  { %403 = vst [vmem:[%s753_s5] sm:$0xff] %v321_v39  ;;  %405 = vst [vmem:[%s753_s5 + $0x10] sm:$0xff] %v382_v6  ;;  %v323_v42 = vadd.f32 %v322_v40, %v150_v36 }
 0x1fe   :  { %v324_v43 = vpop.f32.mrf.mxu0  ;;  %v384_v44 = vpop.f32.mrf.mxu1 }
 0x1ff   :  { %404 = vst [vmem:[%s753_s5 + $0x8] sm:$0xff] %v323_v42  ;;  %v325_v45 = vadd.f32 %v324_v43, %v146_v34  ;;  %v385_v46 = vadd.f32 %v384_v44, %v154_v35 }
 0x200   :  { %v326_v47 = vpop.f32.mrf.mxu0  ;;  %v478_v48 = vpop.f32.mrf.mxu1 }
 0x201   :  { %406 = vst [vmem:[%s753_s5 + $0x18] sm:$0xff] %v325_v45  ;;  %408 = vst [vmem:[%s753_s5 + $0x28] sm:$0xff] %v385_v46  ;;  %v327_v49 = vadd.f32 %v326_v47, %v150_v36 }
 0x202   :  { %v330_v50 = vpop.f32.mrf.mxu0  ;;  %v389_v51 = vpop.f32.mrf.mxu1 }
 0x203   :  { %407 = vst [vmem:[%s753_s5 + $0x20] sm:$0xff] %v327_v49  ;;  %v331_v52 = vadd.f32 %v330_v50, %v146_v34  ;;  %v390_v53 = vadd.f32 %v389_v51, %v154_v35 }
 0x204   :  { %v332_v54 = vpop.f32.mrf.mxu0  ;;  %v481_v55 = vpop.f32.mrf.mxu1 }
 0x205   :  { %409 = vst [vmem:[%s753_s5 + $0x30] sm:$0xff] %v331_v52  ;;  %411 = vst [vmem:[%s753_s5 + $0x40] sm:$0xff] %v390_v53  ;;  %v333_v56 = vadd.f32 %v332_v54, %v150_v36 }
 0x206   :  { %v334_v57 = vpop.f32.mrf.mxu0  ;;  %v392_v58 = vpop.f32.mrf.mxu1 }
 0x207   :  { %410 = vst [vmem:[%s753_s5 + $0x38] sm:$0xff] %v333_v56  ;;  %v335_v59 = vadd.f32 %v334_v57, %v146_v34  ;;  %v393_v60 = vadd.f32 %v392_v58, %v154_v35 }
 0x208   :  { %v336_v61 = vpop.f32.mrf.mxu0  ;;  %v482_v62 = vpop.f32.mrf.mxu1 }
 0x209   :  { %412 = vst [vmem:[%s753_s5 + $0x48] sm:$0xff] %v335_v59  ;;  %414 = vst [vmem:[%s753_s5 + $0x58] sm:$0xff] %v393_v60  ;;  %v337_v63 = vadd.f32 %v336_v61, %v150_v36 }
 0x20a   :  { %v340_v0 = vpop.f32.mrf.mxu0  ;;  %v397_v1 = vpop.f32.mrf.mxu1 }
 0x20b   :  { %413 = vst [vmem:[%s753_s5 + $0x50] sm:$0xff] %v337_v63  ;;  %v341_v2 = vadd.f32 %v340_v0, %v146_v34  ;;  %v398_v3 = vadd.f32 %v397_v1, %v154_v35 }
 0x20c   :  { %v342_v4 = vpop.f32.mrf.mxu0  ;;  %v485_v5 = vpop.f32.mrf.mxu1 }
 0x20d   :  { %415 = vst [vmem:[%s753_s5 + $0x60] sm:$0xff] %v341_v2  ;;  %417 = vst [vmem:[%s753_s5 + $0x70] sm:$0xff] %v398_v3  ;;  %v343_v7 = vadd.f32 %v342_v4, %v150_v36 }
 0x20e   :  { %v344_v8 = vpop.f32.mrf.mxu0  ;;  %v400_v9 = vpop.f32.mrf.mxu1 }
 0x20f   :  { %416 = vst [vmem:[%s753_s5 + $0x68] sm:$0xff] %v343_v7 }
 0x210   :  { %v345_v10 = vpop.f32.mrf.mxu0  ;;  %v486_v11 = vpop.f32.mrf.mxu1 }

// kernel: hubert_forward.27
= control target key start
LH: loop header
LB: loop body
LE: loop exit
PB: predicated region body
PF: predicated region fallthrough
CT: control target
= control target key end

     0   :  { %v471_v38 = vmov 0   ;;  %s706_s0 = inlined_call_operand.vmem [shape: f32[40,128], index: 0, kind: input, shape index: {}]   ;;  %s707_s3 = inlined_call_operand.vmem [shape: bf16[128,256], index: 3, kind: input, shape index: {}]   ;;  %s708_s1 = inlined_call_operand.vmem [shape: f32[1,128], index: 1, kind: input, shape index: {}]   ;;  %s709_s2 = inlined_call_operand.vmem [shape: f32[1,128], index: 2, kind: input, shape index: {}]   ;;  %s710_s4 = inlined_call_operand.vmem [shape: f32[1,256], index: 4, kind: input, shape index: {}]   ;;  %s711_s5 = inlined_call_operand.vmem [shape: f32[40,256], index: 5, kind: output, shape index: {}]  }
   0x1   :  { %v23_v0 = vld [vmem:[%s706_s0 + $0x10] sm:$0xff]  ;;  %v21_v1 = vld [vmem:[%s706_s0] sm:$0xff]  ;;  %v24_v2 = vld [vmem:[%s706_s0 + $0x18] sm:$0xff]  ;;  %259 = vmatprep.mubr.bf16.mxu1 %v471_v38  ;;  %249 = vmatprep.mubr.bf16.mxu0 %v471_v38 }
   0x2   :  { %30 = vadd.xlane.f32.xlu0 %v23_v0  ;;  %26 = vadd.xlane.f32.xlu1 %v21_v1  ;;  %v22_v3 = vld [vmem:[%s706_s0 + $0x8] sm:$0xff]  ;;  %v25_v4 = vld [vmem:[%s706_s0 + $0x20] sm:$0xff]  ;;  %v417_v5 = vld [vmem:[%s707_s3 + $0x74] ss:$8 sps:$4 sm:$0xff]  }
   0x3   :  { %v419_v6 = vld [vmem:[%s707_s3 + $0x70] ss:$8 sps:$4 sm:$0xff]   ;;  %400 = vmatprep.subr.bf16.mxu1 %v417_v5  ;;  %217 = vmatprep.subr.bf16.mxu0 %v417_v5  ;;  %v420_v27 = vld [vmem:[%s707_s3 + $0x64] ss:$8 sps:$4 sm:$0xff]   ;;  %v422_v28 = vld [vmem:[%s707_s3 + $0x60] ss:$8 sps:$4 sm:$0xff]  }
   0x4   :  { %408 = vmatpush1.bf16.msra.mxu1 %v419_v6  ;;  %218 = vmatpush1.bf16.msra.mxu0 %v419_v6  ;;  %v423_v29 = vld [vmem:[%s707_s3 + $0x54] ss:$8 sps:$4 sm:$0xff]   ;;  %v425_v30 = vld [vmem:[%s707_s3 + $0x50] ss:$8 sps:$4 sm:$0xff]   ;;  %v426_v31 = vld [vmem:[%s707_s3 + $0x44] ss:$8 sps:$4 sm:$0xff]  }
   0x5   :  { %401 = vmatprep.subr.bf16.mxu1 %v420_v27  ;;  %219 = vmatprep.subr.bf16.mxu0 %v420_v27  ;;  %v428_v32 = vld [vmem:[%s707_s3 + $0x40] ss:$8 sps:$4 sm:$0xff]   ;;  %v429_v33 = vld [vmem:[%s707_s3 + $0x34] ss:$8 sps:$4 sm:$0xff]   ;;  %v431_v34 = vld [vmem:[%s707_s3 + $0x30] ss:$8 sps:$4 sm:$0xff]  }
   0x6   :  { %32 = vadd.xlane.f32.xlu0 %v24_v2  ;;  %28 = vadd.xlane.f32.xlu1 %v22_v3  ;;  %v432_v35 = vld [vmem:[%s707_s3 + $0x24] ss:$8 sps:$4 sm:$0xff]   ;;  %v434_v36 = vld [vmem:[%s707_s3 + $0x20] ss:$8 sps:$4 sm:$0xff]   ;;  %v435_v37 = vld [vmem:[%s707_s3 + $0x14] ss:$8 sps:$4 sm:$0xff]  }
   0x7   :  { %v437_v39 = vld [vmem:[%s707_s3 + $0x10] ss:$8 sps:$4 sm:$0xff]   ;;  %v438_v40 = vld [vmem:[%s707_s3 + $0x4] ss:$8 sps:$4 sm:$0xff]   ;;  %v440_v41 = vld [vmem:[%s707_s3] ss:$8 sps:$4 sm:$0xff]  }
   0x8   :  { %409 = vmatpush1.bf16.msra.mxu1 %v422_v28  ;;  %220 = vmatpush1.bf16.msra.mxu0 %v422_v28  ;;  %v382_v59 = vld [vmem:[%s708_s1] ss:$0 sm:$0xff] }
   0x9   :  { %402 = vmatprep.subr.bf16.mxu1 %v423_v29  ;;  %221 = vmatprep.subr.bf16.mxu0 %v423_v29 }
   0xa   :  { %34 = vadd.xlane.f32.xlu0 %v25_v4 }
   0xc   :  { %410 = vmatpush1.bf16.msra.mxu1 %v425_v30  ;;  %222 = vmatpush1.bf16.msra.mxu0 %v425_v30 }
   0xd   :  { %403 = vmatprep.subr.bf16.mxu1 %v426_v31  ;;  %223 = vmatprep.subr.bf16.mxu0 %v426_v31 }
  0x10   :  { %411 = vmatpush1.bf16.msra.mxu1 %v428_v32  ;;  %224 = vmatpush1.bf16.msra.mxu0 %v428_v32 }
  0x11   :  { %404 = vmatprep.subr.bf16.mxu1 %v429_v33  ;;  %225 = vmatprep.subr.bf16.mxu0 %v429_v33 }
  0x14   :  { %412 = vmatpush1.bf16.msra.mxu1 %v431_v34  ;;  %226 = vmatpush1.bf16.msra.mxu0 %v431_v34 }
  0x15   :  { %405 = vmatprep.subr.bf16.mxu1 %v432_v35  ;;  %227 = vmatprep.subr.bf16.mxu0 %v432_v35 }
  0x18   :  { %413 = vmatpush1.bf16.msra.mxu1 %v434_v36  ;;  %228 = vmatpush1.bf16.msra.mxu0 %v434_v36 }
  0x19   :  { %406 = vmatprep.subr.bf16.mxu1 %v435_v37  ;;  %229 = vmatprep.subr.bf16.mxu0 %v435_v37 }
  0x1c   :  { %414 = vmatpush1.bf16.msra.mxu1 %v437_v39  ;;  %230 = vmatpush1.bf16.msra.mxu0 %v437_v39 }
  0x1d   :  { %407 = vmatprep.subr.bf16.mxu1 %v438_v40  ;;  %231 = vmatprep.subr.bf16.mxu0 %v438_v40 }
  0x20   :  { %415 = vmatpush1.bf16.msra.mxu1 %v440_v41  ;;  %232 = vmatpush1.bf16.msra.mxu0 %v440_v41 }
  0x8b   :  { %v31_v7 = vpop.xlane.xlu0 %30  ;;  %v27_v8 = vpop.xlane.xlu1 %26 }
  0x8c   :  { %v39_v9 = vmul.f32 0.0078125, %v31_v7  ;;  %v37_v10 = vmul.f32 0.0078125, %v27_v8 }
  0x8e   :  { %v523_v11 = vsub.f32 %v23_v0, %v39_v9  ;;  %v525_v12 = vsub.f32 %v21_v1, %v37_v10  ;;  %v383_v0 = vld [vmem:[%s709_s2] ss:$0 sm:$0xff] }
  0x8f   :  { %v33_v13 = vpop.xlane.xlu0 %32  ;;  %v29_v14 = vpop.xlane.xlu1 %28 }
  0x90   :  { %v40_v15 = vmul.f32 0.0078125, %v33_v13  ;;  %v49_v16 = vmul.f32 %v523_v11, %v523_v11  ;;  %v38_v17 = vmul.f32 0.0078125, %v29_v14  ;;  %v47_v20 = vmul.f32 %v525_v12, %v525_v12 }
  0x92   :  { %v529_v18 = vsub.f32 %v24_v2, %v40_v15  ;;  %56 = vadd.xlane.f32.xlu1 %v49_v16  ;;  %v531_v19 = vsub.f32 %v22_v3, %v38_v17 }
  0x93   :  { %v35_v21 = vpop.xlane.xlu0 %34 }
  0x94   :  { %v41_v22 = vmul.f32 0.0078125, %v35_v21  ;;  %v50_v23 = vmul.f32 %v529_v18, %v529_v18  ;;  %v48_v25 = vmul.f32 %v531_v19, %v531_v19 }
  0x96   :  { %v537_v24 = vsub.f32 %v25_v4, %v41_v22  ;;  %58 = vadd.xlane.f32.xlu0 %v50_v23  ;;  %52 = vadd.xlane.f32.xlu1 %v47_v20 }
  0x98   :  { %v51_v26 = vmul.f32 %v537_v24, %v537_v24 }
  0x9a   :  { %60 = vadd.xlane.f32.xlu1 %v51_v26  ;;  %54 = vadd.xlane.f32.xlu0 %v48_v25 }
 0x11b   :  { %v57_v42 = vpop.xlane.xlu1 %56 }
 0x11c   :  { %v64_v43 = vmul.f32 0.0078125, %v57_v42 }
 0x11e   :  { %v69_v44 = vadd.f32 0.0001, %v64_v43 }
 0x11f   :  { %v59_v45 = vpop.xlane.xlu0 %58  ;;  %v53_v46 = vpop.xlane.xlu1 %52 }
 0x120   :  { %441 = vrsqrt.f32 %v69_v44  ;;  %v65_v47 = vmul.f32 0.0078125, %v59_v45  ;;  %v62_v48 = vmul.f32 0.0078125, %v53_v46 }
 0x122   :  { %v70_v49 = vadd.f32 0.0001, %v65_v47  ;;  %v67_v50 = vadd.f32 0.0001, %v62_v48 }
 0x123   :  { %v55_v51 = vpop.xlane.xlu0 %54  ;;  %v61_v52 = vpop.xlane.xlu1 %60 }
 0x124   :  { %443 = vrsqrt.f32 %v70_v49  ;;  %v63_v53 = vmul.f32 0.0078125, %v55_v51  ;;  %v66_v54 = vmul.f32 0.0078125, %v61_v52 }
 0x125   :  { %445 = vrsqrt.f32 %v67_v50 }
 0x126   :  { %v68_v55 = vadd.f32 0.0001, %v63_v53  ;;  %v71_v56 = vadd.f32 0.0001, %v66_v54 }
 0x128   :  { %447 = vrsqrt.f32 %v68_v55 }
 0x129   :  { %449 = vrsqrt.f32 %v71_v56 }
 0x12d   :  { %v442_v57 = vpop.eup %441 }
 0x12e   :  { %v79_v58 = vmul.f32 %v442_v57, %v523_v11 }
 0x130   :  { %v91_v63 = vmul.f32 %v382_v59, %v79_v58 }
 0x131   :  { %v444_v60 = vpop.eup %443 }
 0x132   :  { %v446_v61 = vpop.eup %445  ;;  %v80_v62 = vmul.f32 %v444_v60, %v529_v18  ;;  %v103_v5 = vadd.f32 %v383_v0, %v91_v63  ;;  %v127_v18 = vlaneseq }
 0x133   :  { %v77_v1 = vmul.f32 %v446_v61, %v525_v12 }
 0x134   :  { %v92_v2 = vmul.f32 %v382_v59, %v80_v62  ;;  %v128_v20 = vshrl.u32 %v127_v18, 7 }
 0x135   :  { %v448_v3 = vpop.eup %447  ;;  %v89_v8 = vmul.f32 %v382_v59, %v77_v1 }
 0x136   :  { %v450_v4 = vpop.eup %449  ;;  %v104_v6 = vadd.f32 %v383_v0, %v92_v2  ;;  %v78_v7 = vmul.f32 %v448_v3, %v531_v19  ;;  %v129_v21 = vsub.s32 0, %v128_v20  ;;  %v125_v19 = vld [vmem:[%s710_s4] sm:$0x3]  ;;  %v133_v22 = vsub.s32 1, %v128_v20 }
 0x137   :  { %v81_v9 = vmul.f32 %v450_v4, %v537_v24  ;;  %v101_v14 = vadd.f32 %v383_v0, %v89_v8 }
 0x138   :  { %v107_v10 = vpack.c.bf16 %v104_v6, %v103_v5  ;;  %v90_v11 = vmul.f32 %v382_v59, %v78_v7  ;;  %v130_v23 = vrot.slane %v125_v19, %v129_v21  ;;  %v599_v24 = vrot.slane %v125_v19, %v133_v22 }
 0x139   :  { %v93_v13 = vmul.f32 %v382_v59, %v81_v9 }
 0x13a   :  { %260 = vmatmul.mubr.bf16.vlgmr.msra.gmra.mxu1 %v107_v10  ;;  %v102_v15 = vadd.f32 %v383_v0, %v90_v11 }
 0x13b   :  { %269 = vmatprep.mubr.bf16.mxu1 %v471_v38  ;;  %v105_v17 = vadd.f32 %v383_v0, %v93_v13 }
 0x13c   :  { %v106_v16 = vpack.c.bf16 %v102_v15, %v101_v14 }
 0x13d   :  { %v108_v12 = vpack.c.bf16 %v105_v17, %v105_v17 }
 0x13e   :  { %250 = vmatmul.mubr.bf16.vlgmr.msra.gmra.mxu0 %v106_v16 }
 0x142   :  { %270 = vmatmul.mubr.bf16.gmra.mxu1 %v108_v12 }
 0x1fa   :  { %v261_v25 = vpop.f32.mrf.mxu1 }
 0x1fb   :  { %v601_v26 = vadd.f32 %v261_v25, %v130_v23 }
 0x1fc   :  { %v263_v27 = vpop.f32.mrf.mxu1 }
 0x1fd   :  { %v292_v28 = vmul.f32 0.044715, %v601_v26  ;;  %v605_v29 = vadd.f32 %v263_v27, %v599_v24 }
 0x1fe   :  { %v251_v30 = vpop.f32.mrf.mxu0  ;;  %v265_v31 = vpop.f32.mrf.mxu1 }
 0x1ff   :  { %v302_v32 = vmul.f32 %v292_v28, %v601_v26  ;;  %v293_v33 = vmul.f32 0.044715, %v605_v29  ;;  %v609_v34 = vadd.f32 %v251_v30, %v130_v23  ;;  %v611_v35 = vadd.f32 %v265_v31, %v130_v23 }
 0x200   :  { %v253_v36 = vpop.f32.mrf.mxu0  ;;  %v267_v37 = vpop.f32.mrf.mxu1 }
 0x201   :  { %v312_v38 = vmul.f32 %v302_v32, %v601_v26  ;;  %v303_v39 = vmul.f32 %v293_v33, %v605_v29  ;;  %v288_v40 = vmul.f32 0.044715, %v609_v34  ;;  %v294_v41 = vmul.f32 0.044715, %v611_v35 }
 0x202   :  { %v618_v42 = vadd.f32 %v253_v36, %v599_v24  ;;  %v621_v43 = vadd.f32 %v267_v37, %v599_v24  ;;  %v255_v44 = vpop.f32.mrf.mxu0  ;;  %v271_v45 = vpop.f32.mrf.mxu1  ;;  %v282_v36 = vmul.f32 0.5, %v601_v26 }
 0x203   :  { %v322_v46 = vadd.f32 %v312_v38, %v601_v26  ;;  %v313_v47 = vmul.f32 %v303_v39, %v605_v29  ;;  %v298_v48 = vmul.f32 %v288_v40, %v609_v34  ;;  %v626_v49 = vadd.f32 %v255_v44, %v130_v23 }
 0x204   :  { %v304_v50 = vmul.f32 %v294_v41, %v611_v35  ;;  %v289_v51 = vmul.f32 0.044715, %v618_v42  ;;  %v273_v52 = vpop.f32.mrf.mxu1  ;;  %v295_v56 = vmul.f32 0.044715, %v621_v43  ;;  %v257_v60 = vpop.f32.mrf.mxu0  ;;  %v641_v4 = vadd.f32 %v271_v45, %v130_v23 }
 0x205   :  { %v332_v53 = vmul.f32 0.7978846, %v322_v46  ;;  %v323_v54 = vadd.f32 %v313_v47, %v605_v29  ;;  %v308_v55 = vmul.f32 %v298_v48, %v609_v34  ;;  %v290_v59 = vmul.f32 0.044715, %v626_v49 }
 0x206   :  { %v314_v57 = vmul.f32 %v304_v50, %v611_v35  ;;  %v299_v58 = vmul.f32 %v289_v51, %v618_v42  ;;  %v275_v61 = vpop.f32.mrf.mxu1  ;;  %v305_v0 = vmul.f32 %v295_v56, %v621_v43  ;;  %v645_v8 = vadd.f32 %v257_v60, %v599_v24 }
 0x207   :  { %451 = vtanh.f32 %v332_v53  ;;  %v333_v62 = vmul.f32 0.7978846, %v323_v54  ;;  %v318_v63 = vadd.f32 %v308_v55, %v609_v34  ;;  %v300_v3 = vmul.f32 %v290_v59, %v626_v49 }
 0x208   :  { %v324_v1 = vadd.f32 %v314_v57, %v611_v35  ;;  %v309_v2 = vmul.f32 %v299_v58, %v618_v42  ;;  %v276_v5 = vpop.f32.mrf.mxu1  ;;  %v315_v7 = vmul.f32 %v305_v0, %v621_v43  ;;  %v296_v14 = vmul.f32 0.044715, %v641_v4 }
 0x209   :  { %453 = vtanh.f32 %v333_v62  ;;  %v328_v6 = vmul.f32 0.7978846, %v318_v63  ;;  %v310_v11 = vmul.f32 %v300_v3, %v626_v49  ;;  %v291_v17 = vmul.f32 0.044715, %v645_v8 }
 0x20a   :  { %v334_v9 = vmul.f32 0.7978846, %v324_v1  ;;  %v319_v10 = vadd.f32 %v309_v2, %v618_v42  ;;  %v325_v13 = vadd.f32 %v315_v7, %v621_v43  ;;  %v306_v18 = vmul.f32 %v296_v14, %v641_v4 }
 0x20b   :  { %455 = vtanh.f32 %v328_v6  ;;  %v320_v16 = vadd.f32 %v310_v11, %v626_v49  ;;  %v655_v20 = vadd.f32 %v273_v52, %v599_v24  ;;  %v301_v19 = vmul.f32 %v291_v17, %v645_v8 }
 0x20c   :  { %457 = vtanh.f32 %v334_v9  ;;  %v329_v15 = vmul.f32 0.7978846, %v319_v10  ;;  %v335_v12 = vmul.f32 0.7978846, %v325_v13  ;;  %v316_v22 = vmul.f32 %v306_v18, %v641_v4 }
 0x20d   :  { %v330_v21 = vmul.f32 0.7978846, %v320_v16  ;;  %v297_v23 = vmul.f32 0.044715, %v655_v20  ;;  %v311_v25 = vmul.f32 %v301_v19, %v645_v8  ;;  %v283_v41 = vmul.f32 0.5, %v605_v29 }
 0x20e   :  { %459 = vtanh.f32 %v329_v15  ;;  %v326_v27 = vadd.f32 %v316_v22, %v641_v4  ;;  %v278_v26 = vmul.f32 0.5, %v609_v34  ;;  %v284_v51 = vmul.f32 0.5, %v611_v35 }
 0x20f   :  { %461 = vtanh.f32 %v335_v12  ;;  %v307_v28 = vmul.f32 %v297_v23, %v655_v20  ;;  %v321_v30 = vadd.f32 %v311_v25, %v645_v8  ;;  %v279_v56 = vmul.f32 0.5, %v618_v42 }
 0x210   :  { %463 = vtanh.f32 %v330_v21  ;;  %v336_v24 = vmul.f32 0.7978846, %v326_v27  ;;  %v285_v34 = vmul.f32 0.5, %v621_v43  ;;  %v280_v60 = vmul.f32 0.5, %v626_v49 }
 0x211   :  { %v317_v31 = vmul.f32 %v307_v28, %v655_v20  ;;  %v331_v33 = vmul.f32 0.7978846, %v321_v30  ;;  %v286_v0 = vmul.f32 0.5, %v641_v4  ;;  %v281_v1 = vmul.f32 0.5, %v645_v8 }
 0x212   :  { %465 = vtanh.f32 %v336_v24  ;;  %v287_v7 = vmul.f32 0.5, %v655_v20 }
 0x213   :  { %v327_v38 = vadd.f32 %v317_v31, %v655_v20  ;;  %467 = vtanh.f32 %v331_v33 }
 0x214   :  { %v452_v32 = vpop.eup %451 }
 0x215   :  { %v352_v37 = vadd.f32 1.0, %v452_v32  ;;  %v337_v45 = vmul.f32 0.7978846, %v327_v38 }
 0x216   :  { %v454_v39 = vpop.eup %453 }
 0x217   :  { %v362_v40 = vmul.f32 %v352_v37, %v282_v36  ;;  %v353_v44 = vadd.f32 1.0, %v454_v39  ;;  %469 = vtanh.f32 %v337_v45 }
 0x218   :  { %v456_v46 = vpop.eup %455 }
 0x219   :  { %v458_v47 = vpop.eup %457  ;;  %372 = vst [vmem:[%s711_s5 + $0x20] sm:$0xff] %v362_v40  ;;  %v363_v48 = vmul.f32 %v353_v44, %v283_v41  ;;  %v348_v50 = vadd.f32 1.0, %v456_v46 }
 0x21a   :  { %v354_v52 = vadd.f32 1.0, %v458_v47 }
 0x21b   :  { %v460_v53 = vpop.eup %459  ;;  %373 = vst [vmem:[%s711_s5 + $0x28] sm:$0xff] %v363_v48  ;;  %v358_v29 = vmul.f32 %v348_v50, %v278_v26 }
 0x21c   :  { %v462_v54 = vpop.eup %461  ;;  %v364_v55 = vmul.f32 %v354_v52, %v284_v51  ;;  %v349_v57 = vadd.f32 1.0, %v460_v53 }
 0x21d   :  { %v464_v58 = vpop.eup %463  ;;  %368 = vst [vmem:[%s711_s5] sm:$0xff] %v358_v29  ;;  %v355_v35 = vadd.f32 1.0, %v462_v54 }
 0x21e   :  { %374 = vst [vmem:[%s711_s5 + $0x30] sm:$0xff] %v364_v55  ;;  %v359_v59 = vmul.f32 %v349_v57, %v279_v56  ;;  %v350_v61 = vadd.f32 1.0, %v464_v58 }
 0x21f   :  { %v365_v62 = vmul.f32 %v355_v35, %v285_v34  ;;  %v466_v43 = vpop.eup %465 }
 0x220   :  { %369 = vst [vmem:[%s711_s5 + $0x8] sm:$0xff] %v359_v59  ;;  %v360_v42 = vmul.f32 %v350_v61, %v280_v60  ;;  %v468_v63 = vpop.eup %467  ;;  %v356_v49 = vadd.f32 1.0, %v466_v43 }
 0x221   :  { %375 = vst [vmem:[%s711_s5 + $0x38] sm:$0xff] %v365_v62  ;;  %v351_v2 = vadd.f32 1.0, %v468_v63 }
 0x222   :  { %370 = vst [vmem:[%s711_s5 + $0x10] sm:$0xff] %v360_v42  ;;  %v366_v3 = vmul.f32 %v356_v49, %v286_v0 }
 0x223   :  { %v361_v6 = vmul.f32 %v351_v2, %v281_v1 }
 0x224   :  { %v470_v5 = vpop.eup %469  ;;  %376 = vst [vmem:[%s711_s5 + $0x40] sm:$0xff] %v366_v3 }
 0x225   :  { %v357_v9 = vadd.f32 1.0, %v470_v5  ;;  %371 = vst [vmem:[%s711_s5 + $0x18] sm:$0xff] %v361_v6 }
 0x227   :  { %v367_v10 = vmul.f32 %v357_v9, %v287_v7 }
 0x229   :  { %377 = vst [vmem:[%s711_s5 + $0x48] sm:$0xff] %v367_v10 }

// kernel: hubert_forward.26
= control target key start
LH: loop header
LB: loop body
LE: loop exit
PB: predicated region body
PF: predicated region fallthrough
CT: control target
= control target key end

     0   :  { %s1743_s21 = smov 0   ;;  %s1947_s0 = inlined_call_operand.vmem [shape: bf16[2,19,128], index: 0, kind: input, shape index: {}]   ;;  %s1948_s1 = inlined_call_operand.vmem [shape: bf16[2,19,128], index: 1, kind: input, shape index: {}]   ;;  %s1949_s2 = inlined_call_operand.vmem [shape: bf16[2,19,128], index: 2, kind: input, shape index: {}]   ;;  %s1950_s3 = inlined_call_operand.vmem [shape: bf16[128,128], index: 3, kind: input, shape index: {}]   ;;  %s1951_s4 = inlined_call_operand.vmem [shape: f32[1,128], index: 4, kind: input, shape index: {}]   ;;  %s1952_s5 = inlined_call_operand.vmem [shape: f32[2,19,128], index: 5, kind: input, shape index: {}]   ;;  %s1953_s6 = inlined_call_operand.vmem [shape: f32[2,19,128], index: 6, kind: output, shape index: {}]  }
   0x1 LB: > { %s1417_s22 = sadd.s32 4294967295, %s1702_s21   ;;  %p1421_p0 = scmp.ge.s32.totalorder %s1702_s21, 1  ;;  %s1702_s21 = sphi %s1743_s21, %s16_s21  }
   0x2   : > { %p242_p1 = scmp.lt.s32.totalorder %s1702_s21, 3 }
   0x4   : > { %p243_p2 = pnand %p1421_p0, %p242_p1 }
   0x5   : > { %p287_p3 = scmp.lt.s32.totalorder (!%p243_p2), %s1417_s22, 1  ;;  %s1705_s9 = smov (!%p243_p2), 96  }
   0x6   : > { %246 = sbr.rel (%p243_p2) target bundleno = 2443 (0x98b), region = 44  ;;  %s1706_s14 = smov (!%p243_p2), 64  }
   0x7   : > { %s1707_s19 = smov (!%p243_p2), 32  }
   0xb   : > { %s1955_s22 = smov (!%p287_p3, %s1417_s22), 1  ;;  %vm354_vm0 = vcmask 261120   ;;  %vm425_vm1 = vcmask 149504   ;;  %vm418_vm2 = vcmask 154624   ;;  %vm470_vm3 = vcmask 1040384   ;;  %v1640_v54 = vld [vmem:[%s1950_s3 + $0x8] sm:$0xff]  }
   0xc   : > { %s1754_s23 = smul.u32 12, %s1955_s22  ;;  %vm471_vm4 = vcmask 1041408   ;;  %v1704_v32 = vmov 65535   ;;  %v1641_v55 = vld [vmem:[%s1950_s3] sm:$0xff]  }
   0xd   : > { %v472_v33 = vsel %vm470_vm3, 4294967295, %v1704_v32  ;;  %s1621_s30 = smul.u32 24, %s1955_s22 }
   0xe   : > { %s296_s26 = scalar_lea.vmem %s1948_s1, %s1754_s23  ;;  %s291_s29 = scalar_lea.vmem %s1947_s0, %s1754_s23  ;;  %v1796_v34 = vsel %vm471_vm4, %v472_v33, 0 }
   0xf   : > { %v1764_v0 = vld [vmem:[%s296_s26 + $0x8] ss:$0 sps:$4 sm:$0x33]   ;;  %v1766_v1 = vld [vmem:[%s296_s26] sm:$0xff]   ;;  %s301_s8 = scalar_lea.vmem %s1949_s2, %s1754_s23 }
  0x10   : > { %1612 = vmatprep.subr.msk.bf16.mxu0 %vm354_vm0, %v1764_v0  ;;  %v365_v2 = vsel %vm354_vm0, %v1764_v0, 0  ;;  %v1772_v3 = vld [vmem:[%s291_s29] sm:$0xff]   ;;  %v362_v4 = vsel %vm354_vm0, %v1766_v1, 0  ;;  %v1780_v5 = vld [vmem:[%s291_s29 + $0x8] ss:$0 sps:$4 sm:$0x33]  }
  0x11   : > { %1517 = vmatpush3.bf16.xpose.msra.mxu0 %v365_v2  ;;  %1520 = vmatprep.mubr.msk.bf16.mxu0 %vm354_vm0, %v1772_v3  ;;  %v1794_v31 = vld [vmem:[%s301_s8 + $0x8] ss:$0 sps:$4 sm:$0x33]   ;;  %v1800_v36 = vld [vmem:[%s301_s8] sm:$0xff]  }
  0x12   : > { %1613 = vmatprep.subr.msk.bf16.mxu0 %vm354_vm0, %v1766_v1  ;;  %v475_v35 = vand.u32 %v1794_v31, %v1796_v34 }
  0x14   : > { %1524 = vmatprep.subr.bf16.mxu1 %v475_v35 }
  0x15   : > { %1525 = vmatpush3.bf16.msra.mxu1 %v475_v35 }
  0x16   : > { %1526 = vmatprep.subr.bf16.mxu1 %v1800_v36 }
  0x19   : > { %1519 = vmatpush3.bf16.xpose.msra.mxu0 %v362_v4  ;;  %1527 = vmatpush3.bf16.msra.mxu1 %v1800_v36 }
  0x20   : > { %1521 = vmatmul.mubr.msk.bf16.vlgmr.msra.gmra.mxu0 %vm354_vm0, %v1780_v5 }
  0xe0   : > { %v1522_v6 = vpop.f32.mrf.mxu0 }
  0xe1   : > { %v417_v7 = vmul.f32 0.17677669, %v1522_v6 }
  0xe2   : > { %v401_v8 = vpop.f32.mrf.mxu0 }
  0xe3   : > { %v415_v9 = vmul.f32 0.17677669, %v401_v8  ;;  %v426_v10 = vsel %vm425_vm1, %v417_v7, -inf }
  0xe4   : > { %427 = vmax.xlane.f32.xlu1 %v426_v10  ;;  %v1523_v11 = vpop.f32.mrf.mxu0 }
  0xe5   : > { %v419_v12 = vsel %vm418_vm2, %v415_v9, -inf }
  0xe6   : > { %420 = vmax.xlane.f32.xlu0 %v419_v12  ;;  %v404_v13 = vpop.f32.mrf.mxu0 }
  0xe7   : > { %v416_v14 = vmul.f32 0.17677669, %v404_v13 }
  0xe9   : > { %v422_v15 = vsel %vm418_vm2, %v416_v14, -inf }
  0xea   : > { %423 = vmax.xlane.f32.xlu0 %v422_v15 }
 0x16d   : > { %v428_v16 = vpop.xlane.xlu1 %427 }
 0x16e   : > { %v431_v17 = vsub.f32 %v417_v7, %v428_v16 }
 0x16f   : > { %v421_v18 = vpop.xlane.xlu0 %420 }
 0x170   : > { %v429_v19 = vsub.f32 %v415_v9, %v421_v18  ;;  %v436_v20 = vmul.f32 1.442695, %v431_v17 }
 0x172   : > { %v432_v21 = vmul.f32 1.442695, %v429_v19 }
 0x173   : > { %v424_v22 = vpop.xlane.xlu0 %423 }
 0x174   : > { %1648 = vpow2.f32 %v432_v21  ;;  %v430_v23 = vsub.f32 %v416_v14, %v424_v22 }
 0x175   : > { %1650 = vpow2.f32 %v436_v20 }
 0x176   : > { %v434_v24 = vmul.f32 1.442695, %v430_v23 }
 0x178   : > { %1652 = vpow2.f32 %v434_v24 }
 0x181   : > { %v1649_v25 = vpop.eup %1648 }
 0x182   : > { %v438_v26 = vsel %vm418_vm2, %v1649_v25, 0.0  ;;  %v1651_v27 = vpop.eup %1650 }
 0x183   : > { %439 = vadd.xlane.f32.xlu1 %v438_v26  ;;  %v444_v29 = vsel %vm425_vm1, %v1651_v27, 0.0 }
 0x185   : > { %v1653_v28 = vpop.eup %1652 }
 0x186   : > { %v441_v30 = vsel %vm418_vm2, %v1653_v28, 0.0 }
 0x187   : > { %445 = vadd.xlane.f32.xlu1 %v444_v29  ;;  %442 = vadd.xlane.f32.xlu0 %v441_v30 }
 0x198   : > { %531 = vrot.lane.b32.xlu1 %v1766_v1, %s1705_s9 }
 0x19c   : > { %527 = vrot.lane.b32.xlu1 %v1772_v3, %s1705_s9 }
 0x19d   : > { %533 = vrot.lane.b32.xlu0 %v1764_v0, %s1705_s9 }
 0x1a0   : > { %529 = vrot.lane.b32.xlu1 %v1780_v5, %s1705_s9 }
 0x20c   : > { %v440_v37 = vpop.xlane.xlu1 %439 }
 0x20d   : > { %1654 = vrcp.f32 %v440_v37 }
 0x210   : > { %v446_v38 = vpop.xlane.xlu1 %445  ;;  %v443_v39 = vpop.xlane.xlu0 %442 }
 0x211   : > { %1656 = vrcp.f32 %v446_v38 }
 0x212   : > { %1658 = vrcp.f32 %v443_v39 }
 0x214   : > { %v534_v40 = vpop.permute.xlu0 %533  ;;  %v532_v42 = vpop.permute.xlu1 %531 }
 0x215   : > { %1614 = vmatprep.subr.msk.bf16.mxu1 %vm354_vm0, %v534_v40  ;;  %v545_v50 = vsel %vm354_vm0, %v534_v40, 0  ;;  %v542_v52 = vsel %vm354_vm0, %v532_v42, 0 }
 0x218   : > { %v528_v51 = vpop.permute.xlu1 %527 }
 0x21a   : > { %v1655_v41 = vpop.eup %1654 }
 0x21b   : > { %v450_v46 = vmul.f32 %v1655_v41, %v1649_v25 }
 0x21c   : > { %v530_v53 = vpop.permute.xlu1 %529 }
 0x21e   : > { %v1657_v43 = vpop.eup %1656 }
 0x21f   : > { %v1659_v44 = vpop.eup %1658  ;;  %v452_v45 = vmul.f32 %v1657_v43, %v1651_v27 }
 0x220   : > { %v451_v47 = vmul.f32 %v1659_v44, %v1653_v28 }
 0x221   : > { %v454_v48 = vpack.c.bf16 %v452_v45, %v452_v45 }
 0x222   : > { %v453_v49 = vpack.c.bf16 %v451_v47, %v450_v46  ;;  %v1642_v47 = vld [vmem:[%s1950_s3 + $0x18] sm:$0xff]  }
 0x224   : > { %1528 = vmatprep.mubr.msk.bf16.mxu1 %vm418_vm2, %v453_v49 }
 0x225   : > { %1529 = vmatmul.mubr.msk.bf16.vlgmr.msra.gmra.mxu1 %vm418_vm2, %v454_v48  ;;  %v1643_v48 = vld [vmem:[%s1950_s3 + $0x10] sm:$0xff]  }
 0x226   : > { %1533 = vmatpush3.bf16.xpose.msra.mxu1 %v545_v50  ;;  %1536 = vmatprep.mubr.msk.bf16.mxu1 %vm354_vm0, %v528_v51 }
 0x227   : > { %1615 = vmatprep.subr.msk.bf16.mxu1 %vm354_vm0, %v532_v42 }
 0x22e   : > { %1535 = vmatpush3.bf16.xpose.msra.mxu1 %v542_v52 }
 0x22f   : > { %1556 = vmatprep.subr.bf16.mxu1 %v1640_v54 }
 0x235   : > { %1537 = vmatmul.mubr.msk.bf16.vlgmr.msra.gmra.mxu1 %vm354_vm0, %v530_v53 }
 0x236   : > { %1557 = vmatpush3.bf16.msra.mxu1 %v1640_v54 }
 0x237   : > { %1558 = vmatprep.subr.bf16.mxu1 %v1641_v55 }
 0x23a   : > { %1559 = vmatpush3.bf16.msra.mxu1 %v1641_v55 }
 0x2e5   : > { %v1530_v56 = vpop.f32.mrf.mxu1 }
 0x2e6   : > { %v526_v61 = vpack.c.bf16 %v1530_v56, %v1530_v56 }
 0x2e7   : > { %v511_v57 = vpop.f32.mrf.mxu1 }
 0x2e9   : > { %v1531_v58 = vpop.f32.mrf.mxu1 }
 0x2eb   : > { %v514_v59 = vpop.f32.mrf.mxu1 }
 0x2ec   : > { %v525_v60 = vpack.c.bf16 %v514_v59, %v511_v57 }
 0x2ee   : > { %1560 = vmatprep.mubr.msk.bf16.mxu1 %vm354_vm0, %v525_v60 }
 0x2ef   : > { %1561 = vmatmul.mubr.msk.bf16.vlgmr.msra.gmra.mxu1 %vm354_vm0, %v526_v61 }
 0x2f5   : > { %v1538_v62 = vpop.f32.mrf.mxu1 }
 0x2f6   : > { %v597_v6 = vmul.f32 0.17677669, %v1538_v62 }
 0x2f7   : > { %v581_v63 = vpop.f32.mrf.mxu1 }
 0x2f8   : > { %v595_v2 = vmul.f32 0.17677669, %v581_v63  ;;  %v604_v10 = vsel %vm425_vm1, %v597_v6, -inf }
 0x2f9   : > { %v1539_v4 = vpop.f32.mrf.mxu1 }
 0x2fa   : > { %v598_v7 = vsel %vm418_vm2, %v595_v2, -inf }
 0x2fb   : > { %599 = vmax.xlane.f32.xlu0 %v598_v7  ;;  %v584_v8 = vpop.f32.mrf.mxu1 }
 0x2fc   : > { %v596_v9 = vmul.f32 0.17677669, %v584_v8 }
 0x2fe   : > { %v601_v11 = vsel %vm418_vm2, %v596_v9, -inf }
 0x2ff   : > { %605 = vmax.xlane.f32.xlu0 %v604_v10  ;;  %602 = vmax.xlane.f32.xlu1 %v601_v11 }
 0x384   : > { %v600_v12 = vpop.xlane.xlu0 %599 }
 0x385   : > { %v607_v13 = vsub.f32 %v595_v2, %v600_v12 }
 0x387   : > { %v610_v14 = vmul.f32 1.442695, %v607_v13 }
 0x388   : > { %v606_v15 = vpop.xlane.xlu0 %605  ;;  %v603_v16 = vpop.xlane.xlu1 %602 }
 0x389   : > { %1660 = vpow2.f32 %v610_v14  ;;  %v609_v17 = vsub.f32 %v597_v6, %v606_v15  ;;  %v608_v18 = vsub.f32 %v596_v9, %v603_v16 }
 0x38b   : > { %v614_v19 = vmul.f32 1.442695, %v609_v17  ;;  %v612_v20 = vmul.f32 1.442695, %v608_v18 }
 0x38d   : > { %1662 = vpow2.f32 %v614_v19 }
 0x38e   : > { %1664 = vpow2.f32 %v612_v20 }
 0x396   : > { %v1661_v21 = vpop.eup %1660 }
 0x397   : > { %v616_v22 = vsel %vm418_vm2, %v1661_v21, 0.0 }
 0x398   : > { %617 = vadd.xlane.f32.xlu0 %v616_v22 }
 0x39a   : > { %v1663_v23 = vpop.eup %1662 }
 0x39b   : > { %v1665_v24 = vpop.eup %1664  ;;  %v622_v25 = vsel %vm425_vm1, %v1663_v23, 0.0 }
 0x39c   : > { %623 = vadd.xlane.f32.xlu1 %v622_v25  ;;  %v619_v26 = vsel %vm418_vm2, %v1665_v24, 0.0 }
 0x39d   : > { %620 = vadd.xlane.f32.xlu0 %v619_v26 }
 0x3ad   : > { %633 = vrot.lane.b32.xlu1 %v1800_v36, %s1705_s9 }
 0x3af   : > { %v1836_v27 = vpop.f32.mrf.mxu1 }
 0x3b1   : > { %v1838_v28 = vpop.f32.mrf.mxu1  ;;  %835 = vrot.lane.b32.xlu1 %v1764_v0, %s1706_s14 }
 0x3b3   : > { %v1563_v29 = vpop.f32.mrf.mxu1  ;;  %635 = vrot.lane.b32.xlu0 %v1794_v31, %s1705_s9  ;;  %s306_s9 = scalar_lea.vmem %s1952_s5, %s1621_s30 }
 0x3b5   : > { %833 = vrot.lane.b32.xlu1 %v1766_v1, %s1706_s14 }
 0x3b7   : > { %829 = vrot.lane.b32.xlu0 %v1772_v3, %s1706_s14 }
 0x3b9   : > { %831 = vrot.lane.b32.xlu1 %v1780_v5, %s1706_s14 }
 0x3bb   : > { %1074 = vrot.lane.b32.xlu0 %v1764_v0, %s1707_s19 }
 0x3bd   : > { %1072 = vrot.lane.b32.xlu1 %v1766_v1, %s1707_s19 }
 0x3bf   : > { %1068 = vrot.lane.b32.xlu0 %v1772_v3, %s1707_s19 }
 0x3c1   : > { %1070 = vrot.lane.b32.xlu1 %v1780_v5, %s1707_s19 }
 0x421   : > { %v618_v30 = vpop.xlane.xlu0 %617 }
 0x422   : > { %1666 = vrcp.f32 %v618_v30 }
 0x425   : > { %v624_v32 = vpop.xlane.xlu1 %623 }
 0x426   : > { %v621_v33 = vpop.xlane.xlu0 %620  ;;  %1668 = vrcp.f32 %v624_v32 }
 0x427   : > { %1670 = vrcp.f32 %v621_v33 }
 0x429   : > { %v634_v38 = vpop.permute.xlu1 %633 }
 0x42a   : > { %v636_v35 = vpop.permute.xlu0 %635 }
 0x42b   : > { %v645_v37 = vand.u32 %v636_v35, %v1796_v34 }
 0x42d   : > { %1540 = vmatprep.subr.bf16.mxu0 %v645_v37  ;;  %v836_v49 = vpop.permute.xlu1 %835 }
 0x42e   : > { %1541 = vmatpush3.bf16.msra.mxu0 %v645_v37  ;;  %v847_v56 = vsel %vm354_vm0, %v836_v49, 0  ;;  %v830_v57 = vpop.permute.xlu0 %829 }
 0x42f   : > { %1542 = vmatprep.subr.bf16.mxu0 %v634_v38  ;;  %v1667_v39 = vpop.eup %1666 }
 0x430   : > { %v628_v43 = vmul.f32 %v1667_v39, %v1661_v21 }
 0x431   : > { %v834_v0 = vpop.permute.xlu1 %833 }
 0x432   : > { %1543 = vmatpush3.bf16.msra.mxu0 %v634_v38  ;;  %v844_v1 = vsel %vm354_vm0, %v834_v0, 0  ;;  %v1075_v5 = vpop.permute.xlu0 %1074 }
 0x433   : > { %v1669_v40 = vpop.eup %1668  ;;  %1548 = vmatprep.subr.bf16.mxu0 %v1642_v47  ;;  %v1086_v58 = vsel %vm354_vm0, %v1075_v5, 0 }
 0x434   : > { %v1671_v41 = vpop.eup %1670  ;;  %v630_v42 = vmul.f32 %v1669_v40, %v1663_v23 }
 0x435   : > { %v629_v44 = vmul.f32 %v1671_v41, %v1665_v24  ;;  %v832_v3 = vpop.permute.xlu1 %831 }
 0x436   : > { %v632_v45 = vpack.c.bf16 %v630_v42, %v630_v42  ;;  %v1069_v61 = vpop.permute.xlu0 %1068 }
 0x437   : > { %v631_v46 = vpack.c.bf16 %v629_v44, %v628_v43 }
 0x439   : > { %1544 = vmatprep.mubr.msk.bf16.mxu0 %vm418_vm2, %v631_v46  ;;  %v1073_v59 = vpop.permute.xlu1 %1072 }
 0x43a   : > { %1545 = vmatmul.mubr.msk.bf16.vlgmr.msra.gmra.mxu0 %vm418_vm2, %v632_v45  ;;  %v1083_v60 = vsel %vm354_vm0, %v1073_v59, 0 }
 0x43b   : > { %1549 = vmatpush3.bf16.msra.mxu0 %v1642_v47 }
 0x43c   : > { %1550 = vmatprep.subr.bf16.mxu0 %v1643_v48 }
 0x43d   : > { %v1071_v62 = vpop.permute.xlu1 %1070 }
 0x43f   : > { %1551 = vmatpush3.bf16.msra.mxu0 %v1643_v48 }
 0x440   : > { %1616 = vmatprep.subr.msk.bf16.mxu0 %vm354_vm0, %v836_v49 }
 0x4fa   : > { %v1546_v50 = vpop.f32.mrf.mxu0 }
 0x4fb   : > { %v696_v55 = vpack.c.bf16 %v1546_v50, %v1546_v50 }
 0x4fc   : > { %v681_v51 = vpop.f32.mrf.mxu0 }
 0x4fe   : > { %v1547_v52 = vpop.f32.mrf.mxu0 }
 0x500   : > { %v684_v53 = vpop.f32.mrf.mxu0 }
 0x501   : > { %v695_v54 = vpack.c.bf16 %v684_v53, %v681_v51 }
 0x503   : > { %1552 = vmatprep.mubr.msk.bf16.mxu0 %vm354_vm0, %v695_v54 }
 0x504   : > { %1553 = vmatmul.mubr.msk.bf16.vlgmr.msra.gmra.mxu0 %vm354_vm0, %v696_v55 }
 0x505   : > { %1565 = vmatpush3.bf16.xpose.msra.mxu0 %v847_v56  ;;  %1568 = vmatprep.mubr.msk.bf16.mxu0 %vm354_vm0, %v830_v57 }
 0x506   : > { %1617 = vmatprep.subr.msk.bf16.mxu0 %vm354_vm0, %v834_v0 }
 0x50d   : > { %1567 = vmatpush3.bf16.xpose.msra.mxu0 %v844_v1 }
 0x50e   : > { %1618 = vmatprep.subr.msk.bf16.mxu0 %vm354_vm0, %v1075_v5 }
 0x514   : > { %1569 = vmatmul.mubr.msk.bf16.vlgmr.msra.gmra.mxu0 %vm354_vm0, %v832_v3 }
 0x515   : > { %1589 = vmatpush3.bf16.xpose.msra.mxu0 %v1086_v58  ;;  %1592 = vmatprep.mubr.msk.bf16.mxu0 %vm354_vm0, %v1069_v61 }
 0x516   : > { %1619 = vmatprep.subr.msk.bf16.mxu0 %vm354_vm0, %v1073_v59 }
 0x51d   : > { %1591 = vmatpush3.bf16.xpose.msra.mxu0 %v1083_v60 }
 0x524   : > { %1593 = vmatmul.mubr.msk.bf16.vlgmr.msra.gmra.mxu0 %vm354_vm0, %v1071_v62 }
 0x5c4   : > { %v1881_v63 = vpop.f32.mrf.mxu0 }
 0x5c6   : > { %v1883_v2 = vpop.f32.mrf.mxu0 }
 0x5c8   : > { %v1555_v4 = vpop.f32.mrf.mxu0 }
 0x5ca   : > { %v1885_v6 = vpop.f32.mrf.mxu0 }
 0x5d4   : > { %v1570_v7 = vpop.f32.mrf.mxu0 }
 0x5d5   : > { %v899_v11 = vmul.f32 0.17677669, %v1570_v7 }
 0x5d6   : > { %v883_v8 = vpop.f32.mrf.mxu0 }
 0x5d7   : > { %v897_v9 = vmul.f32 0.17677669, %v883_v8  ;;  %v906_v15 = vsel %vm425_vm1, %v899_v11, -inf }
 0x5d8   : > { %v1571_v10 = vpop.f32.mrf.mxu0 }
 0x5d9   : > { %v900_v12 = vsel %vm418_vm2, %v897_v9, -inf }
 0x5da   : > { %901 = vmax.xlane.f32.xlu0 %v900_v12  ;;  %v886_v13 = vpop.f32.mrf.mxu0 }
 0x5db   : > { %v898_v14 = vmul.f32 0.17677669, %v886_v13 }
 0x5dd   : > { %v903_v16 = vsel %vm418_vm2, %v898_v14, -inf }
 0x5de   : > { %907 = vmax.xlane.f32.xlu0 %v906_v15  ;;  %904 = vmax.xlane.f32.xlu1 %v903_v16  ;;  %v1644_v15 = vld [vmem:[%s1950_s3 + $0x28] sm:$0xff]   ;;  %v1645_v16 = vld [vmem:[%s1950_s3 + $0x20] sm:$0xff]  }
 0x5e4   : > { %v1594_v17 = vpop.f32.mrf.mxu0 }
 0x5e5   : > { %v1138_v44 = vmul.f32 0.17677669, %v1594_v17  ;;  %v818_v17 = vpop.f32.mrf.mxu1 }
 0x5e6   : > { %v1122_v18 = vpop.f32.mrf.mxu0 }
 0x5e7   : > { %v1136_v41 = vmul.f32 0.17677669, %v1122_v18  ;;  %v1145_v46 = vsel %vm425_vm1, %v1138_v44, -inf }
 0x5e8   : > { %v1595_v19 = vpop.f32.mrf.mxu0 }
 0x5e9   : > { %v1139_v43 = vsel %vm418_vm2, %v1136_v41, -inf }
 0x5ea   : > { %v1125_v40 = vpop.f32.mrf.mxu0 }
 0x5eb   : > { %v1137_v42 = vmul.f32 0.17677669, %v1125_v40  ;;  %v1646_v40 = vld [vmem:[%s1950_s3 + $0x38] sm:$0xff]  }
 0x5ed   : > { %v1142_v45 = vsel %vm418_vm2, %v1137_v42, -inf }
 0x663   : > { %v902_v20 = vpop.xlane.xlu0 %901 }
 0x664   : > { %v909_v21 = vsub.f32 %v897_v9, %v902_v20 }
 0x666   : > { %v912_v22 = vmul.f32 1.442695, %v909_v21 }
 0x667   : > { %v908_v23 = vpop.xlane.xlu0 %907  ;;  %v905_v24 = vpop.xlane.xlu1 %904 }
 0x668   : > { %1672 = vpow2.f32 %v912_v22  ;;  %v911_v25 = vsub.f32 %v899_v11, %v908_v23  ;;  %v910_v26 = vsub.f32 %v898_v14, %v905_v24 }
 0x66a   : > { %v916_v29 = vmul.f32 1.442695, %v911_v25  ;;  %v914_v30 = vmul.f32 1.442695, %v910_v26 }
 0x66c   : > { %1674 = vpow2.f32 %v916_v29 }
 0x66d   : > { %1676 = vpow2.f32 %v914_v30 }
 0x675   : > { %v1673_v32 = vpop.eup %1672 }
 0x676   : > { %v918_v33 = vsel %vm418_vm2, %v1673_v32, 0.0 }
 0x677   : > { %919 = vadd.xlane.f32.xlu0 %v918_v33 }
 0x679   : > { %v1675_v35 = vpop.eup %1674 }
 0x67a   : > { %v1677_v37 = vpop.eup %1676  ;;  %v924_v38 = vsel %vm425_vm1, %v1675_v35, 0.0 }
 0x67b   : > { %925 = vadd.xlane.f32.xlu1 %v924_v38  ;;  %v921_v39 = vsel %vm418_vm2, %v1677_v37, 0.0 }
 0x67c   : > { %922 = vadd.xlane.f32.xlu0 %v921_v39 }
 0x68c   : > { %935 = vrot.lane.b32.xlu1 %v1800_v36, %s1706_s14 }
 0x692   : > { %937 = vrot.lane.b32.xlu0 %v1794_v31, %s1706_s14  ;;  %s311_s14 = scalar_lea.vmem %s1953_s6, %s1621_s30 }
 0x6b0   : > { %1140 = vmax.xlane.f32.xlu1 %v1139_v43 }
 0x6b1   : > { %1143 = vmax.xlane.f32.xlu0 %v1142_v45 }
 0x6b5   : > { %1146 = vmax.xlane.f32.xlu0 %v1145_v46 }
 0x700   : > { %v920_v47 = vpop.xlane.xlu0 %919 }
 0x701   : > { %1678 = vrcp.f32 %v920_v47 }
 0x704   : > { %v926_v48 = vpop.xlane.xlu1 %925 }
 0x705   : > { %v923_v49 = vpop.xlane.xlu0 %922  ;;  %1680 = vrcp.f32 %v926_v48 }
 0x706   : > { %1682 = vrcp.f32 %v923_v49  ;;  %v819_v49 = vadd.f32 %v818_v17, %v1885_v6 }
 0x708   : > { %v936_v52 = vpop.permute.xlu1 %935 }
 0x709   : > { %v938_v50 = vpop.permute.xlu0 %937 }
 0x70a   : > { %v947_v51 = vand.u32 %v938_v50, %v1796_v34 }
 0x70c   : > { %1572 = vmatprep.subr.bf16.mxu1 %v947_v51 }
 0x70d   : > { %1573 = vmatpush3.bf16.msra.mxu1 %v947_v51 }
 0x70e   : > { %1574 = vmatprep.subr.bf16.mxu1 %v936_v52  ;;  %v1679_v53 = vpop.eup %1678 }
 0x70f   : > { %v930_v57 = vmul.f32 %v1679_v53, %v1673_v32 }
 0x711   : > { %1575 = vmatpush3.bf16.msra.mxu1 %v936_v52 }
 0x712   : > { %v1681_v54 = vpop.eup %1680  ;;  %1580 = vmatprep.subr.bf16.mxu1 %v1644_v15 }
 0x713   : > { %v1683_v55 = vpop.eup %1682  ;;  %v932_v56 = vmul.f32 %v1681_v54, %v1675_v35 }
 0x714   : > { %v931_v0 = vmul.f32 %v1683_v55, %v1677_v37 }
 0x715   : > { %v934_v1 = vpack.c.bf16 %v932_v56, %v932_v56 }
 0x716   : > { %v933_v3 = vpack.c.bf16 %v931_v0, %v930_v57 }
 0x718   : > { %1576 = vmatprep.mubr.msk.bf16.mxu1 %vm418_vm2, %v933_v3  ;;  %v1317_v3 = vld [vmem:[%s306_s9] sm:$0xff] }
 0x719   : > { %1577 = vmatmul.mubr.msk.bf16.vlgmr.msra.gmra.mxu1 %vm418_vm2, %v934_v1 }
 0x71a   : > { %1581 = vmatpush3.bf16.msra.mxu1 %v1644_v15 }
 0x71b   : > { %1582 = vmatprep.subr.bf16.mxu1 %v1645_v16 }
 0x71e   : > { %1583 = vmatpush3.bf16.msra.mxu1 %v1645_v16 }
 0x739   : > { %v1141_v58 = vpop.xlane.xlu1 %1140 }
 0x73a   : > { %v1144_v5 = vpop.xlane.xlu0 %1143  ;;  %v1148_v61 = vsub.f32 %v1136_v41, %v1141_v58  ;;  %v1647_v41 = vld [vmem:[%s1950_s3 + $0x30] sm:$0xff]  }
 0x73b   : > { %v1149_v59 = vsub.f32 %v1137_v42, %v1144_v5  ;;  %v824_v42 = vadd.f32 %v1836_v27, %v1881_v63 }
 0x73c   : > { %v1151_v7 = vmul.f32 1.442695, %v1148_v61 }
 0x73d   : > { %v1153_v60 = vmul.f32 1.442695, %v1149_v59 }
 0x73e   : > { %v1147_v62 = vpop.xlane.xlu0 %1146 }
 0x73f   : > { %1684 = vpow2.f32 %v1153_v60  ;;  %v1150_v4 = vsub.f32 %v1138_v44, %v1147_v62  ;;  %v816_v44 = vadd.f32 %v1838_v28, %v1883_v2  ;;  %v1465_v28 = vld [vmem:[%s1951_s4] ss:$0 sm:$0xff]  ;;  %v1319_v2 = vld [vmem:[%s306_s9 + $0x10] sm:$0x7] }
 0x741   : > { %v1155_v8 = vmul.f32 1.442695, %v1150_v4  ;;  %v1318_v4 = vld [vmem:[%s306_s9 + $0x8] sm:$0xff] }
 0x743   : > { %1686 = vpow2.f32 %v1155_v8 }
 0x744   : > { %1688 = vpow2.f32 %v1151_v7 }
 0x74c   : > { %v1685_v9 = vpop.eup %1684 }
 0x74d   : > { %v1160_v10 = vsel %vm418_vm2, %v1685_v9, 0.0 }
 0x74e   : > { %1161 = vadd.xlane.f32.xlu0 %v1160_v10 }
 0x750   : > { %v1687_v11 = vpop.eup %1686 }
 0x751   : > { %v1163_v12 = vsel %vm425_vm1, %v1687_v11, 0.0  ;;  %v1689_v13 = vpop.eup %1688 }
 0x752   : > { %1164 = vadd.xlane.f32.xlu1 %v1163_v12  ;;  %v1157_v14 = vsel %vm418_vm2, %v1689_v13, 0.0 }
 0x756   : > { %1158 = vadd.xlane.f32.xlu1 %v1157_v14 }
 0x764   : > { %1176 = vrot.lane.b32.xlu0 %v1794_v31, %s1707_s19 }
 0x767   : > { %1174 = vrot.lane.b32.xlu1 %v1800_v36, %s1707_s19 }
 0x7d7   : > { %v1162_v18 = vpop.xlane.xlu0 %1161 }
 0x7d9   : > { %v1578_v19 = vpop.f32.mrf.mxu1 }
 0x7da   : > { %v998_v31 = vpack.c.bf16 %v1578_v19, %v1578_v19 }
 0x7db   : > { %v983_v20 = vpop.f32.mrf.mxu1  ;;  %v1165_v21 = vpop.xlane.xlu1 %1164 }
 0x7dc   : > { %v1177_v22 = vpop.permute.xlu0 %1176  ;;  %1690 = vrcp.f32 %v1165_v21 }
 0x7dd   : > { %v1579_v23 = vpop.f32.mrf.mxu1  ;;  %v1186_v24 = vand.u32 %v1177_v22, %v1796_v34  ;;  %1692 = vrcp.f32 %v1162_v18 }
 0x7df   : > { %v986_v25 = vpop.f32.mrf.mxu1  ;;  %v1159_v26 = vpop.xlane.xlu1 %1158  ;;  %1596 = vmatprep.subr.bf16.mxu1 %v1186_v24 }
 0x7e0   : > { %v997_v29 = vpack.c.bf16 %v986_v25, %v983_v20  ;;  %1694 = vrcp.f32 %v1159_v26 }
 0x7e2   : > { %1584 = vmatprep.mubr.msk.bf16.mxu1 %vm354_vm0, %v997_v29 }
 0x7e3   : > { %1585 = vmatmul.mubr.msk.bf16.vlgmr.msra.gmra.mxu1 %vm354_vm0, %v998_v31  ;;  %v1175_v36 = vpop.permute.xlu1 %1174 }
 0x7e4   : > { %1597 = vmatpush3.bf16.msra.mxu1 %v1186_v24 }
 0x7e5   : > { %1598 = vmatprep.subr.bf16.mxu1 %v1175_v36 }
 0x7e8   : > { %1599 = vmatpush3.bf16.msra.mxu1 %v1175_v36 }
 0x7e9   : > { %v1691_v30 = vpop.eup %1690  ;;  %1604 = vmatprep.subr.bf16.mxu1 %v1646_v40 }
 0x7ea   : > { %v1693_v32 = vpop.eup %1692  ;;  %v1171_v35 = vmul.f32 %v1691_v30, %v1687_v11 }
 0x7eb   : > { %v1170_v37 = vmul.f32 %v1693_v32, %v1685_v9 }
 0x7ec   : > { %v1173_v39 = vpack.c.bf16 %v1171_v35, %v1171_v35 }
 0x7ed   : > { %v1695_v33 = vpop.eup %1694 }
 0x7ee   : > { %v1169_v34 = vmul.f32 %v1695_v33, %v1689_v13 }
 0x7f0   : > { %v1172_v38 = vpack.c.bf16 %v1170_v37, %v1169_v34 }
 0x7f2   : > { %1600 = vmatprep.mubr.msk.bf16.mxu1 %vm418_vm2, %v1172_v38 }
 0x7f3   : > { %1601 = vmatmul.mubr.msk.bf16.vlgmr.msra.gmra.mxu1 %vm418_vm2, %v1173_v39 }
 0x7f4   : > { %1605 = vmatpush3.bf16.msra.mxu1 %v1646_v40 }
 0x7f5   : > { %1606 = vmatprep.subr.bf16.mxu1 %v1647_v41 }
 0x7f8   : > { %1607 = vmatpush3.bf16.msra.mxu1 %v1647_v41 }
 0x8a3   : > { %v1586_v43 = vpop.f32.mrf.mxu1 }
 0x8a4   : > { %v1067_v45 = vadd.f32 %v1586_v43, %v824_v42 }
 0x8a5   : > { %v1051_v46 = vpop.f32.mrf.mxu1 }
 0x8a6   : > { %v1065_v47 = vadd.f32 %v1051_v46, %v816_v44 }
 0x8a7   : > { %v1587_v48 = vpop.f32.mrf.mxu1 }
 0x8a9   : > { %v1054_v50 = vpop.f32.mrf.mxu1 }
 0x8aa   : > { %v1066_v51 = vadd.f32 %v1054_v50, %v819_v49 }
 0x8b3   : > { %v1602_v52 = vpop.f32.mrf.mxu1 }
 0x8b4   : > { %v1237_v57 = vpack.c.bf16 %v1602_v52, %v1602_v52 }
 0x8b5   : > { %v1222_v53 = vpop.f32.mrf.mxu1 }
 0x8b7   : > { %v1603_v54 = vpop.f32.mrf.mxu1 }
 0x8b9   : > { %v1225_v55 = vpop.f32.mrf.mxu1 }
 0x8ba   : > { %v1236_v56 = vpack.c.bf16 %v1225_v55, %v1222_v53 }
 0x8bc   : > { %1608 = vmatprep.mubr.msk.bf16.mxu1 %vm354_vm0, %v1236_v56 }
 0x8bd   : > { %1609 = vmatmul.mubr.msk.bf16.vlgmr.msra.gmra.mxu1 %vm354_vm0, %v1237_v57 }
 0x97d   : > { %v1610_v27 = vpop.f32.mrf.mxu1 }
 0x97e   : > { %v1306_v63 = vadd.f32 %v1610_v27, %v1067_v45 }
 0x97f   : > { %v1290_v6 = vpop.f32.mrf.mxu1 }
 0x980   : > { %v1316_v0 = vadd.f32 %v1465_v28, %v1306_v63  ;;  %v1304_v1 = vadd.f32 %v1290_v6, %v1065_v47 }
 0x981   : > { %v1611_v5 = vpop.f32.mrf.mxu1 }
 0x982   : > { %v1322_v58 = vadd.f32 %v1319_v2, %v1316_v0  ;;  %v1314_v59 = vadd.f32 %v1465_v28, %v1304_v1 }
 0x983   : > { %v1293_v60 = vpop.f32.mrf.mxu1 }
 0x984   : > { %1325 = vst [vmem:[%s311_s14 + $0x10] sm:$0x7] %v1322_v58  ;;  %v1320_v61 = vadd.f32 %v1317_v3, %v1314_v59  ;;  %v1305_v62 = vadd.f32 %v1293_v60, %v1066_v51 }
 0x986   : > { %1323 = vst [vmem:[%s311_s14] sm:$0xff] %v1320_v61  ;;  %v1315_v7 = vadd.f32 %v1465_v28, %v1305_v62 }
 0x988   : > { %v1321_v8 = vadd.f32 %v1318_v4, %v1315_v7 }
 0x98a   : > { %1324 = vst [vmem:[%s311_s14 + $0x8] sm:$0xff] %v1321_v8 }
 0x98b PF: > { %s16_s21 = sadd.s32 1, %s1702_s21  }
 0x98c   : > { %p13_p4 = scmp.ge.s32.totalorder %s16_s21, 4  }
 0x98e   :  { %15 = sbr.rel (!%p13_p4) target bundleno = 1 (0x1), region = 83 }

// kernel: hubert_forward.28
= control target key start
LH: loop header
LB: loop body
LE: loop exit
PB: predicated region body
PF: predicated region fallthrough
CT: control target
= control target key end

     0   :  { %s515_s1 = inlined_call_operand.vmem [shape: bf16[256,128], index: 1, kind: input, shape index: {}]   ;;  %s516_s0 = inlined_call_operand.vmem [shape: bf16[40,256], index: 0, kind: input, shape index: {}]   ;;  %s517_s2 = inlined_call_operand.vmem [shape: f32[1,128], index: 2, kind: input, shape index: {}]   ;;  %s518_s3 = inlined_call_operand.vmem [shape: f32[40,128], index: 3, kind: input, shape index: {}]   ;;  %s519_s4 = inlined_call_operand.vmem [shape: f32[40,128], index: 4, kind: output, shape index: {}]  }
   0x1   :  { %v370_v0 = vld [vmem:[%s515_s1 + $0x78] sm:$0xff]   ;;  %v372_v2 = vld [vmem:[%s515_s1 + $0x70] sm:$0xff]   ;;  %v374_v4 = vld [vmem:[%s515_s1 + $0x68] sm:$0xff]  }
   0x2   :  { %v371_v1 = vld [vmem:[%s515_s1 + $0x38] sm:$0xff]   ;;  %320 = vmatprep.subr.bf16.mxu0 %v370_v0  ;;  %354 = vmatprep.subr.bf16.mxu1 %v370_v0  ;;  %v373_v3 = vld [vmem:[%s515_s1 + $0x30] sm:$0xff]   ;;  %v375_v5 = vld [vmem:[%s515_s1 + $0x28] sm:$0xff]  }
   0x3   :  { %321 = vmatpush3.bf16.msra.mxu0 %v371_v1  ;;  %362 = vmatpush3.bf16.msra.mxu1 %v371_v1  ;;  %v376_v6 = vld [vmem:[%s515_s1 + $0x60] sm:$0xff]   ;;  %v378_v8 = vld [vmem:[%s515_s1 + $0x58] sm:$0xff]   ;;  %v380_v10 = vld [vmem:[%s515_s1 + $0x50] sm:$0xff]  }
   0x4   :  { %322 = vmatprep.subr.bf16.mxu0 %v372_v2  ;;  %355 = vmatprep.subr.bf16.mxu1 %v372_v2  ;;  %v377_v7 = vld [vmem:[%s515_s1 + $0x20] sm:$0xff]   ;;  %v379_v9 = vld [vmem:[%s515_s1 + $0x18] sm:$0xff]   ;;  %v381_v13 = vld [vmem:[%s515_s1 + $0x10] sm:$0xff]  }
   0x5   :  { %v388_v11 = vld [vmem:[%s516_s0 + $0x4] ss:$8 sps:$4 sm:$0xff]   ;;  %v391_v12 = vld [vmem:[%s516_s0 + $0x14] ss:$8 sps:$4 sm:$0xff]   ;;  %v386_v19 = vld [vmem:[%s516_s0] ss:$8 sps:$4 sm:$0xff]  }
   0x6   :  { %v382_v14 = vld [vmem:[%s515_s1 + $0x48] sm:$0xff]   ;;  %224 = vmatprep.mubr.bf16.mxu0 %v388_v11  ;;  %232 = vmatprep.mubr.bf16.mxu1 %v391_v12  ;;  %v384_v16 = vld [vmem:[%s515_s1 + $0x40] sm:$0xff]   ;;  %v389_v20 = vld [vmem:[%s516_s0 + $0x10] ss:$8 sps:$4 sm:$0xff]  }
   0x7   :  { %323 = vmatpush3.bf16.msra.mxu0 %v373_v3  ;;  %363 = vmatpush3.bf16.msra.mxu1 %v373_v3  ;;  %v383_v15 = vld [vmem:[%s515_s1 + $0x8] sm:$0xff]   ;;  %v385_v17 = vld [vmem:[%s515_s1] sm:$0xff]   ;;  %v280_v31 = vld [vmem:[%s518_s3 + $0x10] sm:$0xff] }
   0x8   :  { %324 = vmatprep.subr.bf16.mxu0 %v374_v4  ;;  %356 = vmatprep.subr.bf16.mxu1 %v374_v4  ;;  %v36_v18 = vld [vmem:[%s516_s0 + $0x20] sm:$0xff]  ;;  %v279_v42 = vld [vmem:[%s518_s3 + $0x8] sm:$0xff]  ;;  %v281_v43 = vld [vmem:[%s518_s3 + $0x18] sm:$0xff] }
   0x9   :  { %v302_v21 = vcombine.high %v36_v18, %v36_v18  ;;  %v301_v22 = vcombine.low %v36_v18, %v36_v18  ;;  %v319_v26 = vld [vmem:[%s517_s2] ss:$0 sm:$0xff] }
   0xa   :  { %v278_v30 = vld [vmem:[%s518_s3] sm:$0xff] }
   0xb   :  { %325 = vmatpush3.bf16.msra.mxu0 %v375_v5  ;;  %364 = vmatpush3.bf16.msra.mxu1 %v375_v5  ;;  %v282_v51 = vld [vmem:[%s518_s3 + $0x20] sm:$0xff] }
   0xc   :  { %326 = vmatprep.subr.bf16.mxu0 %v376_v6  ;;  %357 = vmatprep.subr.bf16.mxu1 %v376_v6 }
   0xf   :  { %327 = vmatpush3.bf16.msra.mxu0 %v377_v7  ;;  %365 = vmatpush3.bf16.msra.mxu1 %v377_v7 }
  0x10   :  { %328 = vmatprep.subr.bf16.mxu0 %v378_v8  ;;  %358 = vmatprep.subr.bf16.mxu1 %v378_v8 }
  0x13   :  { %329 = vmatpush3.bf16.msra.mxu0 %v379_v9  ;;  %366 = vmatpush3.bf16.msra.mxu1 %v379_v9 }
  0x14   :  { %330 = vmatprep.subr.bf16.mxu0 %v380_v10  ;;  %359 = vmatprep.subr.bf16.mxu1 %v380_v10 }
  0x17   :  { %331 = vmatpush3.bf16.msra.mxu0 %v381_v13  ;;  %367 = vmatpush3.bf16.msra.mxu1 %v381_v13 }
  0x18   :  { %332 = vmatprep.subr.bf16.mxu0 %v382_v14  ;;  %360 = vmatprep.subr.bf16.mxu1 %v382_v14 }
  0x1b   :  { %333 = vmatpush3.bf16.msra.mxu0 %v383_v15  ;;  %368 = vmatpush3.bf16.msra.mxu1 %v383_v15 }
  0x1c   :  { %334 = vmatprep.subr.bf16.mxu0 %v384_v16  ;;  %361 = vmatprep.subr.bf16.mxu1 %v384_v16 }
  0x1f   :  { %335 = vmatpush3.bf16.msra.mxu0 %v385_v17  ;;  %369 = vmatpush3.bf16.msra.mxu1 %v385_v17 }
  0x22   :  { %225 = vmatmul.mubr.bf16.vlgmr.msra.gmra.mxu0 %v386_v19  ;;  %233 = vmatmul.mubr.bf16.vlgmr.msra.gmra.mxu1 %v389_v20 }
  0x23   :  { %240 = vmatprep.mubr.bf16.mxu1 %v302_v21 }
  0x2a   :  { %241 = vmatmul.mubr.bf16.gmra.mxu1 %v301_v22 }
  0xe2   :  { %v336_v23 = vpop.f32.mrf.mxu0  ;;  %v342_v24 = vpop.f32.mrf.mxu1 }
  0xe4   :  { %v337_v25 = vpop.f32.mrf.mxu0  ;;  %v343_v27 = vpop.f32.mrf.mxu1 }
  0xe5   :  { %v338_v28 = vadd.f32 %v337_v25, %v336_v23  ;;  %v344_v29 = vadd.f32 %v343_v27, %v342_v24 }
  0xe6   :  { %v339_v32 = vpop.f32.mrf.mxu0  ;;  %v345_v33 = vpop.f32.mrf.mxu1 }
  0xe7   :  { %v273_v34 = vadd.f32 %v338_v28, %v319_v26  ;;  %v275_v35 = vadd.f32 %v344_v29, %v319_v26 }
  0xe8   :  { %v340_v36 = vpop.f32.mrf.mxu0  ;;  %v346_v37 = vpop.f32.mrf.mxu1 }
  0xe9   :  { %v283_v38 = vadd.f32 %v278_v30, %v273_v34  ;;  %v285_v39 = vadd.f32 %v280_v31, %v275_v35  ;;  %v341_v40 = vadd.f32 %v340_v36, %v339_v32  ;;  %v347_v41 = vadd.f32 %v346_v37, %v345_v33 }
  0xea   :  { %v348_v44 = vpop.f32.mrf.mxu1 }
  0xeb   :  { %288 = vst [vmem:[%s519_s4] sm:$0xff] %v283_v38  ;;  %290 = vst [vmem:[%s519_s4 + $0x10] sm:$0xff] %v285_v39  ;;  %v274_v45 = vadd.f32 %v341_v40, %v319_v26  ;;  %v276_v46 = vadd.f32 %v347_v41, %v319_v26 }
  0xec   :  { %v349_v47 = vpop.f32.mrf.mxu1 }
  0xed   :  { %v284_v48 = vadd.f32 %v279_v42, %v274_v45  ;;  %v286_v49 = vadd.f32 %v281_v43, %v276_v46  ;;  %v350_v50 = vadd.f32 %v349_v47, %v348_v44 }
  0xee   :  { %v351_v52 = vpop.f32.mrf.mxu1 }
  0xef   :  { %289 = vst [vmem:[%s519_s4 + $0x8] sm:$0xff] %v284_v48  ;;  %291 = vst [vmem:[%s519_s4 + $0x18] sm:$0xff] %v286_v49  ;;  %v277_v53 = vadd.f32 %v350_v50, %v319_v26 }
  0xf0   :  { %v352_v54 = vpop.f32.mrf.mxu1 }
  0xf1   :  { %v287_v55 = vadd.f32 %v282_v51, %v277_v53 }
  0xf3   :  { %292 = vst [vmem:[%s519_s4 + $0x20] sm:$0xff] %v287_v55 }

// kernel: hubert_forward.33
= control target key start
LH: loop header
LB: loop body
LE: loop exit
PB: predicated region body
PF: predicated region fallthrough
CT: control target
= control target key end

     0   :  { %s176_s0 = inlined_call_operand.vmem [shape: f32[40,128], index: 0, kind: input, shape index: {}]   ;;  %s177_s1 = inlined_call_operand.vmem [shape: f32[1,128], index: 1, kind: input, shape index: {}]   ;;  %s178_s2 = inlined_call_operand.vmem [shape: f32[1,128], index: 2, kind: input, shape index: {}]   ;;  %s179_s3 = inlined_call_operand.vmem [shape: f32[40,128], index: 3, kind: output, shape index: {}]  }
   0x1   :  { %v14_v0 = vld [vmem:[%s176_s0] sm:$0xff]  ;;  %v16_v1 = vld [vmem:[%s176_s0 + $0x10] sm:$0xff]  ;;  %v15_v2 = vld [vmem:[%s176_s0 + $0x8] sm:$0xff] }
   0x2   :  { %19 = vadd.xlane.f32.xlu0 %v14_v0  ;;  %23 = vadd.xlane.f32.xlu1 %v16_v1  ;;  %v17_v3 = vld [vmem:[%s176_s0 + $0x18] sm:$0xff]  ;;  %v18_v4 = vld [vmem:[%s176_s0 + $0x20] sm:$0xff] }
   0x3   :  { %v108_v41 = vld [vmem:[%s177_s1] ss:$0 sm:$0xff] }
   0x4   :  { %v109_v43 = vld [vmem:[%s178_s2] ss:$0 sm:$0xff] }
   0x6   :  { %21 = vadd.xlane.f32.xlu0 %v15_v2  ;;  %25 = vadd.xlane.f32.xlu1 %v17_v3 }
   0xa   :  { %27 = vadd.xlane.f32.xlu0 %v18_v4 }
  0x8b   :  { %v20_v5 = vpop.xlane.xlu0 %19  ;;  %v24_v6 = vpop.xlane.xlu1 %23 }
  0x8c   :  { %v30_v7 = vmul.f32 0.0078125, %v20_v5  ;;  %v32_v8 = vmul.f32 0.0078125, %v24_v6 }
  0x8e   :  { %v35_v9 = vsub.f32 %v14_v0, %v30_v7  ;;  %v37_v10 = vsub.f32 %v16_v1, %v32_v8 }
  0x8f   :  { %v22_v11 = vpop.xlane.xlu0 %21  ;;  %v26_v12 = vpop.xlane.xlu1 %25 }
  0x90   :  { %v31_v13 = vmul.f32 0.0078125, %v22_v11  ;;  %v40_v14 = vmul.f32 %v35_v9, %v35_v9  ;;  %v33_v15 = vmul.f32 0.0078125, %v26_v12  ;;  %v42_v18 = vmul.f32 %v37_v10, %v37_v10 }
  0x92   :  { %v36_v16 = vsub.f32 %v15_v2, %v31_v13  ;;  %45 = vadd.xlane.f32.xlu1 %v40_v14  ;;  %v38_v17 = vsub.f32 %v17_v3, %v33_v15 }
  0x93   :  { %v28_v19 = vpop.xlane.xlu0 %27 }
  0x94   :  { %v34_v20 = vmul.f32 0.0078125, %v28_v19  ;;  %v41_v21 = vmul.f32 %v36_v16, %v36_v16  ;;  %v43_v23 = vmul.f32 %v38_v17, %v38_v17 }
  0x96   :  { %v39_v22 = vsub.f32 %v18_v4, %v34_v20  ;;  %49 = vadd.xlane.f32.xlu1 %v42_v18  ;;  %47 = vadd.xlane.f32.xlu0 %v41_v21 }
  0x98   :  { %v44_v24 = vmul.f32 %v39_v22, %v39_v22 }
  0x9a   :  { %51 = vadd.xlane.f32.xlu0 %v43_v23  ;;  %53 = vadd.xlane.f32.xlu1 %v44_v24 }
 0x11b   :  { %v46_v25 = vpop.xlane.xlu1 %45 }
 0x11c   :  { %v55_v26 = vmul.f32 0.0078125, %v46_v25 }
 0x11e   :  { %v60_v27 = vadd.f32 0.0001, %v55_v26 }
 0x11f   :  { %v50_v28 = vpop.xlane.xlu1 %49  ;;  %v48_v29 = vpop.xlane.xlu0 %47 }
 0x120   :  { %110 = vrsqrt.f32 %v60_v27  ;;  %v57_v30 = vmul.f32 0.0078125, %v50_v28  ;;  %v56_v31 = vmul.f32 0.0078125, %v48_v29 }
 0x122   :  { %v62_v32 = vadd.f32 0.0001, %v57_v30  ;;  %v61_v33 = vadd.f32 0.0001, %v56_v31 }
 0x123   :  { %v54_v34 = vpop.xlane.xlu1 %53  ;;  %v52_v35 = vpop.xlane.xlu0 %51 }
 0x124   :  { %112 = vrsqrt.f32 %v62_v32  ;;  %v59_v36 = vmul.f32 0.0078125, %v54_v34  ;;  %v58_v37 = vmul.f32 0.0078125, %v52_v35 }
 0x125   :  { %114 = vrsqrt.f32 %v61_v33 }
 0x126   :  { %v64_v38 = vadd.f32 0.0001, %v59_v36  ;;  %v63_v39 = vadd.f32 0.0001, %v58_v37 }
 0x128   :  { %116 = vrsqrt.f32 %v64_v38 }
 0x129   :  { %118 = vrsqrt.f32 %v63_v39 }
 0x12d   :  { %v111_v40 = vpop.eup %110 }
 0x12e   :  { %v70_v42 = vmul.f32 %v111_v40, %v35_v9 }
 0x130   :  { %v82_v44 = vmul.f32 %v108_v41, %v70_v42 }
 0x131   :  { %v113_v45 = vpop.eup %112 }
 0x132   :  { %v115_v46 = vpop.eup %114  ;;  %v94_v47 = vadd.f32 %v109_v43, %v82_v44  ;;  %v72_v48 = vmul.f32 %v113_v45, %v37_v10 }
 0x133   :  { %v71_v49 = vmul.f32 %v115_v46, %v36_v16 }
 0x134   :  { %99 = vst [vmem:[%s179_s3] sm:$0xff] %v94_v47  ;;  %v84_v50 = vmul.f32 %v108_v41, %v72_v48 }
 0x135   :  { %v117_v51 = vpop.eup %116  ;;  %v83_v52 = vmul.f32 %v108_v41, %v71_v49 }
 0x136   :  { %v119_v53 = vpop.eup %118  ;;  %v96_v54 = vadd.f32 %v109_v43, %v84_v50  ;;  %v74_v55 = vmul.f32 %v117_v51, %v39_v22 }
 0x137   :  { %v95_v56 = vadd.f32 %v109_v43, %v83_v52  ;;  %v73_v57 = vmul.f32 %v119_v53, %v38_v17 }
 0x138   :  { %101 = vst [vmem:[%s179_s3 + $0x10] sm:$0xff] %v96_v54  ;;  %v86_v58 = vmul.f32 %v108_v41, %v74_v55 }
 0x139   :  { %100 = vst [vmem:[%s179_s3 + $0x8] sm:$0xff] %v95_v56  ;;  %v85_v59 = vmul.f32 %v108_v41, %v73_v57 }
 0x13a   :  { %v98_v60 = vadd.f32 %v109_v43, %v86_v58 }
 0x13b   :  { %v97_v61 = vadd.f32 %v109_v43, %v85_v59 }
 0x13c   :  { %103 = vst [vmem:[%s179_s3 + $0x20] sm:$0xff] %v98_v60 }
 0x13d   :  { %102 = vst [vmem:[%s179_s3 + $0x18] sm:$0xff] %v97_v61 }

</bundles_post_ra>
